<compile_context>
chip_gen: v5e
topology: v5e:2x2
jax: 0.10.0
libtpu: 0.0.40
codegen_flags: <defaults>
</compile_context>

<pallas_src>
import functools
import math

import jax
import jax.numpy as jnp
from jax.experimental import pallas as pl
from jax.experimental.pallas import tpu as pltpu

D_MODEL = 32
NUM_HEADS = 8
HEAD_DIM = D_MODEL // NUM_HEADS
DIM_FF = 2048               # nn.TransformerEncoderLayer default dim_feedforward
LN_EPS = 1e-5
TRIPLET_MARGIN = 0.2        # TripletLoss hardcodes self.margin = 0.2
PAIRWISE_EPS = 1e-6         # torch pairwise_distance eps
MAX_LEN = 64

# Encoder-layer parameter order shared by init, wrapper and kernel.
_ENC_KEYS = ('wqkv', 'bqkv', 'wo', 'bo', 'ln1_g', 'ln1_b',
             'lin1_w', 'lin1_b', 'lin2_w', 'lin2_b', 'ln2_g', 'ln2_b')


# ----------------------------------------------------------------------------
# In-kernel helpers (pure functions traced inside the Pallas kernel)
# ----------------------------------------------------------------------------
def _layernorm(x, g, b):
    mu = jnp.mean(x, axis=-1, keepdims=True)
    var = jnp.mean((x - mu) ** 2, axis=-1, keepdims=True)
    return (x - mu) * jax.lax.rsqrt(var + LN_EPS) * g + b


def _encoder_cls(xf, batch, seq, params, sel, selT, scale):
    """CLS-row output of a post-LN nn.TransformerEncoderLayer.

    xf    : (batch*seq, D) f32, CLS row first within each sequence.
    sel   : (D, H) 0/1 head-selector, selT its (H, D) transpose.
    Returns (batch, D) f32 CLS embeddings.
    """
    (wqkv, bqkv, wo, bo, ln1g, ln1b, l1w, l1b, l2w, l2b, ln2g, ln2b) = params
    D = wqkv.shape[0]

    # Fused QKV projection, batched over all B*S rows (one weight push).
    qkv = jnp.dot(xf, wqkv, preferred_element_type=jnp.float32) + bqkv  # (B*S,3D)

    o_rows, cls_rows = [], []
    for b in range(batch):                                  # batch is tiny -> unrolled
        lo = b * seq
        rows = qkv[lo:lo + seq, :]                          # (S, 3D)
        q0 = rows[0:1, 0:D] * scale                         # (1, D) CLS query only
        k = rows[:, D:2 * D]                                # (S, D)
        v = rows[:, 2 * D:3 * D]                            # (S, D)
        # All heads' CLS score rows stacked as (H, S) via the selector matmul.
        scores = jax.lax.dot_general(selT, k * q0, (((1,), (1,)), ((), ())),
                                     preferred_element_type=jnp.float32)
        scores = scores - jnp.max(scores, axis=-1, keepdims=True)
        p = jnp.exp(scores)
        p = p * pl.reciprocal(jnp.sum(p, axis=-1, keepdims=True), approx=True)
        # Expand (H, S) -> (S, D) so the PV contraction is one mul + sublane sum.
        pfull = jax.lax.dot_general(p, sel, (((0,), (1,)), ((), ())),
                                    preferred_element_type=jnp.float32)  # (S, D)
        o_rows.append(jnp.sum(pfull * v, axis=0, keepdims=True))         # (1, D)
        cls_rows.append(xf[lo:lo + 1, :])
    o_all = jnp.concatenate(o_rows, axis=0)                 # (B, D)
    x_cls = jnp.concatenate(cls_rows, axis=0)               # (B, D)

    # Single (B,D)@(D,D) output projection, then LN/FFN/LN on CLS rows only.
    sa = jnp.dot(o_all, wo, preferred_element_type=jnp.float32) + bo
    h1 = _layernorm(x_cls + sa, ln1g, ln1b)
    ff = jnp.maximum(jnp.dot(h1.astype(jnp.bfloat16), l1w,
                             preferred_element_type=jnp.float32) + l1b, 0.0)
    ff = jnp.dot(ff.astype(jnp.bfloat16), l2w,
                 preferred_element_type=jnp.float32) + l2b
    return _layernorm(h1 + ff, ln2g, ln2b)


# ----------------------------------------------------------------------------
# The single fused kernel
# ----------------------------------------------------------------------------
def _joint_kernel(text_in_ref, dvis_ref, doc_ref, qry_ref,
                  td_w_ref, td_b_ref, vp_w_ref, vp_b_ref,
                  pe_q_ref, pe_d_ref,
                  t_wqkv, t_bqkv, t_wo, t_bo, t_ln1g, t_ln1b,
                  t_l1w, t_l1b, t_l2w, t_l2b, t_ln2g, t_ln2b,
                  v_wqkv, v_bqkv, v_wo, v_bo, v_ln1g, v_ln1b,
                  v_l1w, v_l1b, v_l2w, v_l2b, v_ln2g, v_ln2b,
                  o_ref, *, batch, s_q, s_d, n_d, n_q, num_heads, margin):
    D = td_b_ref.shape[1]
    hd = D // num_heads
    scale = 1.0 / math.sqrt(hd)

    # Head-selector matrices built once from iota (no per-head micro-matmuls).
    di = jax.lax.broadcasted_iota(jnp.int32, (D, num_heads), 0)
    hi = jax.lax.broadcasted_iota(jnp.int32, (D, num_heads), 1)
    sel = jnp.where((di >= hi * hd) & (di < (hi + 1) * hd), 1.0, 0.0)     # (D, H)
    diT = jax.lax.broadcasted_iota(jnp.int32, (num_heads, D), 1)
    hiT = jax.lax.broadcasted_iota(jnp.int32, (num_heads, D), 0)
    selT = jnp.where((diT >= hiT * hd) & (diT < (hiT + 1) * hd), 1.0, 0.0)  # (H, D)

    # --- Text branch: downscale (one fused matmul over B*S_q rows) + PE ------
    xt = (jnp.dot(text_in_ref[...], td_w_ref[...],
                  preferred_element_type=jnp.float32)
          + td_b_ref[...] + pe_q_ref[...])                                # (B*S_q, D)
    t_params = (t_wqkv[...], t_bqkv[...], t_wo[...], t_bo[...],
                t_ln1g[...], t_ln1b[...], t_l1w[...], t_l1b[...],
                t_l2w[...], t_l2b[...], t_ln2g[...], t_ln2b[...])
    agg_query = _encoder_cls(xt, batch, s_q, t_params, sel, selT, scale)  # (B, D)

    # --- Vision branch: ReLU + project (one fused matmul) + PE ---------------
    xv = (jnp.dot(jnp.maximum(dvis_ref[...], 0.0), vp_w_ref[...],
                  preferred_element_type=jnp.float32)
          + vp_b_ref[...] + pe_d_ref[...])                                # (B*S_d, D)
    v_params = (v_wqkv[...], v_bqkv[...], v_wo[...], v_bo[...],
                v_ln1g[...], v_ln1b[...], v_l1w[...], v_l1b[...],
                v_l2w[...], v_l2b[...], v_ln2g[...], v_ln2b[...])
    agg_doc = _encoder_cls(xv, batch, s_d, v_params, sel, selT, scale)    # (B, D)

    # --- SoftHd (positive + in-kernel rolled negative) + TripletLoss ---------
    # TODO(synk): SoftHd source not provided; soft (Hausdorff-style) set
    # distance: local = symmetric mean-of-min pairwise L2, global = L2 between
    # mean set embeddings.  Doc-side terms hoisted; one stacked dot for [q;n].
    hung_acc = jnp.zeros((), jnp.float32)
    for b in range(batch):
        nb = (b - 1) % batch                    # roll(shift=1) negative index
        d = doc_ref[b * n_d:(b + 1) * n_d, :]                             # (Nd, D)
        q = qry_ref[b * n_q:(b + 1) * n_q, :]                             # (Nq, D)
        n = qry_ref[nb * n_q:(nb + 1) * n_q, :]                           # (Nq, D)
        qn = jnp.concatenate([q, n], axis=0)                              # (2Nq, D)
        d_sq = jnp.sum(d * d, axis=-1, keepdims=True)                     # (Nd, 1)
        qn_sq = jnp.sum(qn * qn, axis=-1, keepdims=True)                  # (2Nq, 1)
        cross = jax.lax.dot_general(d, qn, (((1,), (1,)), ((), ())),
                                    preferred_element_type=jnp.float32)   # (Nd, 2Nq)
        dist = jnp.sqrt(jnp.maximum(d_sq + jnp.transpose(qn_sq) - 2.0 * cross, 0.0))
        dist_p = dist[:, 0:n_q]
        dist_n = dist[:, n_q:2 * n_q]
        lp = 0.5 * (jnp.mean(jnp.min(dist_p, axis=1, keepdims=True))
                    + jnp.mean(jnp.min(dist_p, axis=0, keepdims=True)))
        ln_ = 0.5 * (jnp.mean(jnp.min(dist_n, axis=1, keepdims=True))
                     + jnp.mean(jnp.min(dist_n, axis=0, keepdims=True)))
        dm = jnp.mean(d, axis=0, keepdims=True)
        qm = jnp.mean(q, axis=0, keepdims=True)
        nm = jnp.mean(n, axis=0, keepdims=True)
        gp = jnp.sqrt(jnp.sum((dm - qm) ** 2))
        gn = jnp.sqrt(jnp.sum((dm - nm) ** 2))
        # Reproduces the reference's crossed positional args of TripletLoss:
        #   local_loss  = 0.25 * relu(local_pos - global_pos + m)
        #   global_loss = 0.25 * relu(local_neg - global_neg + m)
        hung_acc = hung_acc + 0.25 * jnp.maximum(lp - gp + margin, 0.0) \
                            + 0.25 * jnp.maximum(ln_ - gn + margin, 0.0)
    loss_hung = hung_acc * (1.0 / batch)

    # torch TripletMarginLoss(doc_embs, query_embs, rolled_query_embs).
    ne = jnp.concatenate([agg_query[batch - 1:batch, :],
                          agg_query[0:batch - 1, :]], axis=0)             # (B, D)
    d_ap = jnp.sqrt(jnp.sum((agg_doc - agg_query + PAIRWISE_EPS) ** 2,
                            axis=-1, keepdims=True))
    d_an = jnp.sqrt(jnp.sum((agg_doc - ne + PAIRWISE_EPS) ** 2,
                            axis=-1, keepdims=True))
    loss_trip = jnp.mean(jnp.maximum(d_ap - d_an + margin, 0.0))

    o_ref[...] = jnp.broadcast_to(loss_hung + loss_trip, (1, 1))


# ----------------------------------------------------------------------------
# Parameter init (weights stored pre-transposed; FFN weights in bf16)
# ----------------------------------------------------------------------------
def _init_dense(key, in_dim, out_dim, scale=0.05):
    """Weight in (in, out) layout and bias (1, out)."""
    kw, kb = jax.random.split(key)
    w = jax.random.uniform(kw, (in_dim, out_dim), jnp.float32, -scale, scale)
    b = jax.random.uniform(kb, (1, out_dim), jnp.float32, -scale, scale)
    return w, b


def _init_encoder_layer(key, d, ff):
    ks = jax.random.split(key, 4)
    in_w, in_b = _init_dense(ks[0], d, 3 * d)            # fused [Q | K | V]
    out_w, out_b = _init_dense(ks[1], d, d)
    l1w, l1b = _init_dense(ks[2], d, ff)
    l2w, l2b = _init_dense(ks[3], ff, d)
    return dict(
        wqkv=in_w, bqkv=in_b, wo=out_w, bo=out_b,
        ln1_g=jnp.ones((1, d), jnp.float32), ln1_b=jnp.zeros((1, d), jnp.float32),
        lin1_w=l1w.astype(jnp.bfloat16), lin1_b=l1b,
        lin2_w=l2w.astype(jnp.bfloat16), lin2_b=l2b,
        ln2_g=jnp.ones((1, d), jnp.float32), ln2_b=jnp.zeros((1, d), jnp.float32))


def _positional_encoding_table(d_model, max_len):
    position = jnp.arange(max_len, dtype=jnp.float32)[:, None]
    div_term = jnp.exp(jnp.arange(0, d_model, 2, dtype=jnp.float32)
                       * (-math.log(10000.0) / d_model))
    pe = jnp.zeros((max_len, d_model), jnp.float32)
    pe = pe.at[:, 0::2].set(jnp.sin(position * div_term))
    pe = pe.at[:, 1::2].set(jnp.cos(position * div_term))
    return pe                                            # (max_len, d_model)


def init_params(key, vocab_size, d_model):
    ks = jax.random.split(key, 6)
    td_w, td_b = _init_dense(ks[2], 2 * d_model, d_model)   # text_downscale
    vp_w, vp_b = _init_dense(ks[3], d_model, d_model)       # vision_project[1]
    return dict(
        v_cls=jax.random.uniform(ks[0], (d_model,), jnp.float32),   # torch.rand
        embedding=jax.random.normal(ks[1], (vocab_size, d_model), jnp.float32),
        td_w=td_w, td_b=td_b, vp_w=vp_w, vp_b=vp_b,
        text_agg=_init_encoder_layer(ks[4], d_model, DIM_FF),
        visual_agg=_init_encoder_layer(ks[5], d_model, DIM_FF),
        pe=_positional_encoding_table(d_model, MAX_LEN),
    )


# ----------------------------------------------------------------------------
# Forward: tiny XLA glue (gather / concats / tiling) + ONE fused pallas_call
# ----------------------------------------------------------------------------
def joint_model_forward(params, dense_doc_features, dense_query_features,
                        query_tokens):
    # TODO(synk): FeatureExtractorCNN + to_dense_batch sources not provided;
    # the kernel starts from the dense per-image feature sets they would emit.
    B, Nq, D = dense_query_features.shape
    Nd = dense_doc_features.shape[1]
    S_q, S_d = Nq + 1, Nd + 1

    visual_cls = jnp.broadcast_to(params['v_cls'], (B, 1, D))
    q_with_cls = jnp.concatenate([visual_cls, dense_query_features], axis=1)
    d_with_cls = jnp.concatenate([visual_cls, dense_doc_features], axis=1)
    tok_emb = params['embedding'][query_tokens]                 # (B, S_q, D)

    # Feature-axis concat folded so text_downscale is one (B*S_q,2D)@(2D,D).
    text_in = jnp.concatenate([q_with_cls, tok_emb], axis=2).reshape(B * S_q, 2 * D)
    dvis_in = d_with_cls.reshape(B * S_d, D)
    pe_q = jnp.tile(params['pe'][:S_q], (B, 1))                 # (B*S_q, D)
    pe_d = jnp.tile(params['pe'][:S_d], (B, 1))                 # (B*S_d, D)
    doc_flat = dense_doc_features.reshape(B * Nd, D)
    qry_flat = dense_query_features.reshape(B * Nq, D)

    enc_t = [params['text_agg'][k] for k in _ENC_KEYS]
    enc_v = [params['visual_agg'][k] for k in _ENC_KEYS]
    inputs = (text_in, dvis_in, doc_flat, qry_flat,
              params['td_w'], params['td_b'], params['vp_w'], params['vp_b'],
              pe_q, pe_d, *enc_t, *enc_v)

    kernel = functools.partial(
        _joint_kernel, batch=B, s_q=S_q, s_d=S_d, n_d=Nd, n_q=Nq,
        num_heads=NUM_HEADS, margin=TRIPLET_MARGIN)

    loss = pl.pallas_call(
        kernel,
        out_shape=jax.ShapeDtypeStruct((1, 1), jnp.float32),
        in_specs=[pl.BlockSpec(memory_space=pltpu.MemorySpace.VMEM)] * len(inputs),
        out_specs=pl.BlockSpec(memory_space=pltpu.MemorySpace.VMEM),
    )(*inputs)
    return loss.reshape(())


if __name__ == "__main__":
    key = jax.random.PRNGKey(0)
    k_par, k_doc, k_qry, k_tok = jax.random.split(key, 4)

    B, Nd, Nq, VOCAB = 2, 8, 8, 100
    params = init_params(k_par, VOCAB, D_MODEL)
    dense_doc = jax.random.normal(k_doc, (B, Nd, D_MODEL), jnp.float32)
    dense_query = jax.random.normal(k_qry, (B, Nq, D_MODEL), jnp.float32)
    query_tokens = jax.random.randint(k_tok, (B, Nq + 1), 0, VOCAB)

    loss = jax.jit(joint_model_forward)(params, dense_doc, dense_query,
                                        query_tokens)
    jax.block_until_ready(loss)
    print("KERNEL_OK")
</pallas_src>

<mosaic_0001>
module attributes {stable_mosaic.version = 11 : i64} {
  func.func @_joint_kernel(%arg0: memref<18x64xf32, #tpu.memory_space<vmem>>, %arg1: memref<18x32xf32, #tpu.memory_space<vmem>>, %arg2: memref<16x32xf32, #tpu.memory_space<vmem>>, %arg3: memref<16x32xf32, #tpu.memory_space<vmem>>, %arg4: memref<64x32xf32, #tpu.memory_space<vmem>>, %arg5: memref<1x32xf32, #tpu.memory_space<vmem>>, %arg6: memref<32x32xf32, #tpu.memory_space<vmem>>, %arg7: memref<1x32xf32, #tpu.memory_space<vmem>>, %arg8: memref<18x32xf32, #tpu.memory_space<vmem>>, %arg9: memref<18x32xf32, #tpu.memory_space<vmem>>, %arg10: memref<32x96xf32, #tpu.memory_space<vmem>>, %arg11: memref<1x96xf32, #tpu.memory_space<vmem>>, %arg12: memref<32x32xf32, #tpu.memory_space<vmem>>, %arg13: memref<1x32xf32, #tpu.memory_space<vmem>>, %arg14: memref<1x32xf32, #tpu.memory_space<vmem>>, %arg15: memref<1x32xf32, #tpu.memory_space<vmem>>, %arg16: memref<32x2048xbf16, #tpu.memory_space<vmem>>, %arg17: memref<1x2048xf32, #tpu.memory_space<vmem>>, %arg18: memref<2048x32xbf16, #tpu.memory_space<vmem>>, %arg19: memref<1x32xf32, #tpu.memory_space<vmem>>, %arg20: memref<1x32xf32, #tpu.memory_space<vmem>>, %arg21: memref<1x32xf32, #tpu.memory_space<vmem>>, %arg22: memref<32x96xf32, #tpu.memory_space<vmem>>, %arg23: memref<1x96xf32, #tpu.memory_space<vmem>>, %arg24: memref<32x32xf32, #tpu.memory_space<vmem>>, %arg25: memref<1x32xf32, #tpu.memory_space<vmem>>, %arg26: memref<1x32xf32, #tpu.memory_space<vmem>>, %arg27: memref<1x32xf32, #tpu.memory_space<vmem>>, %arg28: memref<32x2048xbf16, #tpu.memory_space<vmem>>, %arg29: memref<1x2048xf32, #tpu.memory_space<vmem>>, %arg30: memref<2048x32xbf16, #tpu.memory_space<vmem>>, %arg31: memref<1x32xf32, #tpu.memory_space<vmem>>, %arg32: memref<1x32xf32, #tpu.memory_space<vmem>>, %arg33: memref<1x32xf32, #tpu.memory_space<vmem>>, %arg34: memref<1x1xf32, #tpu.memory_space<vmem>>) attributes {dimension_semantics = [], scalar_prefetch = 0 : i64, scratch_operands = 0 : i64, tpu.core_type = #tpu.core_type<tc>} {
    %0 = tpu.iota {dimensions = array<i32: 0>} : vector<32x8xi32>
    %1 = tpu.iota {dimensions = array<i32: 1>} : vector<32x8xi32>
    %c4_i32 = arith.constant 4 : i32
    %2 = vector.broadcast %c4_i32 : i32 to vector<32x8xi32>
    %3 = arith.muli %1, %2 : vector<32x8xi32>
    %4 = arith.cmpi sge, %0, %3 : vector<32x8xi32>
    %c1_i32 = arith.constant 1 : i32
    %5 = vector.broadcast %c1_i32 : i32 to vector<32x8xi32>
    %6 = arith.addi %1, %5 : vector<32x8xi32>
    %c4_i32_0 = arith.constant 4 : i32
    %7 = vector.broadcast %c4_i32_0 : i32 to vector<32x8xi32>
    %8 = arith.muli %6, %7 : vector<32x8xi32>
    %9 = arith.cmpi slt, %0, %8 : vector<32x8xi32>
    %10 = arith.andi %4, %9 : vector<32x8xi1>
    %cst = arith.constant 1.000000e+00 : f32
    %cst_1 = arith.constant 0.000000e+00 : f32
    %11 = vector.broadcast %cst : f32 to vector<32x8xf32>
    %12 = vector.broadcast %cst_1 : f32 to vector<32x8xf32>
    %13 = arith.select %10, %11, %12 : vector<32x8xi1>, vector<32x8xf32>
    %14 = tpu.iota {dimensions = array<i32: 1>} : vector<8x32xi32>
    %15 = tpu.iota {dimensions = array<i32: 0>} : vector<8x32xi32>
    %c4_i32_2 = arith.constant 4 : i32
    %16 = vector.broadcast %c4_i32_2 : i32 to vector<8x32xi32>
    %17 = arith.muli %15, %16 : vector<8x32xi32>
    %18 = arith.cmpi sge, %14, %17 : vector<8x32xi32>
    %c1_i32_3 = arith.constant 1 : i32
    %19 = vector.broadcast %c1_i32_3 : i32 to vector<8x32xi32>
    %20 = arith.addi %15, %19 : vector<8x32xi32>
    %c4_i32_4 = arith.constant 4 : i32
    %21 = vector.broadcast %c4_i32_4 : i32 to vector<8x32xi32>
    %22 = arith.muli %20, %21 : vector<8x32xi32>
    %23 = arith.cmpi slt, %14, %22 : vector<8x32xi32>
    %24 = arith.andi %18, %23 : vector<8x32xi1>
    %cst_5 = arith.constant 1.000000e+00 : f32
    %cst_6 = arith.constant 0.000000e+00 : f32
    %25 = vector.broadcast %cst_5 : f32 to vector<8x32xf32>
    %26 = vector.broadcast %cst_6 : f32 to vector<8x32xf32>
    %27 = arith.select %24, %25, %26 : vector<8x32xi1>, vector<8x32xf32>
    %c0 = arith.constant 0 : index
    %c0_7 = arith.constant 0 : index
    %28 = vector.load %arg0[%c0, %c0_7] : memref<18x64xf32, #tpu.memory_space<vmem>>, vector<18x64xf32>
    %c0_8 = arith.constant 0 : index
    %c0_9 = arith.constant 0 : index
    %29 = vector.load %arg4[%c0_8, %c0_9] : memref<64x32xf32, #tpu.memory_space<vmem>>, vector<64x32xf32>
    %cst_10 = arith.constant dense<0.000000e+00> : vector<18x32xf32>
    %30 = tpu.matmul %28, %29, %cst_10 {dimension_numbers = #tpu.dot_dimension_numbers<[1], [0], [0], [1], [0, 0, 1, 1], [], []>} : vector<18x64xf32>, vector<64x32xf32>, vector<18x32xf32> -> vector<18x32xf32>
    %c0_11 = arith.constant 0 : index
    %c0_12 = arith.constant 0 : index
    %31 = vector.load %arg5[%c0_11, %c0_12] : memref<1x32xf32, #tpu.memory_space<vmem>>, vector<1x32xf32>
    %32 = vector.broadcast %31 : vector<1x32xf32> to vector<18x32xf32>
    %33 = arith.addf %30, %32 : vector<18x32xf32>
    %c0_13 = arith.constant 0 : index
    %c0_14 = arith.constant 0 : index
    %34 = vector.load %arg8[%c0_13, %c0_14] : memref<18x32xf32, #tpu.memory_space<vmem>>, vector<18x32xf32>
    %35 = arith.addf %33, %34 : vector<18x32xf32>
    %c0_15 = arith.constant 0 : index
    %c0_16 = arith.constant 0 : index
    %36 = vector.load %arg10[%c0_15, %c0_16] : memref<32x96xf32, #tpu.memory_space<vmem>>, vector<32x96xf32>
    %c0_17 = arith.constant 0 : index
    %c0_18 = arith.constant 0 : index
    %37 = vector.load %arg11[%c0_17, %c0_18] : memref<1x96xf32, #tpu.memory_space<vmem>>, vector<1x96xf32>
    %c0_19 = arith.constant 0 : index
    %c0_20 = arith.constant 0 : index
    %38 = vector.load %arg12[%c0_19, %c0_20] : memref<32x32xf32, #tpu.memory_space<vmem>>, vector<32x32xf32>
    %c0_21 = arith.constant 0 : index
    %c0_22 = arith.constant 0 : index
    %39 = vector.load %arg13[%c0_21, %c0_22] : memref<1x32xf32, #tpu.memory_space<vmem>>, vector<1x32xf32>
    %c0_23 = arith.constant 0 : index
    %c0_24 = arith.constant 0 : index
    %40 = vector.load %arg14[%c0_23, %c0_24] : memref<1x32xf32, #tpu.memory_space<vmem>>, vector<1x32xf32>
    %c0_25 = arith.constant 0 : index
    %c0_26 = arith.constant 0 : index
    %41 = vector.load %arg15[%c0_25, %c0_26] : memref<1x32xf32, #tpu.memory_space<vmem>>, vector<1x32xf32>
    %c0_27 = arith.constant 0 : index
    %c0_28 = arith.constant 0 : index
    %42 = vector.load %arg16[%c0_27, %c0_28] : memref<32x2048xbf16, #tpu.memory_space<vmem>>, vector<32x2048xbf16>
    %c0_29 = arith.constant 0 : index
    %c0_30 = arith.constant 0 : index
    %43 = vector.load %arg17[%c0_29, %c0_30] : memref<1x2048xf32, #tpu.memory_space<vmem>>, vector<1x2048xf32>
    %c0_31 = arith.constant 0 : index
    %c0_32 = arith.constant 0 : index
    %44 = vector.load %arg18[%c0_31, %c0_32] : memref<2048x32xbf16, #tpu.memory_space<vmem>>, vector<2048x32xbf16>
    %c0_33 = arith.constant 0 : index
    %c0_34 = arith.constant 0 : index
    %45 = vector.load %arg19[%c0_33, %c0_34] : memref<1x32xf32, #tpu.memory_space<vmem>>, vector<1x32xf32>
    %c0_35 = arith.constant 0 : index
    %c0_36 = arith.constant 0 : index
    %46 = vector.load %arg20[%c0_35, %c0_36] : memref<1x32xf32, #tpu.memory_space<vmem>>, vector<1x32xf32>
    %c0_37 = arith.constant 0 : index
    %c0_38 = arith.constant 0 : index
    %47 = vector.load %arg21[%c0_37, %c0_38] : memref<1x32xf32, #tpu.memory_space<vmem>>, vector<1x32xf32>
    %cst_39 = arith.constant dense<0.000000e+00> : vector<18x96xf32>
    %48 = tpu.matmul %35, %36, %cst_39 {dimension_numbers = #tpu.dot_dimension_numbers<[1], [0], [0], [1], [0, 0, 1, 1], [], []>} : vector<18x32xf32>, vector<32x96xf32>, vector<18x96xf32> -> vector<18x96xf32>
    %49 = vector.broadcast %37 : vector<1x96xf32> to vector<18x96xf32>
    %50 = arith.addf %48, %49 : vector<18x96xf32>
    %51 = vector.extract_strided_slice %50 {offsets = [0, 0], sizes = [9, 96], strides = [1, 1]} : vector<18x96xf32> to vector<9x96xf32>
    %52 = vector.extract_strided_slice %51 {offsets = [0, 0], sizes = [1, 32], strides = [1, 1]} : vector<9x96xf32> to vector<1x32xf32>
    %cst_40 = arith.constant 5.000000e-01 : f32
    %53 = vector.broadcast %cst_40 : f32 to vector<1x32xf32>
    %54 = arith.mulf %52, %53 : vector<1x32xf32>
    %55 = vector.extract_strided_slice %51 {offsets = [0, 32], sizes = [9, 32], strides = [1, 1]} : vector<9x96xf32> to vector<9x32xf32>
    %56 = vector.extract_strided_slice %51 {offsets = [0, 64], sizes = [9, 32], strides = [1, 1]} : vector<9x96xf32> to vector<9x32xf32>
    %57 = vector.broadcast %54 : vector<1x32xf32> to vector<9x32xf32>
    %58 = arith.mulf %55, %57 : vector<9x32xf32>
    %cst_41 = arith.constant dense<0.000000e+00> : vector<8x9xf32>
    %59 = tpu.matmul %27, %58, %cst_41 {dimension_numbers = #tpu.dot_dimension_numbers<[1], [1], [0], [0], [0, 0, 1, 0], [], []>} : vector<8x32xf32>, vector<9x32xf32>, vector<8x9xf32> -> vector<8x9xf32>
    %cst_42 = arith.constant dense<0xFF800000> : vector<8xf32>
    %60 = vector.multi_reduction <maximumf>, %59, %cst_42 [1] : vector<8x9xf32> to vector<8xf32>
    %61 = vector.shape_cast %60 : vector<8xf32> to vector<8x1xf32>
    %62 = vector.broadcast %61 : vector<8x1xf32> to vector<8x9xf32>
    %63 = arith.subf %59, %62 : vector<8x9xf32>
    %64 = math.exp %63 : vector<8x9xf32>
    %cst_43 = arith.constant dense<0.000000e+00> : vector<8xf32>
    %65 = vector.multi_reduction <add>, %64, %cst_43 [1] : vector<8x9xf32> to vector<8xf32>
    %66 = vector.shape_cast %65 : vector<8xf32> to vector<8x1xf32>
    %67 = tpu.reciprocal %66 {approx = true} : vector<8x1xf32> -> vector<8x1xf32>
    %68 = vector.broadcast %67 : vector<8x1xf32> to vector<8x9xf32>
    %69 = arith.mulf %64, %68 : vector<8x9xf32>
    %cst_44 = arith.constant dense<0.000000e+00> : vector<9x32xf32>
    %70 = tpu.matmul %69, %13, %cst_44 {dimension_numbers = #tpu.dot_dimension_numbers<[0], [1], [1], [0], [0, 1, 1, 0], [], []>} : vector<8x9xf32>, vector<32x8xf32>, vector<9x32xf32> -> vector<9x32xf32>
    %71 = arith.mulf %70, %56 : vector<9x32xf32>
    %cst_45 = arith.constant dense<0.000000e+00> : vector<32xf32>
    %72 = vector.multi_reduction <add>, %71, %cst_45 [0] : vector<9x32xf32> to vector<32xf32>
    %73 = vector.shape_cast %72 : vector<32xf32> to vector<1x32xf32>
    %74 = vector.extract_strided_slice %35 {offsets = [0, 0], sizes = [1, 32], strides = [1, 1]} : vector<18x32xf32> to vector<1x32xf32>
    %75 = vector.extract_strided_slice %50 {offsets = [9, 0], sizes = [9, 96], strides = [1, 1]} : vector<18x96xf32> to vector<9x96xf32>
    %76 = vector.extract_strided_slice %75 {offsets = [0, 0], sizes = [1, 32], strides = [1, 1]} : vector<9x96xf32> to vector<1x32xf32>
    %cst_46 = arith.constant 5.000000e-01 : f32
    %77 = vector.broadcast %cst_46 : f32 to vector<1x32xf32>
    %78 = arith.mulf %76, %77 : vector<1x32xf32>
    %79 = vector.extract_strided_slice %75 {offsets = [0, 32], sizes = [9, 32], strides = [1, 1]} : vector<9x96xf32> to vector<9x32xf32>
    %80 = vector.extract_strided_slice %75 {offsets = [0, 64], sizes = [9, 32], strides = [1, 1]} : vector<9x96xf32> to vector<9x32xf32>
    %81 = vector.broadcast %78 : vector<1x32xf32> to vector<9x32xf32>
    %82 = arith.mulf %79, %81 : vector<9x32xf32>
    %cst_47 = arith.constant dense<0.000000e+00> : vector<8x9xf32>
    %83 = tpu.matmul %27, %82, %cst_47 {dimension_numbers = #tpu.dot_dimension_numbers<[1], [1], [0], [0], [0, 0, 1, 0], [], []>} : vector<8x32xf32>, vector<9x32xf32>, vector<8x9xf32> -> vector<8x9xf32>
    %cst_48 = arith.constant dense<0xFF800000> : vector<8xf32>
    %84 = vector.multi_reduction <maximumf>, %83, %cst_48 [1] : vector<8x9xf32> to vector<8xf32>
    %85 = vector.shape_cast %84 : vector<8xf32> to vector<8x1xf32>
    %86 = vector.broadcast %85 : vector<8x1xf32> to vector<8x9xf32>
    %87 = arith.subf %83, %86 : vector<8x9xf32>
    %88 = math.exp %87 : vector<8x9xf32>
    %cst_49 = arith.constant dense<0.000000e+00> : vector<8xf32>
    %89 = vector.multi_reduction <add>, %88, %cst_49 [1] : vector<8x9xf32> to vector<8xf32>
    %90 = vector.shape_cast %89 : vector<8xf32> to vector<8x1xf32>
    %91 = tpu.reciprocal %90 {approx = true} : vector<8x1xf32> -> vector<8x1xf32>
    %92 = vector.broadcast %91 : vector<8x1xf32> to vector<8x9xf32>
    %93 = arith.mulf %88, %92 : vector<8x9xf32>
    %cst_50 = arith.constant dense<0.000000e+00> : vector<9x32xf32>
    %94 = tpu.matmul %93, %13, %cst_50 {dimension_numbers = #tpu.dot_dimension_numbers<[0], [1], [1], [0], [0, 1, 1, 0], [], []>} : vector<8x9xf32>, vector<32x8xf32>, vector<9x32xf32> -> vector<9x32xf32>
    %95 = arith.mulf %94, %80 : vector<9x32xf32>
    %cst_51 = arith.constant dense<0.000000e+00> : vector<32xf32>
    %96 = vector.multi_reduction <add>, %95, %cst_51 [0] : vector<9x32xf32> to vector<32xf32>
    %97 = vector.shape_cast %96 : vector<32xf32> to vector<1x32xf32>
    %98 = vector.extract_strided_slice %35 {offsets = [9, 0], sizes = [1, 32], strides = [1, 1]} : vector<18x32xf32> to vector<1x32xf32>
    %99 = tpu.concatenate %73, %97 in 0 : vector<1x32xf32>, vector<1x32xf32> -> vector<2x32xf32>
    %100 = tpu.concatenate %74, %98 in 0 : vector<1x32xf32>, vector<1x32xf32> -> vector<2x32xf32>
    %cst_52 = arith.constant dense<0.000000e+00> : vector<2x32xf32>
    %101 = tpu.matmul %99, %38, %cst_52 {dimension_numbers = #tpu.dot_dimension_numbers<[1], [0], [0], [1], [0, 0, 1, 1], [], []>} : vector<2x32xf32>, vector<32x32xf32>, vector<2x32xf32> -> vector<2x32xf32>
    %102 = vector.broadcast %39 : vector<1x32xf32> to vector<2x32xf32>
    %103 = arith.addf %101, %102 : vector<2x32xf32>
    %104 = arith.addf %100, %103 : vector<2x32xf32>
    %cst_53 = arith.constant dense<0.000000e+00> : vector<2xf32>
    %105 = vector.multi_reduction <add>, %104, %cst_53 [1] : vector<2x32xf32> to vector<2xf32>
    %106 = vector.shape_cast %105 : vector<2xf32> to vector<2x1xf32>
    %cst_54 = arith.constant 3.200000e+01 : f32
    %107 = vector.broadcast %cst_54 : f32 to vector<2x1xf32>
    %108 = arith.divf %106, %107 : vector<2x1xf32>
    %109 = vector.broadcast %108 : vector<2x1xf32> to vector<2x32xf32>
    %110 = arith.subf %104, %109 : vector<2x32xf32>
    %111 = arith.mulf %110, %110 : vector<2x32xf32>
    %cst_55 = arith.constant dense<0.000000e+00> : vector<2xf32>
    %112 = vector.multi_reduction <add>, %111, %cst_55 [1] : vector<2x32xf32> to vector<2xf32>
    %113 = vector.shape_cast %112 : vector<2xf32> to vector<2x1xf32>
    %cst_56 = arith.constant 3.200000e+01 : f32
    %114 = vector.broadcast %cst_56 : f32 to vector<2x1xf32>
    %115 = arith.divf %113, %114 : vector<2x1xf32>
    %116 = vector.broadcast %108 : vector<2x1xf32> to vector<2x32xf32>
    %117 = arith.subf %104, %116 : vector<2x32xf32>
    %cst_57 = arith.constant 9.99999974E-6 : f32
    %118 = vector.broadcast %cst_57 : f32 to vector<2x1xf32>
    %119 = arith.addf %115, %118 : vector<2x1xf32>
    %120 = math.rsqrt %119 : vector<2x1xf32>
    %121 = vector.broadcast %120 : vector<2x1xf32> to vector<2x32xf32>
    %122 = arith.mulf %117, %121 : vector<2x32xf32>
    %123 = vector.broadcast %40 : vector<1x32xf32> to vector<2x32xf32>
    %124 = arith.mulf %122, %123 : vector<2x32xf32>
    %125 = vector.broadcast %41 : vector<1x32xf32> to vector<2x32xf32>
    %126 = arith.addf %124, %125 : vector<2x32xf32>
    %127 = arith.truncf %126 : vector<2x32xf32> to vector<2x32xbf16>
    %cst_58 = arith.constant dense<0.000000e+00> : vector<2x2048xf32>
    %128 = tpu.matmul %127, %42, %cst_58 {dimension_numbers = #tpu.dot_dimension_numbers<[1], [0], [0], [1], [0, 0, 1, 1], [], []>} : vector<2x32xbf16>, vector<32x2048xbf16>, vector<2x2048xf32> -> vector<2x2048xf32>
    %129 = vector.broadcast %43 : vector<1x2048xf32> to vector<2x2048xf32>
    %130 = arith.addf %128, %129 : vector<2x2048xf32>
    %cst_59 = arith.constant 0.000000e+00 : f32
    %131 = vector.broadcast %cst_59 : f32 to vector<2x2048xf32>
    %132 = arith.maximumf %130, %131 : vector<2x2048xf32>
    %133 = arith.truncf %132 : vector<2x2048xf32> to vector<2x2048xbf16>
    %cst_60 = arith.constant dense<0.000000e+00> : vector<2x32xf32>
    %134 = tpu.matmul %133, %44, %cst_60 {dimension_numbers = #tpu.dot_dimension_numbers<[1], [0], [0], [1], [0, 0, 1, 1], [], []>} : vector<2x2048xbf16>, vector<2048x32xbf16>, vector<2x32xf32> -> vector<2x32xf32>
    %135 = vector.broadcast %45 : vector<1x32xf32> to vector<2x32xf32>
    %136 = arith.addf %134, %135 : vector<2x32xf32>
    %137 = arith.addf %126, %136 : vector<2x32xf32>
    %cst_61 = arith.constant dense<0.000000e+00> : vector<2xf32>
    %138 = vector.multi_reduction <add>, %137, %cst_61 [1] : vector<2x32xf32> to vector<2xf32>
    %139 = vector.shape_cast %138 : vector<2xf32> to vector<2x1xf32>
    %cst_62 = arith.constant 3.200000e+01 : f32
    %140 = vector.broadcast %cst_62 : f32 to vector<2x1xf32>
    %141 = arith.divf %139, %140 : vector<2x1xf32>
    %142 = vector.broadcast %141 : vector<2x1xf32> to vector<2x32xf32>
    %143 = arith.subf %137, %142 : vector<2x32xf32>
    %144 = arith.mulf %143, %143 : vector<2x32xf32>
    %cst_63 = arith.constant dense<0.000000e+00> : vector<2xf32>
    %145 = vector.multi_reduction <add>, %144, %cst_63 [1] : vector<2x32xf32> to vector<2xf32>
    %146 = vector.shape_cast %145 : vector<2xf32> to vector<2x1xf32>
    %cst_64 = arith.constant 3.200000e+01 : f32
    %147 = vector.broadcast %cst_64 : f32 to vector<2x1xf32>
    %148 = arith.divf %146, %147 : vector<2x1xf32>
    %149 = vector.broadcast %141 : vector<2x1xf32> to vector<2x32xf32>
    %150 = arith.subf %137, %149 : vector<2x32xf32>
    %cst_65 = arith.constant 9.99999974E-6 : f32
    %151 = vector.broadcast %cst_65 : f32 to vector<2x1xf32>
    %152 = arith.addf %148, %151 : vector<2x1xf32>
    %153 = math.rsqrt %152 : vector<2x1xf32>
    %154 = vector.broadcast %153 : vector<2x1xf32> to vector<2x32xf32>
    %155 = arith.mulf %150, %154 : vector<2x32xf32>
    %156 = vector.broadcast %46 : vector<1x32xf32> to vector<2x32xf32>
    %157 = arith.mulf %155, %156 : vector<2x32xf32>
    %158 = vector.broadcast %47 : vector<1x32xf32> to vector<2x32xf32>
    %159 = arith.addf %157, %158 : vector<2x32xf32>
    %c0_66 = arith.constant 0 : index
    %c0_67 = arith.constant 0 : index
    %160 = vector.load %arg1[%c0_66, %c0_67] : memref<18x32xf32, #tpu.memory_space<vmem>>, vector<18x32xf32>
    %cst_68 = arith.constant 0.000000e+00 : f32
    %161 = vector.broadcast %cst_68 : f32 to vector<18x32xf32>
    %162 = arith.maximumf %160, %161 : vector<18x32xf32>
    %c0_69 = arith.constant 0 : index
    %c0_70 = arith.constant 0 : index
    %163 = vector.load %arg6[%c0_69, %c0_70] : memref<32x32xf32, #tpu.memory_space<vmem>>, vector<32x32xf32>
    %cst_71 = arith.constant dense<0.000000e+00> : vector<18x32xf32>
    %164 = tpu.matmul %162, %163, %cst_71 {dimension_numbers = #tpu.dot_dimension_numbers<[1], [0], [0], [1], [0, 0, 1, 1], [], []>} : vector<18x32xf32>, vector<32x32xf32>, vector<18x32xf32> -> vector<18x32xf32>
    %c0_72 = arith.constant 0 : index
    %c0_73 = arith.constant 0 : index
    %165 = vector.load %arg7[%c0_72, %c0_73] : memref<1x32xf32, #tpu.memory_space<vmem>>, vector<1x32xf32>
    %166 = vector.broadcast %165 : vector<1x32xf32> to vector<18x32xf32>
    %167 = arith.addf %164, %166 : vector<18x32xf32>
    %c0_74 = arith.constant 0 : index
    %c0_75 = arith.constant 0 : index
    %168 = vector.load %arg9[%c0_74, %c0_75] : memref<18x32xf32, #tpu.memory_space<vmem>>, vector<18x32xf32>
    %169 = arith.addf %167, %168 : vector<18x32xf32>
    %c0_76 = arith.constant 0 : index
    %c0_77 = arith.constant 0 : index
    %170 = vector.load %arg22[%c0_76, %c0_77] : memref<32x96xf32, #tpu.memory_space<vmem>>, vector<32x96xf32>
    %c0_78 = arith.constant 0 : index
    %c0_79 = arith.constant 0 : index
    %171 = vector.load %arg23[%c0_78, %c0_79] : memref<1x96xf32, #tpu.memory_space<vmem>>, vector<1x96xf32>
    %c0_80 = arith.constant 0 : index
    %c0_81 = arith.constant 0 : index
    %172 = vector.load %arg24[%c0_80, %c0_81] : memref<32x32xf32, #tpu.memory_space<vmem>>, vector<32x32xf32>
    %c0_82 = arith.constant 0 : index
    %c0_83 = arith.constant 0 : index
    %173 = vector.load %arg25[%c0_82, %c0_83] : memref<1x32xf32, #tpu.memory_space<vmem>>, vector<1x32xf32>
    %c0_84 = arith.constant 0 : index
    %c0_85 = arith.constant 0 : index
    %174 = vector.load %arg26[%c0_84, %c0_85] : memref<1x32xf32, #tpu.memory_space<vmem>>, vector<1x32xf32>
    %c0_86 = arith.constant 0 : index
    %c0_87 = arith.constant 0 : index
    %175 = vector.load %arg27[%c0_86, %c0_87] : memref<1x32xf32, #tpu.memory_space<vmem>>, vector<1x32xf32>
    %c0_88 = arith.constant 0 : index
    %c0_89 = arith.constant 0 : index
    %176 = vector.load %arg28[%c0_88, %c0_89] : memref<32x2048xbf16, #tpu.memory_space<vmem>>, vector<32x2048xbf16>
    %c0_90 = arith.constant 0 : index
    %c0_91 = arith.constant 0 : index
    %177 = vector.load %arg29[%c0_90, %c0_91] : memref<1x2048xf32, #tpu.memory_space<vmem>>, vector<1x2048xf32>
    %c0_92 = arith.constant 0 : index
    %c0_93 = arith.constant 0 : index
    %178 = vector.load %arg30[%c0_92, %c0_93] : memref<2048x32xbf16, #tpu.memory_space<vmem>>, vector<2048x32xbf16>
    %c0_94 = arith.constant 0 : index
    %c0_95 = arith.constant 0 : index
    %179 = vector.load %arg31[%c0_94, %c0_95] : memref<1x32xf32, #tpu.memory_space<vmem>>, vector<1x32xf32>
    %c0_96 = arith.constant 0 : index
    %c0_97 = arith.constant 0 : index
    %180 = vector.load %arg32[%c0_96, %c0_97] : memref<1x32xf32, #tpu.memory_space<vmem>>, vector<1x32xf32>
    %c0_98 = arith.constant 0 : index
    %c0_99 = arith.constant 0 : index
    %181 = vector.load %arg33[%c0_98, %c0_99] : memref<1x32xf32, #tpu.memory_space<vmem>>, vector<1x32xf32>
    %cst_100 = arith.constant dense<0.000000e+00> : vector<18x96xf32>
    %182 = tpu.matmul %169, %170, %cst_100 {dimension_numbers = #tpu.dot_dimension_numbers<[1], [0], [0], [1], [0, 0, 1, 1], [], []>} : vector<18x32xf32>, vector<32x96xf32>, vector<18x96xf32> -> vector<18x96xf32>
    %183 = vector.broadcast %171 : vector<1x96xf32> to vector<18x96xf32>
    %184 = arith.addf %182, %183 : vector<18x96xf32>
    %185 = vector.extract_strided_slice %184 {offsets = [0, 0], sizes = [9, 96], strides = [1, 1]} : vector<18x96xf32> to vector<9x96xf32>
    %186 = vector.extract_strided_slice %185 {offsets = [0, 0], sizes = [1, 32], strides = [1, 1]} : vector<9x96xf32> to vector<1x32xf32>
    %cst_101 = arith.constant 5.000000e-01 : f32
    %187 = vector.broadcast %cst_101 : f32 to vector<1x32xf32>
    %188 = arith.mulf %186, %187 : vector<1x32xf32>
    %189 = vector.extract_strided_slice %185 {offsets = [0, 32], sizes = [9, 32], strides = [1, 1]} : vector<9x96xf32> to vector<9x32xf32>
    %190 = vector.extract_strided_slice %185 {offsets = [0, 64], sizes = [9, 32], strides = [1, 1]} : vector<9x96xf32> to vector<9x32xf32>
    %191 = vector.broadcast %188 : vector<1x32xf32> to vector<9x32xf32>
    %192 = arith.mulf %189, %191 : vector<9x32xf32>
    %cst_102 = arith.constant dense<0.000000e+00> : vector<8x9xf32>
    %193 = tpu.matmul %27, %192, %cst_102 {dimension_numbers = #tpu.dot_dimension_numbers<[1], [1], [0], [0], [0, 0, 1, 0], [], []>} : vector<8x32xf32>, vector<9x32xf32>, vector<8x9xf32> -> vector<8x9xf32>
    %cst_103 = arith.constant dense<0xFF800000> : vector<8xf32>
    %194 = vector.multi_reduction <maximumf>, %193, %cst_103 [1] : vector<8x9xf32> to vector<8xf32>
    %195 = vector.shape_cast %194 : vector<8xf32> to vector<8x1xf32>
    %196 = vector.broadcast %195 : vector<8x1xf32> to vector<8x9xf32>
    %197 = arith.subf %193, %196 : vector<8x9xf32>
    %198 = math.exp %197 : vector<8x9xf32>
    %cst_104 = arith.constant dense<0.000000e+00> : vector<8xf32>
    %199 = vector.multi_reduction <add>, %198, %cst_104 [1] : vector<8x9xf32> to vector<8xf32>
    %200 = vector.shape_cast %199 : vector<8xf32> to vector<8x1xf32>
    %201 = tpu.reciprocal %200 {approx = true} : vector<8x1xf32> -> vector<8x1xf32>
    %202 = vector.broadcast %201 : vector<8x1xf32> to vector<8x9xf32>
    %203 = arith.mulf %198, %202 : vector<8x9xf32>
    %cst_105 = arith.constant dense<0.000000e+00> : vector<9x32xf32>
    %204 = tpu.matmul %203, %13, %cst_105 {dimension_numbers = #tpu.dot_dimension_numbers<[0], [1], [1], [0], [0, 1, 1, 0], [], []>} : vector<8x9xf32>, vector<32x8xf32>, vector<9x32xf32> -> vector<9x32xf32>
    %205 = arith.mulf %204, %190 : vector<9x32xf32>
    %cst_106 = arith.constant dense<0.000000e+00> : vector<32xf32>
    %206 = vector.multi_reduction <add>, %205, %cst_106 [0] : vector<9x32xf32> to vector<32xf32>
    %207 = vector.shape_cast %206 : vector<32xf32> to vector<1x32xf32>
    %208 = vector.extract_strided_slice %169 {offsets = [0, 0], sizes = [1, 32], strides = [1, 1]} : vector<18x32xf32> to vector<1x32xf32>
    %209 = vector.extract_strided_slice %184 {offsets = [9, 0], sizes = [9, 96], strides = [1, 1]} : vector<18x96xf32> to vector<9x96xf32>
    %210 = vector.extract_strided_slice %209 {offsets = [0, 0], sizes = [1, 32], strides = [1, 1]} : vector<9x96xf32> to vector<1x32xf32>
    %cst_107 = arith.constant 5.000000e-01 : f32
    %211 = vector.broadcast %cst_107 : f32 to vector<1x32xf32>
    %212 = arith.mulf %210, %211 : vector<1x32xf32>
    %213 = vector.extract_strided_slice %209 {offsets = [0, 32], sizes = [9, 32], strides = [1, 1]} : vector<9x96xf32> to vector<9x32xf32>
    %214 = vector.extract_strided_slice %209 {offsets = [0, 64], sizes = [9, 32], strides = [1, 1]} : vector<9x96xf32> to vector<9x32xf32>
    %215 = vector.broadcast %212 : vector<1x32xf32> to vector<9x32xf32>
    %216 = arith.mulf %213, %215 : vector<9x32xf32>
    %cst_108 = arith.constant dense<0.000000e+00> : vector<8x9xf32>
    %217 = tpu.matmul %27, %216, %cst_108 {dimension_numbers = #tpu.dot_dimension_numbers<[1], [1], [0], [0], [0, 0, 1, 0], [], []>} : vector<8x32xf32>, vector<9x32xf32>, vector<8x9xf32> -> vector<8x9xf32>
    %cst_109 = arith.constant dense<0xFF800000> : vector<8xf32>
    %218 = vector.multi_reduction <maximumf>, %217, %cst_109 [1] : vector<8x9xf32> to vector<8xf32>
    %219 = vector.shape_cast %218 : vector<8xf32> to vector<8x1xf32>
    %220 = vector.broadcast %219 : vector<8x1xf32> to vector<8x9xf32>
    %221 = arith.subf %217, %220 : vector<8x9xf32>
    %222 = math.exp %221 : vector<8x9xf32>
    %cst_110 = arith.constant dense<0.000000e+00> : vector<8xf32>
    %223 = vector.multi_reduction <add>, %222, %cst_110 [1] : vector<8x9xf32> to vector<8xf32>
    %224 = vector.shape_cast %223 : vector<8xf32> to vector<8x1xf32>
    %225 = tpu.reciprocal %224 {approx = true} : vector<8x1xf32> -> vector<8x1xf32>
    %226 = vector.broadcast %225 : vector<8x1xf32> to vector<8x9xf32>
    %227 = arith.mulf %222, %226 : vector<8x9xf32>
    %cst_111 = arith.constant dense<0.000000e+00> : vector<9x32xf32>
    %228 = tpu.matmul %227, %13, %cst_111 {dimension_numbers = #tpu.dot_dimension_numbers<[0], [1], [1], [0], [0, 1, 1, 0], [], []>} : vector<8x9xf32>, vector<32x8xf32>, vector<9x32xf32> -> vector<9x32xf32>
    %229 = arith.mulf %228, %214 : vector<9x32xf32>
    %cst_112 = arith.constant dense<0.000000e+00> : vector<32xf32>
    %230 = vector.multi_reduction <add>, %229, %cst_112 [0] : vector<9x32xf32> to vector<32xf32>
    %231 = vector.shape_cast %230 : vector<32xf32> to vector<1x32xf32>
    %232 = vector.extract_strided_slice %169 {offsets = [9, 0], sizes = [1, 32], strides = [1, 1]} : vector<18x32xf32> to vector<1x32xf32>
    %233 = tpu.concatenate %207, %231 in 0 : vector<1x32xf32>, vector<1x32xf32> -> vector<2x32xf32>
    %234 = tpu.concatenate %208, %232 in 0 : vector<1x32xf32>, vector<1x32xf32> -> vector<2x32xf32>
    %cst_113 = arith.constant dense<0.000000e+00> : vector<2x32xf32>
    %235 = tpu.matmul %233, %172, %cst_113 {dimension_numbers = #tpu.dot_dimension_numbers<[1], [0], [0], [1], [0, 0, 1, 1], [], []>} : vector<2x32xf32>, vector<32x32xf32>, vector<2x32xf32> -> vector<2x32xf32>
    %236 = vector.broadcast %173 : vector<1x32xf32> to vector<2x32xf32>
    %237 = arith.addf %235, %236 : vector<2x32xf32>
    %238 = arith.addf %234, %237 : vector<2x32xf32>
    %cst_114 = arith.constant dense<0.000000e+00> : vector<2xf32>
    %239 = vector.multi_reduction <add>, %238, %cst_114 [1] : vector<2x32xf32> to vector<2xf32>
    %240 = vector.shape_cast %239 : vector<2xf32> to vector<2x1xf32>
    %cst_115 = arith.constant 3.200000e+01 : f32
    %241 = vector.broadcast %cst_115 : f32 to vector<2x1xf32>
    %242 = arith.divf %240, %241 : vector<2x1xf32>
    %243 = vector.broadcast %242 : vector<2x1xf32> to vector<2x32xf32>
    %244 = arith.subf %238, %243 : vector<2x32xf32>
    %245 = arith.mulf %244, %244 : vector<2x32xf32>
    %cst_116 = arith.constant dense<0.000000e+00> : vector<2xf32>
    %246 = vector.multi_reduction <add>, %245, %cst_116 [1] : vector<2x32xf32> to vector<2xf32>
    %247 = vector.shape_cast %246 : vector<2xf32> to vector<2x1xf32>
    %cst_117 = arith.constant 3.200000e+01 : f32
    %248 = vector.broadcast %cst_117 : f32 to vector<2x1xf32>
    %249 = arith.divf %247, %248 : vector<2x1xf32>
    %250 = vector.broadcast %242 : vector<2x1xf32> to vector<2x32xf32>
    %251 = arith.subf %238, %250 : vector<2x32xf32>
    %cst_118 = arith.constant 9.99999974E-6 : f32
    %252 = vector.broadcast %cst_118 : f32 to vector<2x1xf32>
    %253 = arith.addf %249, %252 : vector<2x1xf32>
    %254 = math.rsqrt %253 : vector<2x1xf32>
    %255 = vector.broadcast %254 : vector<2x1xf32> to vector<2x32xf32>
    %256 = arith.mulf %251, %255 : vector<2x32xf32>
    %257 = vector.broadcast %174 : vector<1x32xf32> to vector<2x32xf32>
    %258 = arith.mulf %256, %257 : vector<2x32xf32>
    %259 = vector.broadcast %175 : vector<1x32xf32> to vector<2x32xf32>
    %260 = arith.addf %258, %259 : vector<2x32xf32>
    %261 = arith.truncf %260 : vector<2x32xf32> to vector<2x32xbf16>
    %cst_119 = arith.constant dense<0.000000e+00> : vector<2x2048xf32>
    %262 = tpu.matmul %261, %176, %cst_119 {dimension_numbers = #tpu.dot_dimension_numbers<[1], [0], [0], [1], [0, 0, 1, 1], [], []>} : vector<2x32xbf16>, vector<32x2048xbf16>, vector<2x2048xf32> -> vector<2x2048xf32>
    %263 = vector.broadcast %177 : vector<1x2048xf32> to vector<2x2048xf32>
    %264 = arith.addf %262, %263 : vector<2x2048xf32>
    %cst_120 = arith.constant 0.000000e+00 : f32
    %265 = vector.broadcast %cst_120 : f32 to vector<2x2048xf32>
    %266 = arith.maximumf %264, %265 : vector<2x2048xf32>
    %267 = arith.truncf %266 : vector<2x2048xf32> to vector<2x2048xbf16>
    %cst_121 = arith.constant dense<0.000000e+00> : vector<2x32xf32>
    %268 = tpu.matmul %267, %178, %cst_121 {dimension_numbers = #tpu.dot_dimension_numbers<[1], [0], [0], [1], [0, 0, 1, 1], [], []>} : vector<2x2048xbf16>, vector<2048x32xbf16>, vector<2x32xf32> -> vector<2x32xf32>
    %269 = vector.broadcast %179 : vector<1x32xf32> to vector<2x32xf32>
    %270 = arith.addf %268, %269 : vector<2x32xf32>
    %271 = arith.addf %260, %270 : vector<2x32xf32>
    %cst_122 = arith.constant dense<0.000000e+00> : vector<2xf32>
    %272 = vector.multi_reduction <add>, %271, %cst_122 [1] : vector<2x32xf32> to vector<2xf32>
    %273 = vector.shape_cast %272 : vector<2xf32> to vector<2x1xf32>
    %cst_123 = arith.constant 3.200000e+01 : f32
    %274 = vector.broadcast %cst_123 : f32 to vector<2x1xf32>
    %275 = arith.divf %273, %274 : vector<2x1xf32>
    %276 = vector.broadcast %275 : vector<2x1xf32> to vector<2x32xf32>
    %277 = arith.subf %271, %276 : vector<2x32xf32>
    %278 = arith.mulf %277, %277 : vector<2x32xf32>
    %cst_124 = arith.constant dense<0.000000e+00> : vector<2xf32>
    %279 = vector.multi_reduction <add>, %278, %cst_124 [1] : vector<2x32xf32> to vector<2xf32>
    %280 = vector.shape_cast %279 : vector<2xf32> to vector<2x1xf32>
    %cst_125 = arith.constant 3.200000e+01 : f32
    %281 = vector.broadcast %cst_125 : f32 to vector<2x1xf32>
    %282 = arith.divf %280, %281 : vector<2x1xf32>
    %283 = vector.broadcast %275 : vector<2x1xf32> to vector<2x32xf32>
    %284 = arith.subf %271, %283 : vector<2x32xf32>
    %cst_126 = arith.constant 9.99999974E-6 : f32
    %285 = vector.broadcast %cst_126 : f32 to vector<2x1xf32>
    %286 = arith.addf %282, %285 : vector<2x1xf32>
    %287 = math.rsqrt %286 : vector<2x1xf32>
    %288 = vector.broadcast %287 : vector<2x1xf32> to vector<2x32xf32>
    %289 = arith.mulf %284, %288 : vector<2x32xf32>
    %290 = vector.broadcast %180 : vector<1x32xf32> to vector<2x32xf32>
    %291 = arith.mulf %289, %290 : vector<2x32xf32>
    %292 = vector.broadcast %181 : vector<1x32xf32> to vector<2x32xf32>
    %293 = arith.addf %291, %292 : vector<2x32xf32>
    %c0_127 = arith.constant 0 : index
    %c0_128 = arith.constant 0 : index
    %294 = vector.load %arg2[%c0_127, %c0_128] : memref<16x32xf32, #tpu.memory_space<vmem>>, vector<8x32xf32>
    %c0_129 = arith.constant 0 : index
    %c0_130 = arith.constant 0 : index
    %295 = vector.load %arg3[%c0_129, %c0_130] : memref<16x32xf32, #tpu.memory_space<vmem>>, vector<8x32xf32>
    %c8 = arith.constant 8 : index
    %c0_131 = arith.constant 0 : index
    %296 = vector.load %arg3[%c8, %c0_131] : memref<16x32xf32, #tpu.memory_space<vmem>>, vector<8x32xf32>
    %297 = tpu.concatenate %295, %296 in 0 : vector<8x32xf32>, vector<8x32xf32> -> vector<16x32xf32>
    %298 = arith.mulf %294, %294 : vector<8x32xf32>
    %cst_132 = arith.constant dense<0.000000e+00> : vector<8xf32>
    %299 = vector.multi_reduction <add>, %298, %cst_132 [1] : vector<8x32xf32> to vector<8xf32>
    %300 = vector.shape_cast %299 : vector<8xf32> to vector<8x1xf32>
    %301 = arith.mulf %297, %297 : vector<16x32xf32>
    %cst_133 = arith.constant dense<0.000000e+00> : vector<16xf32>
    %302 = vector.multi_reduction <add>, %301, %cst_133 [1] : vector<16x32xf32> to vector<16xf32>
    %303 = vector.shape_cast %302 : vector<16xf32> to vector<16x1xf32>
    %cst_134 = arith.constant dense<0.000000e+00> : vector<8x16xf32>
    %304 = tpu.matmul %294, %297, %cst_134 {dimension_numbers = #tpu.dot_dimension_numbers<[1], [1], [0], [0], [0, 0, 1, 0], [], []>} : vector<8x32xf32>, vector<16x32xf32>, vector<8x16xf32> -> vector<8x16xf32>
    %305 = tpu.transpose %303, [1, 0] : vector<16x1xf32> -> vector<1x16xf32>
    %306 = vector.broadcast %300 : vector<8x1xf32> to vector<8x16xf32>
    %307 = vector.broadcast %305 : vector<1x16xf32> to vector<8x16xf32>
    %308 = arith.addf %306, %307 : vector<8x16xf32>
    %cst_135 = arith.constant 2.000000e+00 : f32
    %309 = vector.broadcast %cst_135 : f32 to vector<8x16xf32>
    %310 = arith.mulf %309, %304 : vector<8x16xf32>
    %311 = arith.subf %308, %310 : vector<8x16xf32>
    %cst_136 = arith.constant 0.000000e+00 : f32
    %312 = vector.broadcast %cst_136 : f32 to vector<8x16xf32>
    %313 = arith.maximumf %311, %312 : vector<8x16xf32>
    %314 = math.sqrt %313 : vector<8x16xf32>
    %315 = vector.extract_strided_slice %314 {offsets = [0, 0], sizes = [8, 8], strides = [1, 1]} : vector<8x16xf32> to vector<8x8xf32>
    %316 = vector.extract_strided_slice %314 {offsets = [0, 8], sizes = [8, 8], strides = [1, 1]} : vector<8x16xf32> to vector<8x8xf32>
    %cst_137 = arith.constant dense<0x7F800000> : vector<8xf32>
    %317 = vector.multi_reduction <minimumf>, %315, %cst_137 [1] : vector<8x8xf32> to vector<8xf32>
    %318 = vector.shape_cast %317 : vector<8xf32> to vector<8x1xf32>
    %319 = vector.shape_cast %318 : vector<8x1xf32> to vector<1x8x1xf32>
    %cst_138 = arith.constant dense<0.000000e+00> : vector<1xf32>
    %320 = vector.multi_reduction <add>, %319, %cst_138 [1, 2] : vector<1x8x1xf32> to vector<1xf32>
    %321 = vector.shape_cast %320 : vector<1xf32> to vector<1x1x1xf32>
    %322 = vector.extract %321[0, 0, 0] : f32 from vector<1x1x1xf32>
    %cst_139 = arith.constant 8.000000e+00 : f32
    %323 = arith.divf %322, %cst_139 : f32
    %cst_140 = arith.constant dense<0x7F800000> : vector<8xf32>
    %324 = vector.multi_reduction <minimumf>, %315, %cst_140 [0] : vector<8x8xf32> to vector<8xf32>
    %325 = vector.shape_cast %324 : vector<8xf32> to vector<1x8xf32>
    %326 = vector.shape_cast %325 : vector<1x8xf32> to vector<1x1x8xf32>
    %cst_141 = arith.constant dense<0.000000e+00> : vector<1xf32>
    %327 = vector.multi_reduction <add>, %326, %cst_141 [1, 2] : vector<1x1x8xf32> to vector<1xf32>
    %328 = vector.shape_cast %327 : vector<1xf32> to vector<1x1x1xf32>
    %329 = vector.extract %328[0, 0, 0] : f32 from vector<1x1x1xf32>
    %cst_142 = arith.constant 8.000000e+00 : f32
    %330 = arith.divf %329, %cst_142 : f32
    %331 = arith.addf %323, %330 : f32
    %cst_143 = arith.constant 5.000000e-01 : f32
    %332 = arith.mulf %cst_143, %331 : f32
    %cst_144 = arith.constant dense<0x7F800000> : vector<8xf32>
    %333 = vector.multi_reduction <minimumf>, %316, %cst_144 [1] : vector<8x8xf32> to vector<8xf32>
    %334 = vector.shape_cast %333 : vector<8xf32> to vector<8x1xf32>
    %335 = vector.shape_cast %334 : vector<8x1xf32> to vector<1x8x1xf32>
    %cst_145 = arith.constant dense<0.000000e+00> : vector<1xf32>
    %336 = vector.multi_reduction <add>, %335, %cst_145 [1, 2] : vector<1x8x1xf32> to vector<1xf32>
    %337 = vector.shape_cast %336 : vector<1xf32> to vector<1x1x1xf32>
    %338 = vector.extract %337[0, 0, 0] : f32 from vector<1x1x1xf32>
    %cst_146 = arith.constant 8.000000e+00 : f32
    %339 = arith.divf %338, %cst_146 : f32
    %cst_147 = arith.constant dense<0x7F800000> : vector<8xf32>
    %340 = vector.multi_reduction <minimumf>, %316, %cst_147 [0] : vector<8x8xf32> to vector<8xf32>
    %341 = vector.shape_cast %340 : vector<8xf32> to vector<1x8xf32>
    %342 = vector.shape_cast %341 : vector<1x8xf32> to vector<1x1x8xf32>
    %cst_148 = arith.constant dense<0.000000e+00> : vector<1xf32>
    %343 = vector.multi_reduction <add>, %342, %cst_148 [1, 2] : vector<1x1x8xf32> to vector<1xf32>
    %344 = vector.shape_cast %343 : vector<1xf32> to vector<1x1x1xf32>
    %345 = vector.extract %344[0, 0, 0] : f32 from vector<1x1x1xf32>
    %cst_149 = arith.constant 8.000000e+00 : f32
    %346 = arith.divf %345, %cst_149 : f32
    %347 = arith.addf %339, %346 : f32
    %cst_150 = arith.constant 5.000000e-01 : f32
    %348 = arith.mulf %cst_150, %347 : f32
    %cst_151 = arith.constant dense<0.000000e+00> : vector<32xf32>
    %349 = vector.multi_reduction <add>, %294, %cst_151 [0] : vector<8x32xf32> to vector<32xf32>
    %350 = vector.shape_cast %349 : vector<32xf32> to vector<1x32xf32>
    %cst_152 = arith.constant 8.000000e+00 : f32
    %351 = vector.broadcast %cst_152 : f32 to vector<1x32xf32>
    %352 = arith.divf %350, %351 : vector<1x32xf32>
    %cst_153 = arith.constant dense<0.000000e+00> : vector<32xf32>
    %353 = vector.multi_reduction <add>, %295, %cst_153 [0] : vector<8x32xf32> to vector<32xf32>
    %354 = vector.shape_cast %353 : vector<32xf32> to vector<1x32xf32>
    %cst_154 = arith.constant 8.000000e+00 : f32
    %355 = vector.broadcast %cst_154 : f32 to vector<1x32xf32>
    %356 = arith.divf %354, %355 : vector<1x32xf32>
    %cst_155 = arith.constant dense<0.000000e+00> : vector<32xf32>
    %357 = vector.multi_reduction <add>, %296, %cst_155 [0] : vector<8x32xf32> to vector<32xf32>
    %358 = vector.shape_cast %357 : vector<32xf32> to vector<1x32xf32>
    %cst_156 = arith.constant 8.000000e+00 : f32
    %359 = vector.broadcast %cst_156 : f32 to vector<1x32xf32>
    %360 = arith.divf %358, %359 : vector<1x32xf32>
    %361 = arith.subf %352, %356 : vector<1x32xf32>
    %362 = arith.mulf %361, %361 : vector<1x32xf32>
    %363 = vector.shape_cast %362 : vector<1x32xf32> to vector<1x1x32xf32>
    %cst_157 = arith.constant dense<0.000000e+00> : vector<1xf32>
    %364 = vector.multi_reduction <add>, %363, %cst_157 [1, 2] : vector<1x1x32xf32> to vector<1xf32>
    %365 = vector.shape_cast %364 : vector<1xf32> to vector<1x1x1xf32>
    %366 = vector.extract %365[0, 0, 0] : f32 from vector<1x1x1xf32>
    %367 = math.sqrt %366 : f32
    %368 = arith.subf %352, %360 : vector<1x32xf32>
    %369 = arith.mulf %368, %368 : vector<1x32xf32>
    %370 = vector.shape_cast %369 : vector<1x32xf32> to vector<1x1x32xf32>
    %cst_158 = arith.constant dense<0.000000e+00> : vector<1xf32>
    %371 = vector.multi_reduction <add>, %370, %cst_158 [1, 2] : vector<1x1x32xf32> to vector<1xf32>
    %372 = vector.shape_cast %371 : vector<1xf32> to vector<1x1x1xf32>
    %373 = vector.extract %372[0, 0, 0] : f32 from vector<1x1x1xf32>
    %374 = math.sqrt %373 : f32
    %375 = arith.subf %332, %367 : f32
    %cst_159 = arith.constant 2.000000e-01 : f32
    %376 = arith.addf %375, %cst_159 : f32
    %cst_160 = arith.constant 0.000000e+00 : f32
    %377 = arith.maximumf %376, %cst_160 : f32
    %cst_161 = arith.constant 2.500000e-01 : f32
    %378 = arith.mulf %cst_161, %377 : f32
    %cst_162 = arith.constant 0.000000e+00 : f32
    %379 = arith.addf %cst_162, %378 : f32
    %380 = arith.subf %348, %374 : f32
    %cst_163 = arith.constant 2.000000e-01 : f32
    %381 = arith.addf %380, %cst_163 : f32
    %cst_164 = arith.constant 0.000000e+00 : f32
    %382 = arith.maximumf %381, %cst_164 : f32
    %cst_165 = arith.constant 2.500000e-01 : f32
    %383 = arith.mulf %cst_165, %382 : f32
    %384 = arith.addf %379, %383 : f32
    %c8_166 = arith.constant 8 : index
    %c0_167 = arith.constant 0 : index
    %385 = vector.load %arg2[%c8_166, %c0_167] : memref<16x32xf32, #tpu.memory_space<vmem>>, vector<8x32xf32>
    %c8_168 = arith.constant 8 : index
    %c0_169 = arith.constant 0 : index
    %386 = vector.load %arg3[%c8_168, %c0_169] : memref<16x32xf32, #tpu.memory_space<vmem>>, vector<8x32xf32>
    %c0_170 = arith.constant 0 : index
    %c0_171 = arith.constant 0 : index
    %387 = vector.load %arg3[%c0_170, %c0_171] : memref<16x32xf32, #tpu.memory_space<vmem>>, vector<8x32xf32>
    %388 = tpu.concatenate %386, %387 in 0 : vector<8x32xf32>, vector<8x32xf32> -> vector<16x32xf32>
    %389 = arith.mulf %385, %385 : vector<8x32xf32>
    %cst_172 = arith.constant dense<0.000000e+00> : vector<8xf32>
    %390 = vector.multi_reduction <add>, %389, %cst_172 [1] : vector<8x32xf32> to vector<8xf32>
    %391 = vector.shape_cast %390 : vector<8xf32> to vector<8x1xf32>
    %392 = arith.mulf %388, %388 : vector<16x32xf32>
    %cst_173 = arith.constant dense<0.000000e+00> : vector<16xf32>
    %393 = vector.multi_reduction <add>, %392, %cst_173 [1] : vector<16x32xf32> to vector<16xf32>
    %394 = vector.shape_cast %393 : vector<16xf32> to vector<16x1xf32>
    %cst_174 = arith.constant dense<0.000000e+00> : vector<8x16xf32>
    %395 = tpu.matmul %385, %388, %cst_174 {dimension_numbers = #tpu.dot_dimension_numbers<[1], [1], [0], [0], [0, 0, 1, 0], [], []>} : vector<8x32xf32>, vector<16x32xf32>, vector<8x16xf32> -> vector<8x16xf32>
    %396 = tpu.transpose %394, [1, 0] : vector<16x1xf32> -> vector<1x16xf32>
    %397 = vector.broadcast %391 : vector<8x1xf32> to vector<8x16xf32>
    %398 = vector.broadcast %396 : vector<1x16xf32> to vector<8x16xf32>
    %399 = arith.addf %397, %398 : vector<8x16xf32>
    %cst_175 = arith.constant 2.000000e+00 : f32
    %400 = vector.broadcast %cst_175 : f32 to vector<8x16xf32>
    %401 = arith.mulf %400, %395 : vector<8x16xf32>
    %402 = arith.subf %399, %401 : vector<8x16xf32>
    %cst_176 = arith.constant 0.000000e+00 : f32
    %403 = vector.broadcast %cst_176 : f32 to vector<8x16xf32>
    %404 = arith.maximumf %402, %403 : vector<8x16xf32>
    %405 = math.sqrt %404 : vector<8x16xf32>
    %406 = vector.extract_strided_slice %405 {offsets = [0, 0], sizes = [8, 8], strides = [1, 1]} : vector<8x16xf32> to vector<8x8xf32>
    %407 = vector.extract_strided_slice %405 {offsets = [0, 8], sizes = [8, 8], strides = [1, 1]} : vector<8x16xf32> to vector<8x8xf32>
    %cst_177 = arith.constant dense<0x7F800000> : vector<8xf32>
    %408 = vector.multi_reduction <minimumf>, %406, %cst_177 [1] : vector<8x8xf32> to vector<8xf32>
    %409 = vector.shape_cast %408 : vector<8xf32> to vector<8x1xf32>
    %410 = vector.shape_cast %409 : vector<8x1xf32> to vector<1x8x1xf32>
    %cst_178 = arith.constant dense<0.000000e+00> : vector<1xf32>
    %411 = vector.multi_reduction <add>, %410, %cst_178 [1, 2] : vector<1x8x1xf32> to vector<1xf32>
    %412 = vector.shape_cast %411 : vector<1xf32> to vector<1x1x1xf32>
    %413 = vector.extract %412[0, 0, 0] : f32 from vector<1x1x1xf32>
    %cst_179 = arith.constant 8.000000e+00 : f32
    %414 = arith.divf %413, %cst_179 : f32
    %cst_180 = arith.constant dense<0x7F800000> : vector<8xf32>
    %415 = vector.multi_reduction <minimumf>, %406, %cst_180 [0] : vector<8x8xf32> to vector<8xf32>
    %416 = vector.shape_cast %415 : vector<8xf32> to vector<1x8xf32>
    %417 = vector.shape_cast %416 : vector<1x8xf32> to vector<1x1x8xf32>
    %cst_181 = arith.constant dense<0.000000e+00> : vector<1xf32>
    %418 = vector.multi_reduction <add>, %417, %cst_181 [1, 2] : vector<1x1x8xf32> to vector<1xf32>
    %419 = vector.shape_cast %418 : vector<1xf32> to vector<1x1x1xf32>
    %420 = vector.extract %419[0, 0, 0] : f32 from vector<1x1x1xf32>
    %cst_182 = arith.constant 8.000000e+00 : f32
    %421 = arith.divf %420, %cst_182 : f32
    %422 = arith.addf %414, %421 : f32
    %cst_183 = arith.constant 5.000000e-01 : f32
    %423 = arith.mulf %cst_183, %422 : f32
    %cst_184 = arith.constant dense<0x7F800000> : vector<8xf32>
    %424 = vector.multi_reduction <minimumf>, %407, %cst_184 [1] : vector<8x8xf32> to vector<8xf32>
    %425 = vector.shape_cast %424 : vector<8xf32> to vector<8x1xf32>
    %426 = vector.shape_cast %425 : vector<8x1xf32> to vector<1x8x1xf32>
    %cst_185 = arith.constant dense<0.000000e+00> : vector<1xf32>
    %427 = vector.multi_reduction <add>, %426, %cst_185 [1, 2] : vector<1x8x1xf32> to vector<1xf32>
    %428 = vector.shape_cast %427 : vector<1xf32> to vector<1x1x1xf32>
    %429 = vector.extract %428[0, 0, 0] : f32 from vector<1x1x1xf32>
    %cst_186 = arith.constant 8.000000e+00 : f32
    %430 = arith.divf %429, %cst_186 : f32
    %cst_187 = arith.constant dense<0x7F800000> : vector<8xf32>
    %431 = vector.multi_reduction <minimumf>, %407, %cst_187 [0] : vector<8x8xf32> to vector<8xf32>
    %432 = vector.shape_cast %431 : vector<8xf32> to vector<1x8xf32>
    %433 = vector.shape_cast %432 : vector<1x8xf32> to vector<1x1x8xf32>
    %cst_188 = arith.constant dense<0.000000e+00> : vector<1xf32>
    %434 = vector.multi_reduction <add>, %433, %cst_188 [1, 2] : vector<1x1x8xf32> to vector<1xf32>
    %435 = vector.shape_cast %434 : vector<1xf32> to vector<1x1x1xf32>
    %436 = vector.extract %435[0, 0, 0] : f32 from vector<1x1x1xf32>
    %cst_189 = arith.constant 8.000000e+00 : f32
    %437 = arith.divf %436, %cst_189 : f32
    %438 = arith.addf %430, %437 : f32
    %cst_190 = arith.constant 5.000000e-01 : f32
    %439 = arith.mulf %cst_190, %438 : f32
    %cst_191 = arith.constant dense<0.000000e+00> : vector<32xf32>
    %440 = vector.multi_reduction <add>, %385, %cst_191 [0] : vector<8x32xf32> to vector<32xf32>
    %441 = vector.shape_cast %440 : vector<32xf32> to vector<1x32xf32>
    %cst_192 = arith.constant 8.000000e+00 : f32
    %442 = vector.broadcast %cst_192 : f32 to vector<1x32xf32>
    %443 = arith.divf %441, %442 : vector<1x32xf32>
    %cst_193 = arith.constant dense<0.000000e+00> : vector<32xf32>
    %444 = vector.multi_reduction <add>, %386, %cst_193 [0] : vector<8x32xf32> to vector<32xf32>
    %445 = vector.shape_cast %444 : vector<32xf32> to vector<1x32xf32>
    %cst_194 = arith.constant 8.000000e+00 : f32
    %446 = vector.broadcast %cst_194 : f32 to vector<1x32xf32>
    %447 = arith.divf %445, %446 : vector<1x32xf32>
    %cst_195 = arith.constant dense<0.000000e+00> : vector<32xf32>
    %448 = vector.multi_reduction <add>, %387, %cst_195 [0] : vector<8x32xf32> to vector<32xf32>
    %449 = vector.shape_cast %448 : vector<32xf32> to vector<1x32xf32>
    %cst_196 = arith.constant 8.000000e+00 : f32
    %450 = vector.broadcast %cst_196 : f32 to vector<1x32xf32>
    %451 = arith.divf %449, %450 : vector<1x32xf32>
    %452 = arith.subf %443, %447 : vector<1x32xf32>
    %453 = arith.mulf %452, %452 : vector<1x32xf32>
    %454 = vector.shape_cast %453 : vector<1x32xf32> to vector<1x1x32xf32>
    %cst_197 = arith.constant dense<0.000000e+00> : vector<1xf32>
    %455 = vector.multi_reduction <add>, %454, %cst_197 [1, 2] : vector<1x1x32xf32> to vector<1xf32>
    %456 = vector.shape_cast %455 : vector<1xf32> to vector<1x1x1xf32>
    %457 = vector.extract %456[0, 0, 0] : f32 from vector<1x1x1xf32>
    %458 = math.sqrt %457 : f32
    %459 = arith.subf %443, %451 : vector<1x32xf32>
    %460 = arith.mulf %459, %459 : vector<1x32xf32>
    %461 = vector.shape_cast %460 : vector<1x32xf32> to vector<1x1x32xf32>
    %cst_198 = arith.constant dense<0.000000e+00> : vector<1xf32>
    %462 = vector.multi_reduction <add>, %461, %cst_198 [1, 2] : vector<1x1x32xf32> to vector<1xf32>
    %463 = vector.shape_cast %462 : vector<1xf32> to vector<1x1x1xf32>
    %464 = vector.extract %463[0, 0, 0] : f32 from vector<1x1x1xf32>
    %465 = math.sqrt %464 : f32
    %466 = arith.subf %423, %458 : f32
    %cst_199 = arith.constant 2.000000e-01 : f32
    %467 = arith.addf %466, %cst_199 : f32
    %cst_200 = arith.constant 0.000000e+00 : f32
    %468 = arith.maximumf %467, %cst_200 : f32
    %cst_201 = arith.constant 2.500000e-01 : f32
    %469 = arith.mulf %cst_201, %468 : f32
    %470 = arith.addf %384, %469 : f32
    %471 = arith.subf %439, %465 : f32
    %cst_202 = arith.constant 2.000000e-01 : f32
    %472 = arith.addf %471, %cst_202 : f32
    %cst_203 = arith.constant 0.000000e+00 : f32
    %473 = arith.maximumf %472, %cst_203 : f32
    %cst_204 = arith.constant 2.500000e-01 : f32
    %474 = arith.mulf %cst_204, %473 : f32
    %475 = arith.addf %470, %474 : f32
    %cst_205 = arith.constant 5.000000e-01 : f32
    %476 = arith.mulf %475, %cst_205 : f32
    %477 = vector.extract_strided_slice %159 {offsets = [1, 0], sizes = [1, 32], strides = [1, 1]} : vector<2x32xf32> to vector<1x32xf32>
    %478 = vector.extract_strided_slice %159 {offsets = [0, 0], sizes = [1, 32], strides = [1, 1]} : vector<2x32xf32> to vector<1x32xf32>
    %479 = tpu.concatenate %477, %478 in 0 : vector<1x32xf32>, vector<1x32xf32> -> vector<2x32xf32>
    %480 = arith.subf %293, %159 : vector<2x32xf32>
    %cst_206 = arith.constant 9.99999997E-7 : f32
    %481 = vector.broadcast %cst_206 : f32 to vector<2x32xf32>
    %482 = arith.addf %480, %481 : vector<2x32xf32>
    %483 = arith.mulf %482, %482 : vector<2x32xf32>
    %cst_207 = arith.constant dense<0.000000e+00> : vector<2xf32>
    %484 = vector.multi_reduction <add>, %483, %cst_207 [1] : vector<2x32xf32> to vector<2xf32>
    %485 = vector.shape_cast %484 : vector<2xf32> to vector<2x1xf32>
    %486 = math.sqrt %485 : vector<2x1xf32>
    %487 = arith.subf %293, %479 : vector<2x32xf32>
    %cst_208 = arith.constant 9.99999997E-7 : f32
    %488 = vector.broadcast %cst_208 : f32 to vector<2x32xf32>
    %489 = arith.addf %487, %488 : vector<2x32xf32>
    %490 = arith.mulf %489, %489 : vector<2x32xf32>
    %cst_209 = arith.constant dense<0.000000e+00> : vector<2xf32>
    %491 = vector.multi_reduction <add>, %490, %cst_209 [1] : vector<2x32xf32> to vector<2xf32>
    %492 = vector.shape_cast %491 : vector<2xf32> to vector<2x1xf32>
    %493 = math.sqrt %492 : vector<2x1xf32>
    %494 = arith.subf %486, %493 : vector<2x1xf32>
    %cst_210 = arith.constant 2.000000e-01 : f32
    %495 = vector.broadcast %cst_210 : f32 to vector<2x1xf32>
    %496 = arith.addf %494, %495 : vector<2x1xf32>
    %cst_211 = arith.constant 0.000000e+00 : f32
    %497 = vector.broadcast %cst_211 : f32 to vector<2x1xf32>
    %498 = arith.maximumf %496, %497 : vector<2x1xf32>
    %499 = vector.shape_cast %498 : vector<2x1xf32> to vector<1x2x1xf32>
    %cst_212 = arith.constant dense<0.000000e+00> : vector<1xf32>
    %500 = vector.multi_reduction <add>, %499, %cst_212 [1, 2] : vector<1x2x1xf32> to vector<1xf32>
    %501 = vector.shape_cast %500 : vector<1xf32> to vector<1x1x1xf32>
    %502 = vector.extract %501[0, 0, 0] : f32 from vector<1x1x1xf32>
    %cst_213 = arith.constant 2.000000e+00 : f32
    %503 = arith.divf %502, %cst_213 : f32
    %504 = arith.addf %476, %503 : f32
    %505 = vector.broadcast %504 : f32 to vector<1x1xf32>
    %c0_214 = arith.constant 0 : index
    %c0_215 = arith.constant 0 : index
    %506 = vector.load %arg34[%c0_214, %c0_215] : memref<1x1xf32, #tpu.memory_space<vmem>>, vector<1x1xf32>
    tpu.vector_store %arg34[%c0_214, %c0_215], %505 {strides = array<i32>} : memref<1x1xf32, #tpu.memory_space<vmem>>, vector<1x1xf32>,
    return
  }
}

</mosaic_0001>

<bundles_post_ra>
// kernel: tile.14
= control target key start
LH: loop header
LB: loop body
LE: loop exit
PB: predicated region body
PF: predicated region fallthrough
CT: control target
= control target key end

     0   :  { %vm3_vm0 = vcmask 261120   ;;  %s6_s6 = smov 3  ;;  %s48_s0 = inlined_call_operand.vmem [shape: f32[2,9,32], index: 0, kind: input, shape index: {}]   ;;  %s49_s1 = inlined_call_operand.vmem [shape: f32[18,32], index: 1, kind: output, shape index: {}]  }
   0x1   :  { %v2_v0 = vld [vmem:[%s48_s0] sm:$0xff]   ;;  %v18_v2 = vld [vmem:[%s48_s0 + $0x11] sm:$0xff]  }
   0x2   :  { %v16_v1 = vld [vmem:[%s48_s0 + $0x8] ss:$8 sm:%s6_s6]   ;;  %4 = vst.msk [vmem:[%s49_s1] sm:$0xff] %vm3_vm0, %v2_v0  }
   0x3   :  { %17 = vst.msk [vmem:[%s49_s1 + $0x8] sm:$0x3] %vm3_vm0, %v16_v1  }
   0x4   :  { %19 = vst.msk [vmem:[%s49_s1 + $0xa] sm:$0xff] %vm3_vm0, %v18_v2  }

// kernel: joint_model_forward.1
= control target key start
LH: loop header
LB: loop body
LE: loop exit
PB: predicated region body
PF: predicated region fallthrough
CT: control target
= control target key end

     0   :  { %s7065_s6 = smov 1   ;;  %s7066_s10 = smov 2   ;;  %s8184_s0 = inlined_call_operand.smem [shape: u32[35], index: -1, kind: input, shape index: {}] }
   0x1   :  { %s7117_s5 = sld [smem:[%s8184_s0]]   ;;  %s7067_s14 = smov 3  }
   0x2   :  { %s7122_s9 = sld [smem:[%s8184_s0 + %s7065_s6]]   ;;  %s7068_s18 = smov 4  }
   0x3   :  { %s7127_s13 = sld [smem:[%s8184_s0 + %s7066_s10]]   ;;  %s7069_s22 = smov 5  }
   0x4   :  { %s7132_s17 = sld [smem:[%s8184_s0 + %s7067_s14]]   ;;  %s7070_s26 = smov 6  }
   0x5   :  { %s7137_s21 = sld [smem:[%s8184_s0 + %s7068_s18]]   ;;  %s7071_s30 = smov 7  }
   0x6   :  { %s7142_s25 = sld [smem:[%s8184_s0 + %s7069_s22]]   ;;  %s7072_s4 = smov 8  }
   0x7   :  { %s7147_s29 = sld [smem:[%s8184_s0 + %s7070_s26]]   ;;  %s7073_s10 = smov 9  }
   0x8   :  { %8194 = sst [smem:[#allocation5_spill]] %s7122_s9  ;;  %s7074_s15 = smov 10  }
   0x9   :  { %8195 = sst [smem:[#allocation6_spill]] %s7127_s13  ;;  %s7075_s20 = smov 11  }
   0xa   :  { %8196 = sst [smem:[#allocation7_spill]] %s7132_s17  ;;  %s7076_s26 = smov 12  }
   0xb   :  { %s7152_s3 = sld [smem:[%s8184_s0 + %s7071_s30]]   ;;  %s7077_s1 = smov 13  }
   0xc   :  { %s7157_s8 = sld [smem:[%s8184_s0 + %s7072_s4]]   ;;  %s7078_s7 = smov 14  }
   0xd   :  { %s7162_s14 = sld [smem:[%s8184_s0 + %s7073_s10]]   ;;  %s7080_s22 = smov 16  }
   0xe   :  { %s7167_s19 = sld [smem:[%s8184_s0 + %s7074_s15]]   ;;  %s7079_s15 = smov 15  }
   0xf   :  { %s7172_s24 = sld [smem:[%s8184_s0 + %s7075_s20]]   ;;  %s7081_s28 = smov 17  }
  0x10   :  { %s7177_s30 = sld [smem:[%s8184_s0 + %s7076_s26]]  }
  0x11   :  { %8197 = sst [smem:[#allocation8_spill]] %s7152_s3 }
  0x12   :  { %s7182_s6 = sld [smem:[%s8184_s0 + %s7077_s1]]  }
  0x13   :  { %8198 = sst [smem:[#allocation9_spill]] %s7162_s14 }
  0x14   :  { %s7187_s12 = sld [smem:[%s8184_s0 + %s7078_s7]]   ;;  %s7082_s7 = smov 18  }
  0x15   :  { %s7192_s20 = sld [smem:[%s8184_s0 + %s7079_s15]]   ;;  %s7083_s15 = smov 19  }
  0x16   :  { %s7197_s27 = sld [smem:[%s8184_s0 + %s7080_s22]]   ;;  %s7084_s22 = smov 20  }
  0x17   :  { %s7202_s4 = sld [smem:[%s8184_s0 + %s7081_s28]]   ;;  %s7085_s28 = smov 21  }
  0x18   :  { %s7207_s13 = sld [smem:[%s8184_s0 + %s7082_s7]]   ;;  %s7086_s7 = smov 22  }
  0x19   :  { %s7212_s17 = sld [smem:[%s8184_s0 + %s7083_s15]]   ;;  %s7087_s15 = smov 23  }
  0x1a   :  { %s7217_s14 = sld [smem:[%s8184_s0 + %s7084_s22]]   ;;  %s7088_s22 = smov 24  }
  0x1b   :  { %s7222_s3 = sld [smem:[%s8184_s0 + %s7085_s28]]   ;;  %s7089_s28 = smov 25  }
  0x1c   :  { %s7227_s9 = sld [smem:[%s8184_s0 + %s7086_s7]]   ;;  %s7090_s7 = smov 26  }
  0x1f   :  { %8199 = sst [smem:[#allocation10_spill]] %s7212_s17 }
  0x20   :  { %8200 = sst [smem:[#allocation11_spill]] %s7217_s14 }
  0x21   :  { %8201 = sst [smem:[#allocation12_spill]] %s7222_s3 }
  0x22   :  { %8202 = sst [smem:[#allocation13_spill]] %s7227_s9 }
  0x23   :  { %s7232_s17 = sld [smem:[%s8184_s0 + %s7087_s15]]   ;;  %s7091_s15 = smov 27  }
  0x24   :  { %s7237_s14 = sld [smem:[%s8184_s0 + %s7088_s22]]   ;;  %s7092_s22 = smov 28  }
  0x25   :  { %s7242_s3 = sld [smem:[%s8184_s0 + %s7089_s28]]   ;;  %s7093_s28 = smov 29  }
  0x26   :  { %s7247_s9 = sld [smem:[%s8184_s0 + %s7090_s7]]   ;;  %s7094_s7 = smov 30  }
  0x29   :  { %8203 = sst [smem:[#allocation14_spill]] %s7232_s17 }
  0x2a   :  { %8204 = sst [smem:[#allocation15_spill]] %s7237_s14 }
  0x2b   :  { %8205 = sst [smem:[#allocation16_spill]] %s7242_s3 }
  0x2c   :  { %8206 = sst [smem:[#allocation17_spill]] %s7247_s9 }
  0x2d   :  { %s7252_s17 = sld [smem:[%s8184_s0 + %s7091_s15]]   ;;  %s7095_s15 = smov 31  }
  0x2e   :  { %s7257_s14 = sld [smem:[%s8184_s0 + %s7092_s22]]   ;;  %s7096_s22 = smov 32  }
  0x2f   :  { %s7262_s3 = sld [smem:[%s8184_s0 + %s7093_s28]]   ;;  %s7097_s28 = smov 33  }
  0x30   :  { %s7267_s9 = sld [smem:[%s8184_s0 + %s7094_s7]]   ;;  %s7098_s7 = smov 34  }
  0x33   :  { %8207 = sst [smem:[#allocation18_spill]] %s7252_s17 }
  0x34   :  { %8208 = sst [smem:[#allocation19_spill]] %s7257_s14 }
  0x35   :  { %8209 = sst [smem:[#allocation20_spill]] %s7262_s3 }
  0x36   :  { %8210 = sst [smem:[#allocation21_spill]] %s7267_s9 }
  0x37   :  { %s7272_s17 = sld [smem:[%s8184_s0 + %s7095_s15]]  }
  0x38   :  { %s7277_s14 = sld [smem:[%s8184_s0 + %s7096_s22]]  }
  0x39   :  { %s7282_s3 = sld [smem:[%s8184_s0 + %s7097_s28]]  }
  0x3a   :  { %s7287_s9 = sld [smem:[%s8184_s0 + %s7098_s7]]  }
  0x3b   :  { %v187_v0 = vld [vmem:[%s7137_s21 + $0x38] sm:$0xff]  ;;  %v186_v1 = vld [vmem:[%s7137_s21 + $0x30] sm:$0xff]  ;;  %v185_v2 = vld [vmem:[%s7137_s21 + $0x28] sm:$0xff] }
  0x3c   :  { %210 = vmatpush.msra.mxu0 %v187_v0  ;;  %v184_v3 = vld [vmem:[%s7137_s21 + $0x20] sm:$0xff]  ;;  %v237_v4 = vld [vmem:[%s7167_s19 + $0x18] sm:$0xff]  ;;  %v182_v6 = vld [vmem:[%s7137_s21 + $0x10] sm:$0xff] }
  0x3d   :  { %v183_v5 = vld [vmem:[%s7137_s21 + $0x18] sm:$0xff]  ;;  %564 = vmatpush.msra.mxu1 %v237_v4 }
  0x3e   :  { %211 = vmatpush.msra.mxu0 %v186_v1 }
  0x40   :  { %212 = vmatpush.msra.mxu0 %v185_v2 }
  0x42   :  { %213 = vmatpush.msra.mxu0 %v184_v3 }
  0x44   :  { %214 = vmatpush.msra.mxu0 %v183_v5 }
  0x45   :  { %74 = vsyncpa [#allocation3], 0  ;;  %v181_v7 = vld [vmem:[%s7137_s21 + $0x8] sm:$0xff]  ;;  %v180_v8 = vld [vmem:[%s7137_s21] sm:$0xff]  ;;  %vm192_vm0 = vcmask 523264   ;;  %vm542_vm1 = vcmask 261120   ;;  %v144_v49 = vlaneseq }
  0x46   :  { %215 = vmatpush.msra.mxu0 %v182_v6  ;;  %v177_v9 = vld [vmem:[%s7117_s5] sm:$0xff]  ;;  %v178_v10 = vld [vmem:[%s7117_s5 + $0x8] sm:$0xff]  ;;  %v179_v11 = vld [vmem:[%s7117_s5 + $0x10] sm:$0x3]  ;;  %vm860_vm2 = vcmask 1040384   ;;  %s7099_s0 = smov 32  }
  0x47   :  { %v236_v12 = vld [vmem:[%s7167_s19 + $0x10] sm:$0xff]  ;;  %v235_v13 = vld [vmem:[%s7167_s19 + $0x8] sm:$0xff]  ;;  %v234_v14 = vld [vmem:[%s7167_s19] sm:$0xff]  ;;  %s7100_s5 = smov 96   ;;  %vm735_vm3 = vcmask 1046528   ;;  %v7334_v50 = vshrl.u32 %v144_v49, 7 }
  0x48   :  { %216 = vmatpush.msra.mxu0 %v181_v7  ;;  %565 = vmatpush.msra.mxu1 %v236_v12  ;;  %v6974_v15 = vld [vmem:[%s7142_s25] ss:$0 sm:$0xff]  ;;  %v229_v21 = vld [vmem:[%s7157_s8 + $0x8] sm:$0xff]  ;;  %v230_v26 = vld [vmem:[%s7157_s8 + $0x10] sm:$0x3]  ;;  %v150_v52 = vand.u32 127, %v144_v49 }
  0x49   :  { %v228_v17 = vld [vmem:[%s7157_s8] sm:$0xff]  ;;  %v172_v51 = vadd.s32 1, %v7334_v50  ;;  %v170_v53 = vmul.u32 4, %v7334_v50  ;;  %v7101_v58 = vmov 0.0   ;;  %vm619_vm7 = vcmask 72704   ;;  %s7102_s21 = smov 64  }
  0x4a   :  { %217 = vmatpush.msra.mxu0 %v180_v8  ;;  %566 = vmatpush.msra.mxu1 %v235_v13  ;;  %v6975_v29 = vld [vmem:[%s7172_s24] ss:$0 sm:$0xff]  ;;  %vm663_vm11 = vcmask 64512   ;;  %s8211_s25 = sld [smem:[#allocation5_spill]] }
  0x4b   :  { %5204 = vmatmul.msk.f32.vlgmr.msra.gmra.mxu0 %vm192_vm0, %v177_v9  ;;  %v173_v54 = vmul.u32 4, %v172_v51  ;;  %vm171_vm4 = vcmp.ge.s32.totalorder %v150_v52, %v170_v53  ;;  %s8214_s8 = sld [smem:[#allocation8_spill]] }
  0x4c   :  { %567 = vmatpush.msra.mxu1 %v234_v14  ;;  %s8215_s19 = sld [smem:[#allocation9_spill]] }
  0x4d   :  { %vm174_vm5 = vcmp.lt.s32.totalorder %v150_v52, %v173_v54  ;;  %s8216_s24 = sld [smem:[#allocation14_spill]] }
  0x4e   :  { %vm175_vm6 = vmand %vm171_vm4, %vm174_vm5  ;;  %s8223_s15 = sld [smem:[#allocation6_spill]] }
  0x4f   :  { %v7341_v59 = vsel %vm175_vm6, 1.0, %v7101_v58  ;;  %s8224_s16 = sld [smem:[#allocation21_spill]] }
  0x50   :  { %s8225_s18 = sld [smem:[#allocation20_spill]] }
  0x53   :  { %5205 = vmatmul.msk.f32.gmra.mxu0 %vm192_vm0, %v178_v10 }
  0x5b   :  { %5206 = vmatmul.msk.f32.gmra.mxu0 %vm192_vm0, %v179_v11 }
  0xc8   :  { %v219_v16 = vpop.f32.mrf.mxu0 }
  0xc9   :  { %v220_v18 = vadd.f32 %v6974_v15, %v219_v16 }
  0xcb   :  { %v231_v19 = vadd.f32 %v228_v17, %v220_v18 }
  0xcd   :  { %5207 = vmatmul.msk.f32.vlgmr.msra.gmra.mxu1 %vm542_vm1, %v231_v19 }
  0xd0   :  { %v222_v20 = vpop.f32.mrf.mxu0 }
  0xd1   :  { %v223_v22 = vadd.f32 %v6974_v15, %v222_v20  ;;  %v148_v20 = vadd.s32 24, %v7334_v50 }
  0xd3   :  { %v232_v23 = vadd.f32 %v229_v21, %v223_v22  ;;  %v151_v21 = vmul.u32 4, %v150_v52  ;;  %v156_v22 = vadd.s32 1, %v150_v52 }
  0xd5   :  { %5208 = vmatmul.msk.f32.gmra.mxu1 %vm542_vm1, %v232_v23  ;;  %v7310_v24 = vsel %vm860_vm2, %v231_v19, %v232_v23  ;;  %v147_v23 = vadd.s32 16, %v7334_v50  ;;  %vm155_vm8 = vcmp.ge.s32.totalorder %v148_v20, %v151_v21  ;;  %vm152_vm5 = vcmp.ge.s32.totalorder %v7334_v50, %v151_v21 }
  0xd7   :  { %vm154_vm9 = vcmp.ge.s32.totalorder %v147_v23, %v151_v21 }
  0xd8   :  { %v225_v25 = vpop.f32.mrf.mxu0 }
  0xd9   :  { %v226_v27 = vadd.f32 %v6974_v15, %v225_v25  ;;  %v157_v25 = vmul.u32 4, %v156_v22 }
  0xdb   :  { %v233_v28 = vadd.f32 %v230_v26, %v226_v27  ;;  %v146_v26 = vadd.s32 8, %v7334_v50  ;;  %vm161_vm10 = vcmp.lt.s32.totalorder %v148_v20, %v157_v25  ;;  %vm160_vm12 = vcmp.lt.s32.totalorder %v147_v23, %v157_v25  ;;  %v5295_v23 = vld [vmem:[%s7197_s27 + $0x80] sm:$0xf] }
  0xdc   :  { %vm165_vm13 = vmand %vm155_vm8, %vm161_vm10  ;;  %vm158_vm6 = vcmp.lt.s32.totalorder %v7334_v50, %v157_v25  ;;  %vm890_vm10 = vcmask 254976  }
  0xdd   :  { %5209 = vmatmul.msk.f32.gmra.mxu1 %vm542_vm1, %v233_v28  ;;  %v7365_v27 = vsel %vm165_vm13, 1.0, %v7101_v58  ;;  %vm164_vm14 = vmand %vm154_vm9, %vm160_vm12  ;;  %vm153_vm15 = vcmp.ge.s32.totalorder %v146_v26, %v151_v21  ;;  %vm159_vm0 = vcmp.lt.s32.totalorder %v146_v26, %v157_v25  ;;  %vm716_vm9 = vcmask 253952   ;;  %v6596_v25 = vld [vmem:[%s7197_s27 + $0xbc] sm:$0xf0]  ;;  %v6588_v26 = vld [vmem:[%s7197_s27 + $0x84] sm:$0xf] }
  0xde   :  { %5213 = vmatpush.xpose.msk.msra.mxu3 %vm663_vm11, %v7365_v27  ;;  %5222 = vmatpush.xpose.msk.msrb.mxu1 %vm663_vm11, %v7365_v27  ;;  %v7372_v28 = vsel %vm164_vm14, 1.0, %v7101_v58  ;;  %vm163_vm4 = vmand %vm153_vm15, %vm159_vm0 }
  0xdf   :  { %vm162_vm8 = vmand %vm152_vm5, %vm158_vm6  ;;  %vm4688_vm5 = vcmask 130112  }
  0xe2   :  { %5214 = vmatpush.xpose.msk.msra.mxu3 %vm663_vm11, %v7372_v28  ;;  %5223 = vmatpush.xpose.msk.msrb.mxu1 %vm663_vm11, %v7372_v28 }
 0x14a   :  { %v569_v30 = vpop.f32.mrf.mxu1 }
 0x14b   :  { %v7315_v31 = vadd.f32 %v6975_v29, %v569_v30  ;;  %v7388_v30 = vsel %vm162_vm8, 1.0, %v7101_v58  ;;  %vm4666_vm8 = vcmask 57344  }
 0x14d   :  { %v578_v32 = vmul.f32 0.5, %v7315_v31 }
 0x14f   :  { %v579_v33 = vperm.slane %v578_v32, 0 }
 0x151   :  { %581 = vrot.lane.b32.xlu0 %v579_v33, %s7099_s0 }
 0x152   :  { %v572_v34 = vpop.f32.mrf.mxu1 }
 0x153   :  { %v7319_v35 = vadd.f32 %v6975_v29, %v572_v34 }
 0x155   :  { %v725_v36 = vmul.f32 0.5, %v7319_v35  ;;  %v840_v12 = vrot.slane %v7319_v35, 1 }
 0x157   :  { %v726_v37 = vperm.slane %v725_v36, 1  ;;  %v242_v36 = vld [vmem:[%s7177_s30 + $0x18] sm:$0xff] }
 0x159   :  { %728 = vrot.lane.b32.xlu0 %v726_v37, %s7099_s0  ;;  %v241_v37 = vld [vmem:[%s7177_s30 + $0x10] sm:$0xff] }
 0x15a   :  { %v575_v40 = vpop.f32.mrf.mxu1 }
 0x15b   :  { %v7325_v41 = vadd.f32 %v6975_v29, %v575_v40  ;;  %v7381_v29 = vsel %vm163_vm4, 1.0, %v7101_v58 }
 0x15c   :  { %5215 = vmatpush.xpose.msk.msra.mxu3 %vm663_vm11, %v7381_v29  ;;  %5224 = vmatpush.xpose.msk.msrb.mxu1 %vm663_vm11, %v7381_v29 }
 0x15d   :  { %v841_v11 = vrot.slane %v7325_v41, 1 }
 0x15f   :  { %v842_v13 = vsel %vm735_vm3, %v840_v12, %v841_v11  ;;  %v7103_v12 = vmov 32.0  }
 0x160   :  { %5216 = vmatpush.xpose.msk.msra.mxu3 %vm663_vm11, %v7388_v30  ;;  %5225 = vmatpush.xpose.msk.msrb.mxu1 %vm663_vm11, %v7388_v30 }
 0x1c3   :  { %v582_v38 = vpop.permute.xlu0 %581 }
 0x1c4   :  { %v585_v39 = vmul.f32 %v582_v38, %v7319_v35  ;;  %v584_v43 = vmul.f32 %v582_v38, %v7315_v31  ;;  %v240_v38 = vld [vmem:[%s7177_s30 + $0x8] sm:$0xff] }
 0x1c6   :  { %590 = vrot.lane.b32.xlu1 %v585_v39, %s7100_s5  ;;  %v239_v39 = vld [vmem:[%s7177_s30] sm:$0xff]  ;;  %s8217_s30 = sld [smem:[#allocation15_spill]] }
 0x1cb   :  { %v729_v42 = vpop.permute.xlu0 %728 }
 0x1cc   :  { %v732_v44 = vmul.f32 %v729_v42, %v7325_v41  ;;  %v731_v46 = vmul.f32 %v729_v42, %v7319_v35 }
 0x1ce   :  { %588 = vrot.lane.b32.xlu1 %v584_v43, %s7100_s5  ;;  %v737_v45 = vrot.slane %v732_v44, 1  ;;  %v736_v47 = vrot.slane %v731_v46, 1 }
 0x1d0   :  { %741 = vrot.lane.b32.xlu2 %v737_v45, %s7100_s5  ;;  %v738_v48 = vsel %vm735_vm3, %v736_v47, %v737_v45 }
 0x1d8   :  { %739 = vrot.lane.b32.xlu2 %v738_v48, %s7100_s5 }
 0x22a   :  { %v742_v56 = vpop.permute.xlu2 %741 }
 0x232   :  { %v740_v60 = vpop.permute.xlu2 %739 }
 0x238   :  { %v591_v55 = vpop.permute.xlu1 %590 }
 0x239   :  { %5210 = vmatpush.xpose.msk.msra.mxu2 %vm542_vm1, %v591_v55 }
 0x240   :  { %v589_v57 = vpop.permute.xlu1 %588 }
 0x241   :  { %5211 = vmatpush.xpose.msk.msra.mxu2 %vm542_vm1, %v589_v57 }
 0x244   :  { %5212 = vmatmul.msk.f32.vlgmr.msra.gmra.mxu2 %vm542_vm1, %v7341_v59 }
 0x245   :  { %5219 = vmatpush.xpose.msk.msrb.mxu2 %vm542_vm1, %v742_v56 }
 0x249   :  { %5220 = vmatpush.xpose.msk.msrb.mxu2 %vm542_vm1, %v740_v60 }
 0x24c   :  { %5221 = vmatmul.msk.f32.vlgmr.msrb.gmra.mxu2 %vm542_vm1, %v7341_v59 }
 0x24d   :  { %881 = vmatpush.msra.mxu2 %v242_v36 }
 0x24f   :  { %882 = vmatpush.msra.mxu2 %v241_v37  ;;  %v6589_v37 = vld [vmem:[%s7197_s27 + $0x8c] sm:$0xf] }
 0x251   :  { %883 = vmatpush.msra.mxu2 %v240_v38  ;;  %v5305_v38 = vld [vmem:[%s7197_s27 + $0xc8] sm:$0xf0] }
 0x253   :  { %884 = vmatpush.msra.mxu2 %v239_v39  ;;  %v5308_v39 = vor.u32 %v6589_v37, %v5305_v38  ;;  %v5335_v37 = vld [vmem:[%s7197_s27 + $0xa8] sm:$0xf] }
 0x255   :  { %1171 = vmatpush.bf16.msra.mxu1 %v5308_v39  ;;  %v6601_v39 = vld [vmem:[%s7197_s27 + $0xe4] sm:$0xf0] }
 0x2c7   :  { %v616_v61 = vpop.f32.mrf.mxu2 }
 0x2c8   :  { %v620_v62 = vsel %vm619_vm7, %v616_v61, -inf }
 0x2c9   :  { %621 = vmax.xlane.f32.xlu0 %v620_v62 }
 0x2cf   :  { %v764_v63 = vpop.f32.mrf.mxu2 }
 0x2d0   :  { %v767_v0 = vsel %vm619_vm7, %v764_v63, -inf }
 0x2d1   :  { %768 = vmax.xlane.f32.xlu1 %v767_v0 }
 0x33c   :  { %v622_v1 = vpop.xlane.xlu0 %621 }
 0x33d   :  { %v623_v2 = vsub.f32 %v616_v61, %v622_v1 }
 0x33f   :  { %v624_v3 = vmul.f32 1.442695, %v623_v2 }
 0x341   :  { %6990 = vpow2.f32 %v624_v3 }
 0x344   :  { %v769_v4 = vpop.xlane.xlu1 %768 }
 0x345   :  { %v770_v5 = vsub.f32 %v764_v63, %v769_v4 }
 0x347   :  { %v6991_v6 = vpop.eup %6990  ;;  %v771_v7 = vmul.f32 1.442695, %v770_v5 }
 0x348   :  { %v626_v8 = vsel %vm619_vm7, %v6991_v6, 0.0 }
 0x349   :  { %6992 = vpow2.f32 %v771_v7  ;;  %627 = vadd.xlane.f32.xlu2 %v626_v8  ;;  %v6976_v7 = vld [vmem:[%s7182_s6] ss:$0 sm:$0xff]  ;;  %s8218_s6 = sld [smem:[#allocation16_spill]] }
 0x34f   :  { %v6993_v9 = vpop.eup %6992 }
 0x350   :  { %v773_v10 = vsel %vm619_vm7, %v6993_v9, 0.0 }
 0x351   :  { %774 = vadd.xlane.f32.xlu2 %v773_v10 }
 0x369   :  { %707 = vrot.lane.b32.xlu2 %v7315_v31, %s7102_s21 }
 0x371   :  { %709 = vrot.lane.b32.xlu2 %v7319_v35, %s7102_s21 }
 0x379   :  { %843 = vrot.lane.b32.xlu2 %v842_v13, %s7102_s21 }
 0x3bc   :  { %v628_v14 = vpop.xlane.xlu2 %627 }
 0x3bd   :  { %6994 = vrcp.f32 %v628_v14 }
 0x3c3   :  { %v6995_v15 = vpop.eup %6994 }
 0x3c4   :  { %v775_v16 = vpop.xlane.xlu2 %774  ;;  %v630_v17 = vmul.f32 %v6995_v15, %v6991_v6 }
 0x3c5   :  { %6996 = vrcp.f32 %v775_v16 }
 0x3c6   :  { %631 = vxpose.xlu0.b32.start.end [1/1] (short) (narrow) %v630_v17, 16  ;;  %6998 = vrcp.f32 %v7103_v12 }
 0x3cb   :  { %v6997_v18 = vpop.eup %6996 }
 0x3cc   :  { %v777_v19 = vmul.f32 %v6997_v18, %v6993_v9  ;;  %v708_v35 = vpop.permute.xlu2 %707  ;;  %v6999_v13 = vpop.eup %6998 }
 0x3cd   :  { %v895_v14 = vmul.f32 32.0, %v6999_v13  ;;  %vm899_vm12 = vweird.f32 %v6999_v13 }
 0x3ce   :  { %778 = vxpose.xlu1.b32.start.end [1/1] (short) (narrow) %v777_v19, 16 }
 0x3cf   :  { %v896_v15 = vsub.f32 1.0, %v895_v14  ;;  %v5257_v14 = vld [vmem:[%s7197_s27 + $0x58] sm:$0xf0] }
 0x3d1   :  { %v897_v16 = vmul.f32 %v6999_v13, %v896_v15 }
 0x3d3   :  { %v898_v17 = vadd.f32 %v6999_v13, %v897_v16 }
 0x3d4   :  { %v710_v40 = vpop.permute.xlu2 %709 }
 0x3d5   :  { %v7412_v18 = vsel %vm899_vm12, %v6999_v13, %v898_v17  ;;  %v6575_v13 = vld [vmem:[%s7197_s27 + $0x1c] sm:$0xf]  ;;  %vm4640_vm12 = vcmask 7168  }
 0x3d6   :  { %v5260_v15 = vor.u32 %v6575_v13, %v5257_v14  ;;  %v6579_v13 = vld [vmem:[%s7197_s27 + $0x3c] sm:$0xf] }
 0x3d7   :  { %v5289_v14 = vld [vmem:[%s7197_s27 + $0x78] sm:$0xf0] }
 0x3dc   :  { %v844_v44 = vpop.permute.xlu2 %843 }
 0x43c   :  { %845 = vrot.lane.b32.xlu0 %v841_v11, %s7102_s21 }
 0x46a   :  { %v647_v31 = vpop.trf.xlu0 }
 0x46b   :  { %5217 = vmatmul.msk.f32.vlgmr.msra.gmra.mxu3 %vm663_vm11, %v647_v31  ;;  %v5296_v31 = vor.u32 %v6596_v25, %v5295_v23  ;;  %v6977_v23 = vld [vmem:[%s7187_s12] ss:$0 sm:$0xff]  ;;  %s8219_s12 = sld [smem:[#allocation7_spill]] }
 0x46d   :  { %1132 = vmatpush.bf16.msrb.mxu2 %v5296_v31 }
 0x472   :  { %v648_v32 = vpop.trf.xlu0  ;;  %v794_v33 = vpop.trf.xlu1 }
 0x473   :  { %5218 = vmatmul.msk.f32.gmra.mxu3 %vm663_vm11, %v648_v32  ;;  %5226 = vmatmul.msk.f32.vlgmr.msrb.gmra.mxu1 %vm663_vm11, %v794_v33  ;;  %v5297_v32 = vld [vmem:[%s7197_s27 + $0xc0] sm:$0xf0]  ;;  %v5303_v33 = vld [vmem:[%s7197_s27 + $0x88] sm:$0xf] }
 0x47a   :  { %v795_v34 = vpop.trf.xlu1 }
 0x47b   :  { %5227 = vmatmul.msk.f32.gmra.mxu1 %vm663_vm11, %v795_v34  ;;  %v6597_v34 = vld [vmem:[%s7197_s27 + $0xc4] sm:$0xf0] }
 0x47c   :  { %v5304_v36 = vor.u32 %v6597_v34, %v5303_v33  ;;  %v5327_v33 = vld [vmem:[%s7197_s27 + $0xa0] sm:$0xf] }
 0x47d   :  { %v6600_v34 = vld [vmem:[%s7197_s27 + $0xdc] sm:$0xf0] }
 0x47e   :  { %1158 = vmatpush.bf16.msrb.mxu0 %v5304_v36  ;;  %v5329_v36 = vld [vmem:[%s7197_s27 + $0xe0] sm:$0xf0] }
 0x4ae   :  { %v846_v48 = vpop.permute.xlu0 %845 }
 0x4ee   :  { %v699_v41 = vpop.f32.mrf.mxu3 }
 0x4ef   :  { %v713_v43 = vmul.f32 %v708_v35, %v699_v41  ;;  %v5300_v35 = vor.u32 %v6588_v26, %v5297_v32  ;;  %v6580_v41 = vld [vmem:[%s7197_s27 + $0x3c] sm:$0xf0] }
 0x4f0   :  { %v833_v42 = vpop.f32.mrf.mxu1  ;;  %v6978_v26 = vld [vmem:[%s7192_s20] ss:$0 sm:$0xff]  ;;  %s8220_s20 = sld [smem:[#allocation19_spill]] }
 0x4f1   :  { %v849_v46 = vmul.f32 %v844_v44, %v833_v42  ;;  %v715_v50 = vsel %vm542_vm1, %v713_v43, 0.0  ;;  %1145 = vmatpush.bf16.msrb.mxu3 %v5300_v35  ;;  %v6572_v42 = vld [vmem:[%s7197_s27 + $0x4] sm:$0xf] }
 0x4f2   :  { %v5233_v44 = vld [vmem:[%s7197_s27 + $0x40] sm:$0xf0] }
 0x4f3   :  { %v851_v54 = vsel %vm542_vm1, %v849_v46, 0.0  ;;  %v6581_v46 = vld [vmem:[%s7197_s27 + $0x44] sm:$0xf0]  ;;  %v6592_v35 = vld [vmem:[%s7197_s27 + $0xa4] sm:$0xf] }
 0x4f6   :  { %v702_v45 = vpop.f32.mrf.mxu3 }
 0x4f7   :  { %v714_v47 = vmul.f32 %v710_v40, %v702_v45  ;;  %v5231_v40 = vld [vmem:[%s7197_s27] sm:$0xf]  ;;  %v5239_v45 = vld [vmem:[%s7197_s27 + $0x8] sm:$0xf] }
 0x4f8   :  { %v836_v49 = vpop.f32.mrf.mxu1  ;;  %v5232_v43 = vor.u32 %v6580_v41, %v5231_v40  ;;  %v6593_v40 = vld [vmem:[%s7197_s27 + $0xac] sm:$0xf] }
 0x4f9   :  { %v717_v51 = vsel %vm716_vm9, %v714_v47, 0.0  ;;  %v850_v52 = vmul.f32 %v846_v48, %v836_v49  ;;  %v5236_v47 = vor.u32 %v6572_v42, %v5233_v44  ;;  %v5240_v48 = vor.u32 %v6581_v46, %v5239_v45  ;;  %v6573_v49 = vld [vmem:[%s7197_s27 + $0xc] sm:$0xf]  ;;  %v5263_v44 = vld [vmem:[%s7197_s27 + $0x20] sm:$0xf] }
 0x4fa   :  { %v718_v53 = vadd.f32 %v717_v51, %v715_v50  ;;  %v5241_v50 = vld [vmem:[%s7197_s27 + $0x48] sm:$0xf0]  ;;  %1133 = vmatpush.bf16.msrb.mxu2 %v5232_v43  ;;  %v5328_v42 = vor.u32 %v6600_v34, %v5327_v33  ;;  %v5332_v43 = vor.u32 %v6592_v35, %v5329_v36  ;;  %v6584_v45 = vld [vmem:[%s7197_s27 + $0x5c] sm:$0xf0]  ;;  %v5336_v46 = vor.u32 %v6601_v39, %v5335_v37 }
 0x4fb   :  { %v852_v55 = vsel %vm716_vm9, %v850_v52, 0.0  ;;  %v5244_v51 = vor.u32 %v6573_v49, %v5241_v50  ;;  %1146 = vmatpush.bf16.msrb.mxu3 %v5236_v47  ;;  %1159 = vmatpush.bf16.msrb.mxu0 %v5240_v48  ;;  %v5337_v41 = vld [vmem:[%s7197_s27 + $0xe8] sm:$0xf0]  ;;  %v6576_v48 = vld [vmem:[%s7197_s27 + $0x24] sm:$0xf] }
 0x4fc   :  { %v719_v56 = vrot.slane %v718_v53, 4  ;;  %v853_v57 = vadd.f32 %v852_v55, %v851_v54  ;;  %v6598_v54 = vld [vmem:[%s7197_s27 + $0xcc] sm:$0xf0]  ;;  %v6590_v55 = vld [vmem:[%s7197_s27 + $0x94] sm:$0xf]  ;;  %v5340_v47 = vor.u32 %v6593_v40, %v5337_v41  ;;  %v6625_v33 = vld [vmem:[%s7207_s13 + $0xa8] sm:$0xff] }
 0x4fd   :  { %1172 = vmatpush.bf16.msra.mxu1 %v5244_v51  ;;  %v5265_v49 = vld [vmem:[%s7197_s27 + $0x60] sm:$0xf0]  ;;  %v5271_v50 = vld [vmem:[%s7197_s27 + $0x28] sm:$0xf] }
 0x4fe   :  { %v720_v58 = vadd.f32 %v719_v56, %v718_v53  ;;  %v854_v60 = vrot.slane %v853_v57, 4  ;;  %v5311_v53 = vld [vmem:[%s7197_s27 + $0x90] sm:$0xf]  ;;  %v6585_v51 = vld [vmem:[%s7197_s27 + $0x64] sm:$0xf0]  ;;  %v6624_v37 = vld [vmem:[%s7207_s13 + $0xa0] sm:$0xff] }
 0x4ff   :  { %v6633_v34 = vld [vmem:[%s7207_s13 + $0xe8] sm:$0xff]  ;;  %v6632_v39 = vld [vmem:[%s7207_s13 + $0xe0] sm:$0xff] }
 0x500   :  { %v721_v61 = vrot.slane %v720_v58, 2  ;;  %v855_v62 = vadd.f32 %v854_v60, %v853_v57  ;;  %v5312_v57 = vor.u32 %v6598_v54, %v5311_v53  ;;  %v5319_v60 = vld [vmem:[%s7197_s27 + $0x98] sm:$0xf]  ;;  %v5273_v53 = vld [vmem:[%s7197_s27 + $0x68] sm:$0xf0]  ;;  %v5264_v54 = vor.u32 %v6584_v45, %v5263_v44  ;;  %v6608_v40 = vld [vmem:[%s7207_s13 + $0x20] sm:$0xff] }
 0x501   :  { %v6609_v35 = vld [vmem:[%s7207_s13 + $0x28] sm:$0xff]  ;;  %v6616_v41 = vld [vmem:[%s7207_s13 + $0x60] sm:$0xff]  ;;  %v6607_v44 = vld [vmem:[%s7207_s13 + $0x18] sm:$0xff] }
 0x502   :  { %v722_v63 = vadd.f32 %v721_v61, %v720_v58  ;;  %v856_v0 = vrot.slane %v855_v62, 2  ;;  %v5313_v58 = vld [vmem:[%s7197_s27 + $0xd0] sm:$0xf0]  ;;  %v6599_v61 = vld [vmem:[%s7197_s27 + $0xd4] sm:$0xf0]  ;;  %v6617_v36 = vld [vmem:[%s7207_s13 + $0x68] sm:$0xff] }
 0x503   :  { %v6615_v45 = vld [vmem:[%s7207_s13 + $0x58] sm:$0xff] }
 0x504   :  { %v723_v1 = vrot.slane %v722_v63, 1  ;;  %v857_v2 = vadd.f32 %v856_v0, %v855_v62  ;;  %v5316_v62 = vor.u32 %v6590_v55, %v5313_v58  ;;  %v6591_v0 = vld [vmem:[%s7197_s27 + $0x9c] sm:$0xf]  ;;  %v5268_v55 = vor.u32 %v6576_v48, %v5265_v49  ;;  %v5343_v58 = vld [vmem:[%s7197_s27 + $0xb0] sm:$0xf] }
 0x505   :  { %v6606_v48 = vld [vmem:[%s7207_s13 + $0x10] sm:$0xff] }
 0x506   :  { %v858_v3 = vrot.slane %v857_v2, 1  ;;  %v724_v4 = vadd.f32 %v723_v1, %v722_v63  ;;  %v5320_v63 = vor.u32 %v6599_v61, %v5319_v60  ;;  %v5321_v1 = vld [vmem:[%s7197_s27 + $0xd8] sm:$0xf0]  ;;  %1197 = vmatpush.bf16.msra.mxu3 %v5316_v62  ;;  %v6602_v60 = vld [vmem:[%s7197_s27 + $0xec] sm:$0xf0] }
 0x507   :  { %v6594_v61 = vld [vmem:[%s7197_s27 + $0xb4] sm:$0xf] }
 0x508   :  { %v859_v5 = vadd.f32 %v858_v3, %v857_v2  ;;  %v5247_v2 = vld [vmem:[%s7197_s27 + $0x10] sm:$0xf]  ;;  %1210 = vmatpush.bf16.msra.mxu0 %v5320_v63  ;;  %v5345_v62 = vld [vmem:[%s7197_s27 + $0xf0] sm:$0xf0]  ;;  %v5351_v63 = vld [vmem:[%s7197_s27 + $0xb8] sm:$0xf] }
 0x509   :  { %v6614_v49 = vld [vmem:[%s7207_s13 + $0x50] sm:$0xff] }
 0x50a   :  { %v861_v6 = vsel %vm860_vm2, %v724_v4, %v859_v5  ;;  %v5324_v4 = vor.u32 %v6591_v0, %v5321_v1  ;;  %v6582_v5 = vld [vmem:[%s7197_s27 + $0x4c] sm:$0xf0]  ;;  %v6603_v0 = vld [vmem:[%s7197_s27 + $0xf4] sm:$0xf0]  ;;  %v6595_v1 = vld [vmem:[%s7197_s27 + $0xbc] sm:$0xf] }
 0x50b   :  { %5228 = vmatmul.msk.f32.vlgmr.msra.gmra.mxu2 %vm542_vm1, %v861_v6  ;;  %v6574_v6 = vld [vmem:[%s7197_s27 + $0x14] sm:$0xf] }
 0x50c   :  { %1184 = vmatpush.bf16.msra.mxu2 %v5312_v57  ;;  %1223 = vmatpush.bf16.msrb.mxu1 %v5324_v4  ;;  %v5348_v4 = vor.u32 %v6594_v61, %v5345_v62  ;;  %v6651_v61 = vld [vmem:[%s7207_s13 + $0x178] sm:$0xff]  ;;  %v6658_v62 = vld [vmem:[%s7207_s13 + $0x1b0] sm:$0xff] }
 0x510   :  { %1224 = vmatpush.bf16.msrb.mxu1 %v5260_v15 }
 0x58e   :  { %v886_v8 = vpop.f32.mrf.mxu2 }
 0x58f   :  { %v887_v9 = vadd.f32 %v6976_v7, %v886_v8  ;;  %v5248_v7 = vor.u32 %v6582_v5, %v5247_v2  ;;  %v5249_v8 = vld [vmem:[%s7197_s27 + $0x50] sm:$0xf0]  ;;  %v5353_v2 = vld [vmem:[%s7197_s27 + $0xf8] sm:$0xf0]  ;;  %v5279_v5 = vld [vmem:[%s7197_s27 + $0x30] sm:$0xf] }
 0x591   :  { %v889_v10 = vadd.f32 %v887_v9, %v7310_v24  ;;  %v5255_v9 = vld [vmem:[%s7197_s27 + $0x18] sm:$0xf]  ;;  %1185 = vmatpush.bf16.msra.mxu2 %v5248_v7  ;;  %v5352_v7 = vor.u32 %v6603_v0, %v5351_v63  ;;  %v6666_v63 = vld [vmem:[%s7207_s13 + $0x1f0] sm:$0xff] }
 0x592   :  { %v6642_v0 = vld [vmem:[%s7207_s13 + $0x130] sm:$0xff] }
 0x593   :  { %v891_v11 = vsel %vm890_vm10, %v889_v10, 0.0 }
 0x594   :  { %892 = vadd.xlane.f32.xlu2 %v891_v11  ;;  %v5252_v11 = vor.u32 %v6574_v6, %v5249_v8  ;;  %v6586_v6 = vld [vmem:[%s7197_s27 + $0x6c] sm:$0xf0]  ;;  %v5356_v8 = vor.u32 %v6595_v1, %v5353_v2  ;;  %v6657_v2 = vld [vmem:[%s7207_s13 + $0x1a8] sm:$0xff] }
 0x595   :  { %v5280_v15 = vor.u32 %v6586_v6, %v5279_v5  ;;  %v6650_v1 = vld [vmem:[%s7207_s13 + $0x170] sm:$0xff]  ;;  %v6649_v5 = vld [vmem:[%s7207_s13 + $0x168] sm:$0xff]  ;;  %v6656_v6 = vld [vmem:[%s7207_s13 + $0x1a0] sm:$0xff] }
 0x596   :  { %1198 = vmatpush.bf16.msra.mxu3 %v5252_v11  ;;  %v5287_v11 = vld [vmem:[%s7197_s27 + $0x38] sm:$0xf] }
 0x607   :  { %v893_v24 = vpop.xlane.xlu2 %892 }
 0x608   :  { %v901_v19 = vmul.f32 %v7412_v18, %v893_v24 }
 0x60a   :  { %v7415_v20 = vsub.f32 %v889_v10, %v901_v19  ;;  %v6583_v10 = vld [vmem:[%s7197_s27 + $0x54] sm:$0xf0] }
 0x60b   :  { %v5256_v12 = vor.u32 %v6583_v10, %v5255_v9  ;;  %v6578_v9 = vld [vmem:[%s7197_s27 + $0x34] sm:$0xf] }
 0x60c   :  { %v903_v21 = vmul.f32 %v7415_v20, %v7415_v20  ;;  %v5281_v10 = vld [vmem:[%s7197_s27 + $0x70] sm:$0xf0] }
 0x60d   :  { %1211 = vmatpush.bf16.msra.mxu0 %v5256_v12  ;;  %v6587_v12 = vld [vmem:[%s7197_s27 + $0x74] sm:$0xf0] }
 0x60e   :  { %v904_v22 = vsel %vm890_vm10, %v903_v21, 0.0 }
 0x60f   :  { %905 = vadd.xlane.f32.xlu1 %v904_v22 }
 0x682   :  { %v906_v52 = vpop.xlane.xlu1 %905 }
 0x683   :  { %v907_v56 = vmul.f32 %v906_v52, %v7412_v18  ;;  %v6577_v52 = vld [vmem:[%s7197_s27 + $0x2c] sm:$0xf]  ;;  %s8221_s27 = sld [smem:[#allocation17_spill]] }
 0x684   :  { %v5276_v57 = vor.u32 %v6577_v52, %v5273_v53  ;;  %v6613_v52 = vld [vmem:[%s7207_s13 + $0x48] sm:$0xff]  ;;  %v6620_v53 = vld [vmem:[%s7207_s13 + $0x80] sm:$0xff] }
 0x685   :  { %v908_v3 = vadd.f32 1e-05, %v907_v56  ;;  %v5272_v56 = vor.u32 %v6585_v51, %v5271_v50  ;;  %v6621_v50 = vld [vmem:[%s7207_s13 + $0x88] sm:$0xff] }
 0x686   :  { %v6605_v51 = vld [vmem:[%s7207_s13 + $0x8] sm:$0xff] }
 0x687   :  { %7000 = vrsqrt.f32 %v908_v3  ;;  %vm915_vm14 = vweird.f32 %v908_v3 }
 0x68d   :  { %v7001_v16 = vpop.eup %7000 }
 0x68e   :  { %v910_v17 = vmul.f32 %v7001_v16, %v908_v3  ;;  %vm916_vm13 = vweird.f32 %v7001_v16  ;;  %v5344_v3 = vor.u32 %v6602_v60, %v5343_v58  ;;  %v6612_v58 = vld [vmem:[%s7207_s13 + $0x40] sm:$0xff]  ;;  %v6643_v60 = vld [vmem:[%s7207_s13 + $0x138] sm:$0xff] }
 0x68f   :  { %vm917_vm15 = vmor %vm915_vm14, %vm916_vm13 }
 0x690   :  { %v911_v24 = vmul.f32 %v7001_v16, %v910_v17  ;;  %v5288_v17 = vor.u32 %v6587_v12, %v5287_v11  ;;  %v6663_v11 = vld [vmem:[%s7207_s13 + $0x1d8] sm:$0xff]  ;;  %v6654_v12 = vld [vmem:[%s7207_s13 + $0x190] sm:$0xff] }
 0x692   :  { %v912_v19 = vmul.f32 0.5, %v911_v24  ;;  %v5292_v24 = vor.u32 %v6579_v13, %v5289_v14  ;;  %v6662_v13 = vld [vmem:[%s7207_s13 + $0x1d0] sm:$0xff]  ;;  %v6639_v14 = vld [vmem:[%s7207_s13 + $0x118] sm:$0xff] }
 0x694   :  { %v913_v21 = vsub.f32 1.5, %v912_v19  ;;  %v6627_v19 = vld [vmem:[%s7207_s13 + $0xb8] sm:$0xff] }
 0x696   :  { %v914_v22 = vmul.f32 %v7001_v16, %v913_v21  ;;  %v6635_v21 = vld [vmem:[%s7207_s13 + $0xf8] sm:$0xff] }
 0x698   :  { %v918_v25 = vsel %vm917_vm15, %v7001_v16, %v914_v22  ;;  %v5284_v16 = vor.u32 %v6578_v9, %v5281_v10  ;;  %v6611_v22 = vld [vmem:[%s7207_s13 + $0x38] sm:$0xff]  ;;  %v6648_v9 = vld [vmem:[%s7207_s13 + $0x160] sm:$0xff] }
 0x699   :  { %v919_v31 = vmul.f32 %v918_v25, %v7415_v20  ;;  %v6626_v25 = vld [vmem:[%s7207_s13 + $0xb0] sm:$0xff]  ;;  %v6655_v10 = vld [vmem:[%s7207_s13 + $0x198] sm:$0xff] }
 0x69b   :  { %v923_v32 = vmul.f32 %v6977_v23, %v919_v31  ;;  %v6619_v23 = vld [vmem:[%s7207_s13 + $0x78] sm:$0xff]  ;;  %v6610_v31 = vld [vmem:[%s7207_s13 + $0x30] sm:$0xff] }
 0x69d   :  { %v7461_v38 = vadd.f32 %v6978_v26, %v923_v32  ;;  %v6634_v26 = vld [vmem:[%s7207_s13 + $0xf0] sm:$0xff] }
 0x69e   :  { %v6618_v32 = vld [vmem:[%s7207_s13 + $0x70] sm:$0xff] }
 0x69f   :  { %v7468_v20 = vpack.c.bf16 %v7461_v38, %v7461_v38 }
 0x6a1   :  { %5357 = vmatmul.msk.bf16.vlgmr.msrb.gmra.mxu2 %vm542_vm1, %v7468_v20  ;;  %5358 = vmatmul.msk.bf16.vlgmr.msrb.gmra.mxu3 %vm542_vm1, %v7468_v20 }
 0x6a2   :  { %5359 = vmatmul.msk.bf16.vlgmr.msrb.gmra.mxu0 %vm542_vm1, %v7468_v20  ;;  %5360 = vmatmul.msk.bf16.vlgmr.msra.gmra.mxu1 %vm542_vm1, %v7468_v20 }
 0x6a3   :  { %1236 = vmatpush.bf16.msrb.mxu2 %v5328_v42  ;;  %1249 = vmatpush.bf16.msrb.mxu3 %v5332_v43  ;;  %v6623_v42 = vld [vmem:[%s7207_s13 + $0x98] sm:$0xff] }
 0x6a4   :  { %1262 = vmatpush.bf16.msrb.mxu0 %v5336_v46  ;;  %1275 = vmatpush.bf16.msra.mxu1 %v5340_v47  ;;  %v6631_v43 = vld [vmem:[%s7207_s13 + $0xd8] sm:$0xff]  ;;  %v6622_v46 = vld [vmem:[%s7207_s13 + $0x90] sm:$0xff] }
 0x6a5   :  { %v6630_v47 = vld [vmem:[%s7207_s13 + $0xd0] sm:$0xff] }
 0x6a7   :  { %1237 = vmatpush.bf16.msrb.mxu2 %v5264_v54  ;;  %1250 = vmatpush.bf16.msrb.mxu3 %v5268_v55  ;;  %v6628_v54 = vld [vmem:[%s7207_s13 + $0xc0] sm:$0xff]  ;;  %v6659_v55 = vld [vmem:[%s7207_s13 + $0x1b8] sm:$0xff] }
 0x6a8   :  { %1263 = vmatpush.bf16.msrb.mxu0 %v5272_v56  ;;  %1276 = vmatpush.bf16.msra.mxu1 %v5276_v57  ;;  %v6667_v56 = vld [vmem:[%s7207_s13 + $0x1f8] sm:$0xff]  ;;  %v6604_v57 = vld [vmem:[%s7207_s13] sm:$0xff] }
 0x6b1   :  { %5361 = vmatmul.msk.bf16.vlgmr.msra.gmra.mxu2 %vm542_vm1, %v7468_v20  ;;  %5362 = vmatmul.msk.bf16.vlgmr.msra.gmra.mxu3 %vm542_vm1, %v7468_v20 }
 0x6b2   :  { %5363 = vmatmul.msk.bf16.vlgmr.msra.gmra.mxu0 %vm542_vm1, %v7468_v20  ;;  %5364 = vmatmul.msk.bf16.vlgmr.msrb.gmra.mxu1 %vm542_vm1, %v7468_v20 }
 0x6b3   :  { %1288 = vmatpush.bf16.msra.mxu2 %v5344_v3  ;;  %1301 = vmatpush.bf16.msra.mxu3 %v5348_v4  ;;  %v6665_v3 = vld [vmem:[%s7207_s13 + $0x1e8] sm:$0xff] }
 0x6b4   :  { %1314 = vmatpush.bf16.msra.mxu0 %v5352_v7  ;;  %1327 = vmatpush.bf16.msrb.mxu1 %v5356_v8  ;;  %v6641_v4 = vld [vmem:[%s7207_s13 + $0x128] sm:$0xff]  ;;  %v6664_v7 = vld [vmem:[%s7207_s13 + $0x1e0] sm:$0xff] }
 0x6b5   :  { %v6640_v8 = vld [vmem:[%s7207_s13 + $0x120] sm:$0xff] }
 0x6b7   :  { %1289 = vmatpush.bf16.msra.mxu2 %v5280_v15  ;;  %1302 = vmatpush.bf16.msra.mxu3 %v5284_v16  ;;  %v6647_v15 = vld [vmem:[%s7207_s13 + $0x158] sm:$0xff]  ;;  %v6653_v16 = vld [vmem:[%s7207_s13 + $0x188] sm:$0xff] }
 0x6b8   :  { %1315 = vmatpush.bf16.msra.mxu0 %v5288_v17  ;;  %1328 = vmatpush.bf16.msrb.mxu1 %v5292_v24  ;;  %v6661_v17 = vld [vmem:[%s7207_s13 + $0x1c8] sm:$0xff]  ;;  %v6638_v24 = vld [vmem:[%s7207_s13 + $0x110] sm:$0xff] }
 0x6c1   :  { %5365 = vmatmul.msk.bf16.vlgmr.msrb.gmra.mxu2 %vm542_vm1, %v7468_v20  ;;  %5366 = vmatmul.msk.bf16.vlgmr.msrb.gmra.mxu3 %vm542_vm1, %v7468_v20 }
 0x6c2   :  { %5367 = vmatmul.msk.bf16.vlgmr.msrb.gmra.mxu0 %vm542_vm1, %v7468_v20  ;;  %5368 = vmatmul.msk.bf16.vlgmr.msra.gmra.mxu1 %vm542_vm1, %v7468_v20 }
 0x6c3   :  { %2163 = vmatpush.bf16.msrb.mxu0 %v6627_v19  ;;  %2176 = vmatpush.bf16.msra.mxu1 %v6635_v21  ;;  %v6646_v19 = vld [vmem:[%s7207_s13 + $0x150] sm:$0xff]  ;;  %v6652_v21 = vld [vmem:[%s7207_s13 + $0x180] sm:$0xff] }
 0x6c4   :  { %2137 = vmatpush.bf16.msrb.mxu2 %v6611_v22  ;;  %2150 = vmatpush.bf16.msrb.mxu3 %v6619_v23  ;;  %v6660_v22 = vld [vmem:[%s7207_s13 + $0x1c0] sm:$0xff]  ;;  %v6637_v23 = vld [vmem:[%s7207_s13 + $0x108] sm:$0xff] }
 0x6c7   :  { %2164 = vmatpush.bf16.msrb.mxu0 %v6626_v25  ;;  %2177 = vmatpush.bf16.msra.mxu1 %v6634_v26  ;;  %v6645_v25 = vld [vmem:[%s7207_s13 + $0x148] sm:$0xff]  ;;  %v6636_v26 = vld [vmem:[%s7207_s13 + $0x100] sm:$0xff] }
 0x6c8   :  { %2138 = vmatpush.bf16.msrb.mxu2 %v6610_v31  ;;  %2151 = vmatpush.bf16.msrb.mxu3 %v6618_v32  ;;  %v6644_v31 = vld [vmem:[%s7207_s13 + $0x140] sm:$0xff] }
 0x6c9   :  { %v7591_v32 = vld [vmem:[%s7202_s4] sm:$0xff] }
 0x6cb   :  { %2165 = vmatpush.bf16.msrb.mxu0 %v6625_v33  ;;  %2178 = vmatpush.bf16.msra.mxu1 %v6633_v34  ;;  %v933_v33 = vperm.slane %v7591_v32, 2  ;;  %v934_v34 = vperm.slane %v7591_v32, 3 }
 0x6cc   :  { %2139 = vmatpush.bf16.msrb.mxu2 %v6609_v35  ;;  %2152 = vmatpush.bf16.msrb.mxu3 %v6617_v36 }
 0x6cf   :  { %2166 = vmatpush.bf16.msrb.mxu0 %v6624_v37  ;;  %2179 = vmatpush.bf16.msra.mxu1 %v6632_v39 }
 0x6d0   :  { %2140 = vmatpush.bf16.msrb.mxu2 %v6608_v40  ;;  %2153 = vmatpush.bf16.msrb.mxu3 %v6616_v41  ;;  %v931_v40 = vperm.slane %v7591_v32, 0  ;;  %v932_v41 = vperm.slane %v7591_v32, 1 }
 0x6d1   :  { %5369 = vmatmul.msk.bf16.vlgmr.msra.gmra.mxu2 %vm542_vm1, %v7468_v20  ;;  %5370 = vmatmul.msk.bf16.vlgmr.msra.gmra.mxu3 %vm542_vm1, %v7468_v20 }
 0x6d2   :  { %5371 = vmatmul.msk.bf16.vlgmr.msra.gmra.mxu0 %vm542_vm1, %v7468_v20  ;;  %5372 = vmatmul.msk.bf16.vlgmr.msrb.gmra.mxu1 %vm542_vm1, %v7468_v20  ;;  %v6629_v20 = vld [vmem:[%s7207_s13 + $0xc8] sm:$0xff] }
 0x6d3   :  { %2167 = vmatpush.bf16.msrb.mxu0 %v6623_v42  ;;  %2180 = vmatpush.bf16.msra.mxu1 %v6631_v43 }
 0x6d4   :  { %2141 = vmatpush.bf16.msrb.mxu2 %v6607_v44  ;;  %2154 = vmatpush.bf16.msrb.mxu3 %v6615_v45  ;;  %v6691_v44 = vld [vmem:[%s7207_s13 + $0x2b8] sm:$0xff] }
 0x6d5   :  { %v6699_v45 = vld [vmem:[%s7207_s13 + $0x2f8] sm:$0xff] }
 0x6d7   :  { %2168 = vmatpush.bf16.msrb.mxu0 %v6622_v46  ;;  %2181 = vmatpush.bf16.msra.mxu1 %v6630_v47 }
 0x6d8   :  { %2142 = vmatpush.bf16.msrb.mxu2 %v6606_v48  ;;  %2155 = vmatpush.bf16.msrb.mxu3 %v6614_v49 }
 0x6db   :  { %2169 = vmatpush.bf16.msrb.mxu0 %v6621_v50  ;;  %2182 = vmatpush.bf16.msra.mxu1 %v6629_v20 }
 0x6dc   :  { %2143 = vmatpush.bf16.msrb.mxu2 %v6605_v51  ;;  %2156 = vmatpush.bf16.msrb.mxu3 %v6613_v52 }
 0x6df   :  { %2170 = vmatpush.bf16.msrb.mxu0 %v6620_v53  ;;  %2183 = vmatpush.bf16.msra.mxu1 %v6628_v54 }
 0x6e0   :  { %2144 = vmatpush.bf16.msrb.mxu2 %v6604_v57  ;;  %2157 = vmatpush.bf16.msrb.mxu3 %v6612_v58 }
 0x6e3   :  { %2215 = vmatpush.bf16.msra.mxu0 %v6659_v55  ;;  %2228 = vmatpush.bf16.msrb.mxu1 %v6667_v56  ;;  %v6690_v55 = vld [vmem:[%s7207_s13 + $0x2b0] sm:$0xff] }
 0x6e4   :  { %2189 = vmatpush.bf16.msra.mxu2 %v6643_v60  ;;  %2202 = vmatpush.bf16.msra.mxu3 %v6651_v61  ;;  %v6698_v56 = vld [vmem:[%s7207_s13 + $0x2f0] sm:$0xff]  ;;  %v6675_v60 = vld [vmem:[%s7207_s13 + $0x238] sm:$0xff] }
 0x6e5   :  { %v6683_v61 = vld [vmem:[%s7207_s13 + $0x278] sm:$0xff] }
 0x6e7   :  { %2216 = vmatpush.bf16.msra.mxu0 %v6658_v62  ;;  %2229 = vmatpush.bf16.msrb.mxu1 %v6666_v63  ;;  %v6689_v62 = vld [vmem:[%s7207_s13 + $0x2a8] sm:$0xff] }
 0x6e8   :  { %2190 = vmatpush.bf16.msra.mxu2 %v6642_v0  ;;  %2203 = vmatpush.bf16.msra.mxu3 %v6650_v1  ;;  %v6697_v63 = vld [vmem:[%s7207_s13 + $0x2e8] sm:$0xff] }
 0x6eb   :  { %2217 = vmatpush.bf16.msra.mxu0 %v6657_v2  ;;  %2230 = vmatpush.bf16.msrb.mxu1 %v6665_v3  ;;  %v937_v2 = vperm.slane %v7591_v32, 6  ;;  %v938_v3 = vperm.slane %v7591_v32, 7 }
 0x6ec   :  { %2191 = vmatpush.bf16.msra.mxu2 %v6641_v4  ;;  %2204 = vmatpush.bf16.msra.mxu3 %v6649_v5  ;;  %v6674_v4 = vld [vmem:[%s7207_s13 + $0x230] sm:$0xff] }
 0x6ed   :  { %v6682_v5 = vld [vmem:[%s7207_s13 + $0x270] sm:$0xff] }
 0x6ef   :  { %2218 = vmatpush.bf16.msra.mxu0 %v6656_v6  ;;  %2231 = vmatpush.bf16.msrb.mxu1 %v6664_v7 }
 0x6f0   :  { %2192 = vmatpush.bf16.msra.mxu2 %v6640_v8  ;;  %2205 = vmatpush.bf16.msra.mxu3 %v6648_v9  ;;  %v6688_v8 = vld [vmem:[%s7207_s13 + $0x2a0] sm:$0xff] }
 0x6f1   :  { %v6696_v9 = vld [vmem:[%s7207_s13 + $0x2e0] sm:$0xff] }
 0x6f3   :  { %2219 = vmatpush.bf16.msra.mxu0 %v6655_v10  ;;  %2232 = vmatpush.bf16.msrb.mxu1 %v6663_v11 }
 0x6f4   :  { %2193 = vmatpush.bf16.msra.mxu2 %v6639_v14  ;;  %2206 = vmatpush.bf16.msra.mxu3 %v6647_v15  ;;  %v935_v14 = vperm.slane %v7591_v32, 4  ;;  %v936_v15 = vperm.slane %v7591_v32, 5  ;;  %v6680_v32 = vld [vmem:[%s7207_s13 + $0x260] sm:$0xff] }
 0x6f7   :  { %2220 = vmatpush.bf16.msra.mxu0 %v6654_v12  ;;  %2233 = vmatpush.bf16.msrb.mxu1 %v6662_v13  ;;  %v6673_v12 = vld [vmem:[%s7207_s13 + $0x228] sm:$0xff] }
 0x6f8   :  { %2194 = vmatpush.bf16.msra.mxu2 %v6638_v24  ;;  %2207 = vmatpush.bf16.msra.mxu3 %v6646_v19  ;;  %v6681_v13 = vld [vmem:[%s7207_s13 + $0x268] sm:$0xff]  ;;  %v6687_v24 = vld [vmem:[%s7207_s13 + $0x298] sm:$0xff] }
 0x6f9   :  { %v6695_v19 = vld [vmem:[%s7207_s13 + $0x2d8] sm:$0xff] }
 0x6fb   :  { %2221 = vmatpush.bf16.msra.mxu0 %v6653_v16  ;;  %2234 = vmatpush.bf16.msrb.mxu1 %v6661_v17 }
 0x6fc   :  { %2195 = vmatpush.bf16.msra.mxu2 %v6637_v23  ;;  %2208 = vmatpush.bf16.msra.mxu3 %v6645_v25 }
 0x6ff   :  { %2222 = vmatpush.bf16.msra.mxu0 %v6652_v21  ;;  %2235 = vmatpush.bf16.msrb.mxu1 %v6660_v22 }
 0x700   :  { %2196 = vmatpush.bf16.msra.mxu2 %v6636_v26  ;;  %2209 = vmatpush.bf16.msra.mxu3 %v6644_v31 }
 0x71f   :  { %v1161_v35 = vpop.f32.mrf.mxu0  ;;  %v1174_v36 = vpop.f32.mrf.mxu1 }
 0x720   :  { %v1162_v37 = vadd.f32 %v1161_v35, %v933_v33  ;;  %v1175_v39 = vadd.f32 %v1174_v36, %v934_v34  ;;  %v6672_v33 = vld [vmem:[%s7207_s13 + $0x220] sm:$0xff] }
 0x722   :  { %v1336_v42 = vmax.f32 %v1162_v37, 0.0  ;;  %v1337_v43 = vmax.f32 %v1175_v39, 0.0  ;;  %v6686_v39 = vld [vmem:[%s7207_s13 + $0x290] sm:$0xff] }
 0x724   :  { %v1352_v46 = vpack.c.bf16 %v1336_v42, %v1336_v42  ;;  %v1353_v47 = vpack.c.bf16 %v1337_v43, %v1337_v43  ;;  %v1135_v48 = vpop.f32.mrf.mxu2  ;;  %v1148_v49 = vpop.f32.mrf.mxu3  ;;  %v6671_v43 = vld [vmem:[%s7207_s13 + $0x218] sm:$0xff] }
 0x725   :  { %v1136_v50 = vadd.f32 %v1135_v48, %v931_v40  ;;  %v1149_v20 = vadd.f32 %v1148_v49, %v932_v41  ;;  %v6694_v40 = vld [vmem:[%s7207_s13 + $0x2d0] sm:$0xff] }
 0x726   :  { %2171 = vmatmul.bf16.vlgmr.msrb.gmra.mxu0 %v1352_v46  ;;  %2184 = vmatmul.bf16.vlgmr.msra.gmra.mxu1 %v1353_v47  ;;  %v6685_v46 = vld [vmem:[%s7207_s13 + $0x288] sm:$0xff] }
 0x727   :  { %v1334_v51 = vmax.f32 %v1136_v50, 0.0  ;;  %v1335_v52 = vmax.f32 %v1149_v20, 0.0  ;;  %2267 = vmatpush.bf16.msrb.mxu0 %v6691_v44  ;;  %2280 = vmatpush.bf16.msra.mxu1 %v6699_v45  ;;  %v1163_v53 = vpop.f32.mrf.mxu0  ;;  %v1176_v54 = vpop.f32.mrf.mxu1  ;;  %v6679_v44 = vld [vmem:[%s7207_s13 + $0x258] sm:$0xff]  ;;  %v7624_v45 = vld [vmem:[%s7202_s4 + $0x8] sm:$0xff]  ;;  %s8222_s4 = sld [smem:[#allocation18_spill]] }
 0x728   :  { %v6693_v47 = vld [vmem:[%s7207_s13 + $0x2c8] sm:$0xff]  ;;  %v941_v50 = vperm.slane %v7624_v45, 2  ;;  %v942_v20 = vperm.slane %v7624_v45, 3 }
 0x729   :  { %v1350_v57 = vpack.c.bf16 %v1334_v51, %v1334_v51  ;;  %v1351_v58 = vpack.c.bf16 %v1335_v52, %v1335_v52  ;;  %v6670_v51 = vld [vmem:[%s7207_s13 + $0x210] sm:$0xff] }
 0x72a   :  { %v6678_v52 = vld [vmem:[%s7207_s13 + $0x250] sm:$0xff] }
 0x72b   :  { %2268 = vmatpush.bf16.msrb.mxu0 %v6690_v55  ;;  %2281 = vmatpush.bf16.msra.mxu1 %v6698_v56  ;;  %v6684_v55 = vld [vmem:[%s7207_s13 + $0x280] sm:$0xff] }
 0x72c   :  { %2145 = vmatmul.bf16.vlgmr.msrb.gmra.mxu2 %v1350_v57  ;;  %2158 = vmatmul.bf16.vlgmr.msrb.gmra.mxu3 %v1351_v58  ;;  %v1137_v0 = vpop.f32.mrf.mxu2  ;;  %v1150_v1 = vpop.f32.mrf.mxu3  ;;  %v6692_v56 = vld [vmem:[%s7207_s13 + $0x2c0] sm:$0xff] }
 0x72d   :  { %2241 = vmatpush.bf16.msrb.mxu2 %v6675_v60  ;;  %2254 = vmatpush.bf16.msrb.mxu3 %v6683_v61  ;;  %v6723_v60 = vld [vmem:[%s7207_s13 + $0x3b8] sm:$0xff]  ;;  %v939_v0 = vperm.slane %v7624_v45, 0  ;;  %v940_v1 = vperm.slane %v7624_v45, 1 }
 0x72e   :  { %v6731_v61 = vld [vmem:[%s7207_s13 + $0x3f8] sm:$0xff] }
 0x72f   :  { %2269 = vmatpush.bf16.msrb.mxu0 %v6689_v62  ;;  %2282 = vmatpush.bf16.msra.mxu1 %v6697_v63  ;;  %v1213_v6 = vpop.f32.mrf.mxu0  ;;  %v1226_v7 = vpop.f32.mrf.mxu1  ;;  %v6669_v62 = vld [vmem:[%s7207_s13 + $0x208] sm:$0xff] }
 0x730   :  { %v1214_v10 = vadd.f32 %v1213_v6, %v937_v2  ;;  %v1227_v11 = vadd.f32 %v1226_v7, %v938_v3  ;;  %v6677_v63 = vld [vmem:[%s7207_s13 + $0x248] sm:$0xff] }
 0x731   :  { %2242 = vmatpush.bf16.msrb.mxu2 %v6674_v4  ;;  %2255 = vmatpush.bf16.msrb.mxu3 %v6682_v5 }
 0x732   :  { %v1340_v16 = vmax.f32 %v1214_v10, 0.0  ;;  %v1341_v17 = vmax.f32 %v1227_v11, 0.0 }
 0x733   :  { %2270 = vmatpush.bf16.msrb.mxu0 %v6688_v8  ;;  %2283 = vmatpush.bf16.msra.mxu1 %v6696_v9  ;;  %v6722_v8 = vld [vmem:[%s7207_s13 + $0x3b0] sm:$0xff] }
 0x734   :  { %v1356_v21 = vpack.c.bf16 %v1340_v16, %v1340_v16  ;;  %v1357_v22 = vpack.c.bf16 %v1341_v17, %v1341_v17  ;;  %v1187_v23 = vpop.f32.mrf.mxu2  ;;  %v1200_v25 = vpop.f32.mrf.mxu3  ;;  %v6730_v9 = vld [vmem:[%s7207_s13 + $0x3f0] sm:$0xff] }
 0x735   :  { %2243 = vmatpush.bf16.msrb.mxu2 %v6673_v12  ;;  %2256 = vmatpush.bf16.msrb.mxu3 %v6681_v13  ;;  %v1188_v26 = vadd.f32 %v1187_v23, %v935_v14  ;;  %v1201_v31 = vadd.f32 %v1200_v25, %v936_v15  ;;  %v6668_v12 = vld [vmem:[%s7207_s13 + $0x200] sm:$0xff]  ;;  %v6707_v14 = vld [vmem:[%s7207_s13 + $0x338] sm:$0xff] }
 0x736   :  { %2223 = vmatmul.bf16.vlgmr.msra.gmra.mxu0 %v1356_v21  ;;  %2236 = vmatmul.bf16.vlgmr.msrb.gmra.mxu1 %v1357_v22  ;;  %v6676_v13 = vld [vmem:[%s7207_s13 + $0x240] sm:$0xff]  ;;  %v6715_v15 = vld [vmem:[%s7207_s13 + $0x378] sm:$0xff]  ;;  %v6721_v21 = vld [vmem:[%s7207_s13 + $0x3a8] sm:$0xff] }
 0x737   :  { %v1338_v34 = vmax.f32 %v1188_v26, 0.0  ;;  %v1339_v35 = vmax.f32 %v1201_v31, 0.0  ;;  %2271 = vmatpush.bf16.msrb.mxu0 %v6687_v24  ;;  %2284 = vmatpush.bf16.msra.mxu1 %v6695_v19  ;;  %v1215_v36 = vpop.f32.mrf.mxu0  ;;  %v1228_v37 = vpop.f32.mrf.mxu1  ;;  %v6729_v22 = vld [vmem:[%s7207_s13 + $0x3e8] sm:$0xff]  ;;  %v6706_v26 = vld [vmem:[%s7207_s13 + $0x330] sm:$0xff] }
 0x738   :  { %v6714_v31 = vld [vmem:[%s7207_s13 + $0x370] sm:$0xff]  ;;  %v6705_v36 = vld [vmem:[%s7207_s13 + $0x328] sm:$0xff] }
 0x739   :  { %v1354_v41 = vpack.c.bf16 %v1338_v34, %v1338_v34  ;;  %v1355_v42 = vpack.c.bf16 %v1339_v35, %v1339_v35  ;;  %2244 = vmatpush.bf16.msrb.mxu2 %v6672_v33  ;;  %2257 = vmatpush.bf16.msrb.mxu3 %v6680_v32  ;;  %v6720_v34 = vld [vmem:[%s7207_s13 + $0x3a0] sm:$0xff]  ;;  %v6713_v37 = vld [vmem:[%s7207_s13 + $0x368] sm:$0xff] }
 0x73a   :  { %v6728_v35 = vld [vmem:[%s7207_s13 + $0x3e0] sm:$0xff] }
 0x73b   :  { %2272 = vmatpush.bf16.msrb.mxu0 %v6686_v39  ;;  %2285 = vmatpush.bf16.msra.mxu1 %v6694_v40 }
 0x73c   :  { %2197 = vmatmul.bf16.vlgmr.msra.gmra.mxu2 %v1354_v41  ;;  %2210 = vmatmul.bf16.vlgmr.msra.gmra.mxu3 %v1355_v42  ;;  %v1189_v48 = vpop.f32.mrf.mxu2  ;;  %v1202_v49 = vpop.f32.mrf.mxu3  ;;  %v6719_v41 = vld [vmem:[%s7207_s13 + $0x398] sm:$0xff] }
 0x73d   :  { %2245 = vmatpush.bf16.msrb.mxu2 %v6671_v43  ;;  %2258 = vmatpush.bf16.msrb.mxu3 %v6679_v44  ;;  %v6727_v42 = vld [vmem:[%s7207_s13 + $0x3d8] sm:$0xff]  ;;  %v6704_v43 = vld [vmem:[%s7207_s13 + $0x320] sm:$0xff]  ;;  %v6718_v48 = vld [vmem:[%s7207_s13 + $0x390] sm:$0xff] }
 0x73e   :  { %v6712_v44 = vld [vmem:[%s7207_s13 + $0x360] sm:$0xff]  ;;  %v6726_v49 = vld [vmem:[%s7207_s13 + $0x3d0] sm:$0xff] }
 0x73f   :  { %2273 = vmatpush.bf16.msrb.mxu0 %v6685_v46  ;;  %2286 = vmatpush.bf16.msra.mxu1 %v6693_v47  ;;  %v1265_v53 = vpop.f32.mrf.mxu0  ;;  %v1278_v54 = vpop.f32.mrf.mxu1 }
 0x740   :  { %v1266_v57 = vadd.f32 %v1265_v53, %v941_v50  ;;  %v1279_v58 = vadd.f32 %v1278_v54, %v942_v20  ;;  %v945_v50 = vperm.slane %v7624_v45, 6  ;;  %v946_v20 = vperm.slane %v7624_v45, 7 }
 0x741   :  { %2246 = vmatpush.bf16.msrb.mxu2 %v6670_v51  ;;  %2259 = vmatpush.bf16.msrb.mxu3 %v6678_v52  ;;  %v6703_v51 = vld [vmem:[%s7207_s13 + $0x318] sm:$0xff] }
 0x742   :  { %v1344_v2 = vmax.f32 %v1266_v57, 0.0  ;;  %v1345_v3 = vmax.f32 %v1279_v58, 0.0  ;;  %v6711_v52 = vld [vmem:[%s7207_s13 + $0x358] sm:$0xff] }
 0x743   :  { %2274 = vmatpush.bf16.msrb.mxu0 %v6684_v55  ;;  %2287 = vmatpush.bf16.msra.mxu1 %v6692_v56  ;;  %v6717_v55 = vld [vmem:[%s7207_s13 + $0x388] sm:$0xff] }
 0x744   :  { %v1360_v4 = vpack.c.bf16 %v1344_v2, %v1344_v2  ;;  %v1361_v5 = vpack.c.bf16 %v1345_v3, %v1345_v3  ;;  %v1239_v6 = vpop.f32.mrf.mxu2  ;;  %v1252_v7 = vpop.f32.mrf.mxu3  ;;  %v6725_v56 = vld [vmem:[%s7207_s13 + $0x3c8] sm:$0xff]  ;;  %v6716_v2 = vld [vmem:[%s7207_s13 + $0x380] sm:$0xff] }
 0x745   :  { %2247 = vmatpush.bf16.msrb.mxu2 %v6669_v62  ;;  %2260 = vmatpush.bf16.msrb.mxu3 %v6677_v63  ;;  %v1240_v10 = vadd.f32 %v1239_v6, %v939_v0  ;;  %v1253_v11 = vadd.f32 %v1252_v7, %v940_v1  ;;  %v943_v62 = vperm.slane %v7624_v45, 4  ;;  %v944_v63 = vperm.slane %v7624_v45, 5  ;;  %v6724_v3 = vld [vmem:[%s7207_s13 + $0x3c0] sm:$0xff]  ;;  %v6701_v6 = vld [vmem:[%s7207_s13 + $0x308] sm:$0xff] }
 0x746   :  { %2275 = vmatmul.bf16.vlgmr.msrb.gmra.mxu0 %v1360_v4  ;;  %2288 = vmatmul.bf16.vlgmr.msra.gmra.mxu1 %v1361_v5  ;;  %v6709_v7 = vld [vmem:[%s7207_s13 + $0x348] sm:$0xff] }
 0x747   :  { %2319 = vmatpush.bf16.msra.mxu0 %v6723_v60  ;;  %2332 = vmatpush.bf16.msrb.mxu1 %v6731_v61  ;;  %v1342_v16 = vmax.f32 %v1240_v10, 0.0  ;;  %v1343_v17 = vmax.f32 %v1253_v11, 0.0  ;;  %v1267_v24 = vpop.f32.mrf.mxu0  ;;  %v1280_v19 = vpop.f32.mrf.mxu1  ;;  %v6702_v60 = vld [vmem:[%s7207_s13 + $0x310] sm:$0xff]  ;;  %v6700_v11 = vld [vmem:[%s7207_s13 + $0x300] sm:$0xff] }
 0x748   :  { %v6710_v61 = vld [vmem:[%s7207_s13 + $0x350] sm:$0xff]  ;;  %v2383_v19 = vld [vmem:[%s7147_s29 + $0x8] sm:$0xff] }
 0x749   :  { %v1358_v23 = vpack.c.bf16 %v1342_v16, %v1342_v16  ;;  %v1359_v25 = vpack.c.bf16 %v1343_v17, %v1343_v17  ;;  %2248 = vmatpush.bf16.msrb.mxu2 %v6668_v12  ;;  %2261 = vmatpush.bf16.msrb.mxu3 %v6676_v13  ;;  %v6708_v12 = vld [vmem:[%s7207_s13 + $0x340] sm:$0xff]  ;;  %v2384_v24 = vld [vmem:[%s7147_s29 + $0x10] sm:$0xff]  ;;  %s8212_s13 = sld [smem:[#allocation10_spill]] }
 0x74b   :  { %2320 = vmatpush.bf16.msra.mxu0 %v6722_v8  ;;  %2333 = vmatpush.bf16.msrb.mxu1 %v6730_v9 }
 0x74c   :  { %v1241_v33 = vpop.f32.mrf.mxu2  ;;  %v1254_v32 = vpop.f32.mrf.mxu3  ;;  %2249 = vmatmul.bf16.vlgmr.msrb.gmra.mxu2 %v1358_v23  ;;  %2262 = vmatmul.bf16.vlgmr.msrb.gmra.mxu3 %v1359_v25  ;;  %v2377_v25 = vld [vmem:[%s8211_s25 + $0x8] sm:$0xff] }
 0x74d   :  { %2293 = vmatpush.bf16.msra.mxu2 %v6707_v14  ;;  %2306 = vmatpush.bf16.msra.mxu3 %v6715_v15  ;;  %v2385_v15 = vld [vmem:[%s7147_s29 + $0x18] sm:$0xff] }
 0x74f   :  { %2321 = vmatpush.bf16.msra.mxu0 %v6721_v21  ;;  %2334 = vmatpush.bf16.msrb.mxu1 %v6729_v22  ;;  %v1317_v39 = vpop.f32.mrf.mxu0  ;;  %v1330_v40 = vpop.f32.mrf.mxu1  ;;  %v2382_v21 = vld [vmem:[%s7147_s29] sm:$0xff]  ;;  %s8213_s29 = sld [smem:[#allocation13_spill]] }
 0x750   :  { %v1318_v57 = vadd.f32 %v1317_v39, %v945_v50  ;;  %v1331_v58 = vadd.f32 %v1330_v40, %v946_v20  ;;  %v2376_v22 = vld [vmem:[%s8211_s25] sm:$0xff] }
 0x751   :  { %2294 = vmatpush.bf16.msra.mxu2 %v6706_v26  ;;  %2307 = vmatpush.bf16.msra.mxu3 %v6714_v31  ;;  %v2379_v23 = vmax.f32 %v2376_v22, 0.0  ;;  %v2380_v26 = vmax.f32 %v2377_v25, 0.0  ;;  %v2378_v31 = vld [vmem:[%s8211_s25 + $0x10] sm:$0x3]  ;;  %v2425_v22 = vld [vmem:[%s8215_s19] sm:$0xff] }
 0x752   :  { %v1348_v4 = vmax.f32 %v1318_v57, 0.0  ;;  %v1349_v5 = vmax.f32 %v1331_v58, 0.0 }
 0x753   :  { %2322 = vmatpush.bf16.msra.mxu0 %v6720_v34  ;;  %2335 = vmatpush.bf16.msrb.mxu1 %v6728_v35  ;;  %v6979_v35 = vld [vmem:[%s8212_s13] ss:$0 sm:$0xff] }
 0x754   :  { %v1291_v46 = vpop.f32.mrf.mxu2  ;;  %v1304_v47 = vpop.f32.mrf.mxu3  ;;  %v1364_v45 = vpack.c.bf16 %v1348_v4, %v1348_v4  ;;  %v1365_v10 = vpack.c.bf16 %v1349_v5, %v1349_v5 }
 0x755   :  { %2295 = vmatpush.bf16.msra.mxu2 %v6705_v36  ;;  %2308 = vmatpush.bf16.msra.mxu3 %v6713_v37  ;;  %v1292_v8 = vadd.f32 %v1291_v46, %v943_v62  ;;  %v1305_v9 = vadd.f32 %v1304_v47, %v944_v63  ;;  %v2433_v5 = vld [vmem:[%s8213_s29 + $0x10] sm:$0xff] }
 0x757   :  { %2323 = vmatpush.bf16.msra.mxu0 %v6719_v41  ;;  %2336 = vmatpush.bf16.msrb.mxu1 %v6727_v42  ;;  %v1319_v53 = vpop.f32.mrf.mxu0  ;;  %v1332_v54 = vpop.f32.mrf.mxu1  ;;  %v1346_v13 = vmax.f32 %v1292_v8, 0.0  ;;  %v1347_v14 = vmax.f32 %v1305_v9, 0.0 }
 0x759   :  { %2296 = vmatpush.bf16.msra.mxu2 %v6704_v43  ;;  %2309 = vmatpush.bf16.msra.mxu3 %v6712_v44  ;;  %v1362_v16 = vpack.c.bf16 %v1346_v13, %v1346_v13  ;;  %v1363_v17 = vpack.c.bf16 %v1347_v14, %v1347_v14 }
 0x75b   :  { %2324 = vmatpush.bf16.msra.mxu0 %v6718_v48  ;;  %2337 = vmatpush.bf16.msrb.mxu1 %v6726_v49 }
 0x75c   :  { %v1293_v0 = vpop.f32.mrf.mxu2  ;;  %v1306_v1 = vpop.f32.mrf.mxu3 }
 0x75d   :  { %2297 = vmatpush.bf16.msra.mxu2 %v6703_v51  ;;  %2310 = vmatpush.bf16.msra.mxu3 %v6711_v52  ;;  %v2434_v0 = vld [vmem:[%s8213_s29 + $0x18] sm:$0xff] }
 0x75f   :  { %2325 = vmatpush.bf16.msra.mxu0 %v6717_v55  ;;  %2338 = vmatpush.bf16.msrb.mxu1 %v6725_v56 }
 0x761   :  { %2298 = vmatpush.bf16.msra.mxu2 %v6702_v60  ;;  %2311 = vmatpush.bf16.msra.mxu3 %v6710_v61 }
 0x763   :  { %2326 = vmatpush.bf16.msra.mxu0 %v6716_v2  ;;  %2339 = vmatpush.bf16.msrb.mxu1 %v6724_v3 }
 0x765   :  { %2299 = vmatpush.bf16.msra.mxu2 %v6701_v6  ;;  %2312 = vmatpush.bf16.msra.mxu3 %v6709_v7  ;;  %v2432_v6 = vld [vmem:[%s8213_s29 + $0x8] sm:$0xff]  ;;  %v2431_v7 = vld [vmem:[%s8213_s29] sm:$0xff] }
 0x766   :  { %2327 = vmatmul.bf16.vlgmr.msra.gmra.mxu0 %v1364_v45  ;;  %2340 = vmatmul.bf16.vlgmr.msrb.gmra.mxu1 %v1365_v10 }
 0x767   :  { %5894 = vmatpush.xpose.msk.msra.mxu1 %vm663_vm11, %v7365_v27 }
 0x769   :  { %2300 = vmatpush.bf16.msra.mxu2 %v6700_v11  ;;  %2313 = vmatpush.bf16.msra.mxu3 %v6708_v12 }
 0x76b   :  { %5895 = vmatpush.xpose.msk.msra.mxu1 %vm663_vm11, %v7372_v28 }
 0x76c   :  { %2301 = vmatmul.bf16.vlgmr.msra.gmra.mxu2 %v1362_v16  ;;  %2314 = vmatmul.bf16.vlgmr.msra.gmra.mxu3 %v1363_v17 }
 0x76d   :  { %2411 = vmatpush.msrb.mxu2 %v2385_v15  ;;  %2760 = vmatpush.msrb.mxu3 %v2434_v0 }
 0x76f   :  { %2412 = vmatpush.msrb.mxu2 %v2384_v24  ;;  %5896 = vmatpush.xpose.msk.msra.mxu1 %vm663_vm11, %v7381_v29 }
 0x770   :  { %2761 = vmatpush.msrb.mxu3 %v2433_v5 }
 0x771   :  { %2413 = vmatpush.msrb.mxu2 %v2383_v19  ;;  %v6980_v19 = vld [vmem:[%s8214_s8] ss:$0 sm:$0xff] }
 0x772   :  { %2762 = vmatpush.msrb.mxu3 %v2432_v6 }
 0x773   :  { %2414 = vmatpush.msrb.mxu2 %v2382_v21  ;;  %5897 = vmatpush.xpose.msk.msra.mxu1 %vm663_vm11, %v7388_v30 }
 0x774   :  { %2763 = vmatpush.msrb.mxu3 %v2431_v7 }
 0x775   :  { %5903 = vmatpush.xpose.msk.msra.mxu2 %vm663_vm11, %v7365_v27  ;;  %v2381_v27 = vmax.f32 %v2378_v31, 0.0  ;;  %v2426_v31 = vld [vmem:[%s8215_s19 + $0x8] sm:$0xff] }
 0x779   :  { %5904 = vmatpush.xpose.msk.msra.mxu2 %vm663_vm11, %v7372_v28 }
 0x77c   :  { %5885 = vmatmul.msk.f32.vlgmr.msrb.gmra.mxu2 %vm542_vm1, %v2379_v23 }
 0x77d   :  { %5905 = vmatpush.xpose.msk.msra.mxu2 %vm663_vm11, %v7381_v29 }
 0x781   :  { %5906 = vmatpush.xpose.msk.msra.mxu2 %vm663_vm11, %v7388_v30 }
 0x784   :  { %5886 = vmatmul.msk.f32.gmra.mxu2 %vm542_vm1, %v2380_v26 }
 0x78c   :  { %5887 = vmatmul.msk.f32.gmra.mxu2 %vm542_vm1, %v2381_v27 }
 0x7a3   :  { %v2172_v33 = vpop.f32.mrf.mxu0  ;;  %v2185_v32 = vpop.f32.mrf.mxu1 }
 0x7ab   :  { %v2174_v28 = vpop.f32.mrf.mxu0  ;;  %v2187_v34 = vpop.f32.mrf.mxu1 }
 0x7ac   :  { %v2427_v34 = vld [vmem:[%s8215_s19 + $0x10] sm:$0x3] }
 0x7af   :  { %v2146_v36 = vpop.f32.mrf.mxu2  ;;  %v2159_v29 = vpop.f32.mrf.mxu3 }
 0x7b0   :  { %v2147_v37 = vadd.f32 %v6979_v35, %v2146_v36 }
 0x7b2   :  { %v2160_v41 = vadd.f32 %v2159_v29, %v2147_v37  ;;  %v6981_v29 = vld [vmem:[%s8216_s24] ss:$0 sm:$0xff] }
 0x7b3   :  { %v2224_v39 = vpop.f32.mrf.mxu0  ;;  %v2237_v40 = vpop.f32.mrf.mxu1 }
 0x7b4   :  { %v2173_v43 = vadd.f32 %v2172_v33, %v2160_v41 }
 0x7b6   :  { %v2186_v47 = vadd.f32 %v2185_v32, %v2173_v43 }
 0x7b7   :  { %v2148_v42 = vpop.f32.mrf.mxu2  ;;  %v2161_v30 = vpop.f32.mrf.mxu3 }
 0x7bb   :  { %v2226_v44 = vpop.f32.mrf.mxu0  ;;  %v2239_v46 = vpop.f32.mrf.mxu1 }
 0x7bf   :  { %v2198_v48 = vpop.f32.mrf.mxu2  ;;  %v2211_v49 = vpop.f32.mrf.mxu3 }
 0x7c0   :  { %v2199_v50 = vadd.f32 %v2198_v48, %v2186_v47 }
 0x7c2   :  { %v2212_v20 = vadd.f32 %v2211_v49, %v2199_v50 }
 0x7c3   :  { %v2276_v51 = vpop.f32.mrf.mxu0  ;;  %v2289_v52 = vpop.f32.mrf.mxu1 }
 0x7c4   :  { %v2225_v53 = vadd.f32 %v2224_v39, %v2212_v20 }
 0x7c6   :  { %v2238_v54 = vadd.f32 %v2237_v40, %v2225_v53 }
 0x7c7   :  { %v2200_v55 = vpop.f32.mrf.mxu2  ;;  %v2213_v56 = vpop.f32.mrf.mxu3 }
 0x7cb   :  { %v2278_v57 = vpop.f32.mrf.mxu0  ;;  %v2291_v58 = vpop.f32.mrf.mxu1 }
 0x7cf   :  { %v2250_v60 = vpop.f32.mrf.mxu2  ;;  %v2263_v61 = vpop.f32.mrf.mxu3 }
 0x7d0   :  { %v2251_v62 = vadd.f32 %v2250_v60, %v2238_v54 }
 0x7d2   :  { %v2264_v63 = vadd.f32 %v2263_v61, %v2251_v62 }
 0x7d4   :  { %v2277_v1 = vadd.f32 %v2276_v51, %v2264_v63 }
 0x7d6   :  { %v2290_v2 = vadd.f32 %v2289_v52, %v2277_v1 }
 0x7d7   :  { %v2252_v3 = vpop.f32.mrf.mxu2  ;;  %v2265_v4 = vpop.f32.mrf.mxu3 }
 0x7e3   :  { %v2328_v8 = vpop.f32.mrf.mxu0  ;;  %v2341_v9 = vpop.f32.mrf.mxu1 }
 0x7eb   :  { %v2330_v45 = vpop.f32.mrf.mxu0  ;;  %v2343_v10 = vpop.f32.mrf.mxu1 }
 0x7ef   :  { %v2302_v11 = vpop.f32.mrf.mxu2  ;;  %v2315_v12 = vpop.f32.mrf.mxu3 }
 0x7f0   :  { %v2303_v13 = vadd.f32 %v2302_v11, %v2290_v2 }
 0x7f2   :  { %v2316_v14 = vadd.f32 %v2315_v12, %v2303_v13 }
 0x7f4   :  { %v2329_v15 = vadd.f32 %v2328_v8, %v2316_v14 }
 0x7f6   :  { %v7707_v16 = vadd.f32 %v2341_v9, %v2329_v15 }
 0x7f7   :  { %v2304_v17 = vpop.f32.mrf.mxu2  ;;  %v2317_v24 = vpop.f32.mrf.mxu3 }
 0x7ff   :  { %v2416_v21 = vpop.f32.mrf.mxu2 }
 0x800   :  { %v2417_v23 = vadd.f32 %v6980_v19, %v2416_v21 }
 0x802   :  { %v2428_v25 = vadd.f32 %v2425_v22, %v2417_v23 }
 0x804   :  { %5888 = vmatmul.msk.f32.vlgmr.msrb.gmra.mxu3 %vm542_vm1, %v2428_v25 }
 0x807   :  { %v2419_v26 = vpop.f32.mrf.mxu2 }
 0x808   :  { %v2420_v27 = vadd.f32 %v6980_v19, %v2419_v26 }
 0x80a   :  { %v2429_v33 = vadd.f32 %v2426_v31, %v2420_v27  ;;  %v2439_v31 = vld [vmem:[%s8217_s30 + $0x18] sm:$0xff]  ;;  %v2438_v27 = vld [vmem:[%s8217_s30 + $0x10] sm:$0xff] }
 0x80c   :  { %5889 = vmatmul.msk.f32.gmra.mxu3 %vm542_vm1, %v2429_v33  ;;  %v7715_v32 = vsel %vm860_vm2, %v2428_v25, %v2429_v33 }
 0x80f   :  { %v2422_v28 = vpop.f32.mrf.mxu2 }
 0x810   :  { %v2423_v35 = vadd.f32 %v6980_v19, %v2422_v28  ;;  %v2437_v28 = vld [vmem:[%s8217_s30 + $0x8] sm:$0xff] }
 0x812   :  { %v2430_v36 = vadd.f32 %v2427_v34, %v2423_v35  ;;  %v2436_v35 = vld [vmem:[%s8217_s30] sm:$0xff] }
 0x814   :  { %5890 = vmatmul.msk.f32.gmra.mxu3 %vm542_vm1, %v2430_v36 }
 0x887   :  { %v2765_v37 = vpop.f32.mrf.mxu3 }
 0x888   :  { %v2766_v39 = vadd.f32 %v6981_v29, %v2765_v37 }
 0x88a   :  { %v2774_v40 = vmul.f32 0.5, %v2766_v39 }
 0x88c   :  { %v2775_v41 = vperm.slane %v2774_v40, 0 }
 0x88e   :  { %2777 = vrot.lane.b32.xlu2 %v2775_v41, %s7099_s0 }
 0x88f   :  { %v2768_v42 = vpop.f32.mrf.mxu3 }
 0x890   :  { %v2769_v30 = vadd.f32 %v6981_v29, %v2768_v42 }
 0x892   :  { %v2903_v43 = vmul.f32 0.5, %v2769_v30  ;;  %v3017_v2 = vrot.slane %v2769_v30, 1 }
 0x894   :  { %v2904_v44 = vperm.slane %v2903_v43, 1 }
 0x896   :  { %2906 = vrot.lane.b32.xlu2 %v2904_v44, %s7099_s0 }
 0x897   :  { %v2771_v48 = vpop.f32.mrf.mxu3 }
 0x898   :  { %v2772_v20 = vadd.f32 %v6981_v29, %v2771_v48 }
 0x89a   :  { %v3018_v1 = vrot.slane %v2772_v20, 1 }
 0x89c   :  { %v3019_v3 = vsel %vm735_vm3, %v3017_v2, %v3018_v1 }
 0x8e8   :  { %v2778_v46 = vpop.permute.xlu2 %2777 }
 0x8e9   :  { %v2781_v47 = vmul.f32 %v2778_v46, %v2769_v30  ;;  %v2780_v49 = vmul.f32 %v2778_v46, %v2766_v39 }
 0x8eb   :  { %2786 = vrot.lane.b32.xlu2 %v2781_v47, %s7100_s5 }
 0x8f0   :  { %v2907_v50 = vpop.permute.xlu2 %2906 }
 0x8f1   :  { %v2910_v51 = vmul.f32 %v2907_v50, %v2772_v20  ;;  %v2909_v53 = vmul.f32 %v2907_v50, %v2769_v30 }
 0x8f3   :  { %2784 = vrot.lane.b32.xlu2 %v2780_v49, %s7100_s5  ;;  %v2914_v52 = vrot.slane %v2910_v51, 1  ;;  %v2913_v54 = vrot.slane %v2909_v53, 1 }
 0x8f5   :  { %v2915_v55 = vsel %vm735_vm3, %v2913_v54, %v2914_v52 }
 0x8fb   :  { %2918 = vrot.lane.b32.xlu2 %v2914_v52, %s7100_s5 }
 0x903   :  { %2916 = vrot.lane.b32.xlu2 %v2915_v55, %s7100_s5 }
 0x945   :  { %v2787_v56 = vpop.permute.xlu2 %2786 }
 0x946   :  { %5891 = vmatpush.xpose.msk.msrb.mxu0 %vm542_vm1, %v2787_v56 }
 0x94d   :  { %v2785_v57 = vpop.permute.xlu2 %2784 }
 0x94e   :  { %5892 = vmatpush.xpose.msk.msrb.mxu0 %vm542_vm1, %v2785_v57 }
 0x951   :  { %5893 = vmatmul.msk.f32.vlgmr.msrb.gmra.mxu0 %vm542_vm1, %v7341_v59 }
 0x955   :  { %v2919_v58 = vpop.permute.xlu2 %2918 }
 0x956   :  { %5900 = vmatpush.xpose.msk.msra.mxu0 %vm542_vm1, %v2919_v58 }
 0x95d   :  { %v2917_v60 = vpop.permute.xlu2 %2916 }
 0x95e   :  { %5901 = vmatpush.xpose.msk.msra.mxu0 %vm542_vm1, %v2917_v60 }
 0x961   :  { %5902 = vmatmul.msk.f32.vlgmr.msra.gmra.mxu0 %vm542_vm1, %v7341_v59 }
 0x962   :  { %3057 = vmatpush.msrb.mxu0 %v2439_v31  ;;  %v5912_v31 = vld [vmem:[%s8220_s20] sm:$0xf] }
 0x964   :  { %3058 = vmatpush.msrb.mxu0 %v2438_v27  ;;  %v6740_v27 = vld [vmem:[%s8220_s20 + $0x3c] sm:$0xf0] }
 0x966   :  { %3059 = vmatpush.msrb.mxu0 %v2437_v28  ;;  %v5913_v28 = vor.u32 %v6740_v27, %v5912_v31  ;;  %v5944_v27 = vld [vmem:[%s8220_s20 + $0x20] sm:$0xf] }
 0x968   :  { %3060 = vmatpush.msrb.mxu0 %v2436_v35  ;;  %v5920_v35 = vld [vmem:[%s8220_s20 + $0x8] sm:$0xf] }
 0x9ce   :  { %v2809_v61 = vpop.f32.mrf.mxu0 }
 0x9cf   :  { %v2812_v62 = vsel %vm619_vm7, %v2809_v61, -inf }
 0x9d0   :  { %2813 = vmax.xlane.f32.xlu0 %v2812_v62 }
 0x9de   :  { %v2941_v63 = vpop.f32.mrf.mxu0 }
 0x9df   :  { %v2944_v0 = vsel %vm619_vm7, %v2941_v63, -inf }
 0x9e0   :  { %2945 = vmax.xlane.f32.xlu2 %v2944_v0 }
 0x9e4   :  { %2886 = vrot.lane.b32.xlu0 %v2766_v39, %s7102_s21 }
 0x9ec   :  { %2888 = vrot.lane.b32.xlu0 %v2769_v30, %s7102_s21 }
 0x9f4   :  { %3020 = vrot.lane.b32.xlu0 %v3019_v3, %s7102_s21 }
 0xa43   :  { %v2814_v4 = vpop.xlane.xlu0 %2813 }
 0xa44   :  { %v2815_v59 = vsub.f32 %v2809_v61, %v2814_v4 }
 0xa46   :  { %v2816_v5 = vmul.f32 1.442695, %v2815_v59 }
 0xa48   :  { %7002 = vpow2.f32 %v2816_v5 }
 0xa4e   :  { %v7003_v6 = vpop.eup %7002 }
 0xa4f   :  { %v2818_v7 = vsel %vm619_vm7, %v7003_v6, 0.0 }
 0xa50   :  { %2819 = vadd.xlane.f32.xlu1 %v2818_v7 }
 0xa53   :  { %v2946_v8 = vpop.xlane.xlu2 %2945 }
 0xa54   :  { %v2947_v9 = vsub.f32 %v2941_v63, %v2946_v8  ;;  %v6982_v63 = vld [vmem:[%s8218_s6] ss:$0 sm:$0xff] }
 0xa56   :  { %v2948_v45 = vmul.f32 1.442695, %v2947_v9  ;;  %v2887_v26 = vpop.permute.xlu0 %2886 }
 0xa58   :  { %7004 = vpow2.f32 %v2948_v45  ;;  %v4546_v45 = vld [vmem:[%s8219_s12 + $0x8] sm:$0xff] }
 0xa5e   :  { %v7005_v10 = vpop.eup %7004  ;;  %v2889_v34 = vpop.permute.xlu0 %2888 }
 0xa5f   :  { %v2950_v11 = vsel %vm619_vm7, %v7005_v10, 0.0 }
 0xa60   :  { %2951 = vadd.xlane.f32.xlu1 %v2950_v11 }
 0xa66   :  { %v3021_v30 = vpop.permute.xlu0 %3020 }
 0xac3   :  { %v2820_v12 = vpop.xlane.xlu1 %2819 }
 0xac4   :  { %7006 = vrcp.f32 %v2820_v12  ;;  %v5976_v12 = vld [vmem:[%s8220_s20 + $0x80] sm:$0xf] }
 0xaca   :  { %v7007_v13 = vpop.eup %7006 }
 0xacb   :  { %v2822_v14 = vmul.f32 %v7007_v13, %v7003_v6  ;;  %v6756_v13 = vld [vmem:[%s8220_s20 + $0xbc] sm:$0xf0] }
 0xacd   :  { %2823 = vxpose.xlu2.b32.start.end [1/1] (short) (narrow) %v2822_v14, 16  ;;  %v6748_v14 = vld [vmem:[%s8220_s20 + $0x84] sm:$0xf] }
 0xad3   :  { %v2952_v15 = vpop.xlane.xlu1 %2951 }
 0xad4   :  { %7008 = vrcp.f32 %v2952_v15  ;;  %v5977_v15 = vor.u32 %v6756_v13, %v5976_v12 }
 0xad6   :  { %3300 = vmatpush.bf16.msra.mxu3 %v5977_v15  ;;  %v6760_v15 = vld [vmem:[%s8220_s20 + $0xdc] sm:$0xf0] }
 0xada   :  { %v7009_v17 = vpop.eup %7008  ;;  %3301 = vmatpush.bf16.msra.mxu3 %v5913_v28 }
 0xadb   :  { %v2954_v24 = vmul.f32 %v7009_v17, %v7005_v10  ;;  %v4552_v10 = vmul.f32 %v4546_v45, %v4546_v45  ;;  %v5978_v17 = vld [vmem:[%s8220_s20 + $0xc0] sm:$0xf0]  ;;  %v6983_v45 = vld [vmem:[%s8221_s27] ss:$0 sm:$0xff] }
 0xadd   :  { %2955 = vxpose.xlu1.b32.start.end [1/1] (short) (narrow) %v2954_v24, 16  ;;  %v4556_v11 = vsel %vm542_vm1, %v4552_v10, 0.0  ;;  %v5984_v24 = vld [vmem:[%s8220_s20 + $0x88] sm:$0xf] }
 0xb3e   :  { %3022 = vrot.lane.b32.xlu2 %v3018_v1, %s7102_s21 }
 0xb66   :  { %v2839_v19 = vpop.trf.xlu2 }
 0xb67   :  { %5898 = vmatmul.msk.f32.vlgmr.msra.gmra.mxu1 %vm663_vm11, %v2839_v19  ;;  %v6757_v19 = vld [vmem:[%s8220_s20 + $0xc4] sm:$0xf0] }
 0xb6e   :  { %v2840_v21 = vpop.trf.xlu2 }
 0xb6f   :  { %5899 = vmatmul.msk.f32.gmra.mxu1 %vm663_vm11, %v2840_v21  ;;  %v5981_v21 = vor.u32 %v6748_v14, %v5978_v17  ;;  %v6008_v14 = vld [vmem:[%s8220_s20 + $0xa0] sm:$0xf]  ;;  %v6752_v17 = vld [vmem:[%s8220_s20 + $0xa4] sm:$0xf] }
 0xb71   :  { %3313 = vmatpush.bf16.msra.mxu0 %v5981_v21 }
 0xb81   :  { %v2971_v22 = vpop.trf.xlu1 }
 0xb82   :  { %5907 = vmatmul.msk.f32.vlgmr.msra.gmra.mxu2 %vm663_vm11, %v2971_v22  ;;  %v5985_v22 = vor.u32 %v6757_v19, %v5984_v24  ;;  %v6010_v24 = vld [vmem:[%s8220_s20 + $0xe0] sm:$0xf0]  ;;  %v6016_v19 = vld [vmem:[%s8220_s20 + $0xa8] sm:$0xf] }
 0xb83   :  { %v6013_v31 = vor.u32 %v6752_v17, %v6010_v24  ;;  %v6769_v17 = vld [vmem:[%s8224_s16 + $0x28] sm:$0xff] }
 0xb84   :  { %3326 = vmatpush.bf16.msrb.mxu1 %v5985_v22  ;;  %v6761_v22 = vld [vmem:[%s8220_s20 + $0xe4] sm:$0xf0] }
 0xb85   :  { %v6017_v28 = vor.u32 %v6761_v22, %v6016_v19  ;;  %v6793_v24 = vld [vmem:[%s8224_s16 + $0xe8] sm:$0xff]  ;;  %v6776_v19 = vld [vmem:[%s8224_s16 + $0x60] sm:$0xff] }
 0xb86   :  { %v6784_v22 = vld [vmem:[%s8224_s16 + $0xa0] sm:$0xff] }
 0xb89   :  { %v2972_v23 = vpop.trf.xlu1 }
 0xb8a   :  { %5908 = vmatmul.msk.f32.gmra.mxu2 %vm663_vm11, %v2972_v23  ;;  %v6749_v23 = vld [vmem:[%s8220_s20 + $0x8c] sm:$0xf] }
 0xb98   :  { %v3023_v44 = vpop.permute.xlu2 %3022 }
 0xbe4   :  { %v2878_v25 = vpop.f32.mrf.mxu1 }
 0xbe5   :  { %v2892_v29 = vmul.f32 %v2887_v26, %v2878_v25  ;;  %v5986_v25 = vld [vmem:[%s8220_s20 + $0xc8] sm:$0xf0] }
 0xbe6   :  { %v5989_v26 = vor.u32 %v6749_v23, %v5986_v25  ;;  %v6753_v23 = vld [vmem:[%s8220_s20 + $0xac] sm:$0xf] }
 0xbe7   :  { %v2894_v39 = vsel %vm542_vm1, %v2892_v29, 0.0  ;;  %v6018_v25 = vld [vmem:[%s8220_s20 + $0xe8] sm:$0xf0] }
 0xbe8   :  { %3339 = vmatpush.bf16.msrb.mxu2 %v5989_v26  ;;  %v6009_v26 = vor.u32 %v6760_v15, %v6008_v14  ;;  %v6777_v14 = vld [vmem:[%s8224_s16 + $0x68] sm:$0xff] }
 0xbe9   :  { %v6785_v15 = vld [vmem:[%s8224_s16 + $0xa8] sm:$0xff] }
 0xbec   :  { %v2881_v33 = vpop.f32.mrf.mxu1 }
 0xbed   :  { %v2893_v36 = vmul.f32 %v2889_v34, %v2881_v33  ;;  %v6732_v33 = vld [vmem:[%s8220_s20 + $0x4] sm:$0xf] }
 0xbee   :  { %v5914_v34 = vld [vmem:[%s8220_s20 + $0x40] sm:$0xf0] }
 0xbef   :  { %v2895_v37 = vsel %vm716_vm9, %v2893_v36, 0.0  ;;  %v6741_v36 = vld [vmem:[%s8220_s20 + $0x44] sm:$0xf0]  ;;  %v5917_v29 = vor.u32 %v6732_v33, %v5914_v34  ;;  %v6744_v33 = vld [vmem:[%s8220_s20 + $0x5c] sm:$0xf0]  ;;  %v6021_v34 = vor.u32 %v6753_v23, %v6018_v25 }
 0xbf0   :  { %v2896_v40 = vadd.f32 %v2895_v37, %v2894_v39  ;;  %v5921_v37 = vor.u32 %v6741_v36, %v5920_v35  ;;  %v6733_v39 = vld [vmem:[%s8220_s20 + $0xc] sm:$0xf]  ;;  %v6736_v35 = vld [vmem:[%s8220_s20 + $0x24] sm:$0xf] }
 0xbf1   :  { %3314 = vmatpush.bf16.msra.mxu0 %v5917_v29  ;;  %v5946_v36 = vld [vmem:[%s8220_s20 + $0x60] sm:$0xf0]  ;;  %v5952_v29 = vld [vmem:[%s8220_s20 + $0x28] sm:$0xf] }
 0xbf2   :  { %v2897_v42 = vrot.slane %v2896_v40, 4  ;;  %3327 = vmatpush.bf16.msrb.mxu1 %v5921_v37  ;;  %v6745_v37 = vld [vmem:[%s8220_s20 + $0x64] sm:$0xf0]  ;;  %v6768_v23 = vld [vmem:[%s8224_s16 + $0x20] sm:$0xff] }
 0xbf3   :  { %v6792_v25 = vld [vmem:[%s8224_s16 + $0xe0] sm:$0xff] }
 0xbf4   :  { %v2898_v46 = vadd.f32 %v2897_v42, %v2896_v40  ;;  %v5922_v40 = vld [vmem:[%s8220_s20 + $0x48] sm:$0xf0] }
 0xbf6   :  { %v2899_v20 = vrot.slane %v2898_v46, 2 }
 0xbf8   :  { %v2900_v53 = vadd.f32 %v2899_v20, %v2898_v46 }
 0xbfa   :  { %v2901_v56 = vrot.slane %v2900_v53, 1 }
 0xbfc   :  { %v2902_v60 = vadd.f32 %v2901_v56, %v2900_v53  ;;  %v6002_v53 = vld [vmem:[%s8220_s20 + $0xd8] sm:$0xf0] }
 0xc05   :  { %v3010_v41 = vpop.f32.mrf.mxu2 }
 0xc06   :  { %v3026_v43 = vmul.f32 %v3021_v30, %v3010_v41  ;;  %v5925_v41 = vor.u32 %v6733_v39, %v5922_v40  ;;  %v5992_v30 = vld [vmem:[%s8220_s20 + $0x90] sm:$0xf]  ;;  %v6737_v39 = vld [vmem:[%s8220_s20 + $0x2c] sm:$0xf] }
 0xc07   :  { %v5954_v40 = vld [vmem:[%s8220_s20 + $0x68] sm:$0xf0] }
 0xc08   :  { %v3028_v49 = vsel %vm542_vm1, %v3026_v43, 0.0  ;;  %3340 = vmatpush.bf16.msrb.mxu2 %v5925_v41  ;;  %v6758_v43 = vld [vmem:[%s8220_s20 + $0xcc] sm:$0xf0]  ;;  %v5945_v41 = vor.u32 %v6744_v33, %v5944_v27  ;;  %v6767_v27 = vld [vmem:[%s8224_s16 + $0x18] sm:$0xff] }
 0xc09   :  { %v6791_v33 = vld [vmem:[%s8224_s16 + $0xd8] sm:$0xff] }
 0xc0d   :  { %v3013_v47 = vpop.f32.mrf.mxu2 }
 0xc0e   :  { %v3027_v48 = vmul.f32 %v3023_v44, %v3013_v47  ;;  %v6750_v44 = vld [vmem:[%s8220_s20 + $0x94] sm:$0xf]  ;;  %v5993_v47 = vor.u32 %v6758_v43, %v5992_v30  ;;  %v5953_v30 = vor.u32 %v6745_v37, %v5952_v29  ;;  %v5957_v43 = vor.u32 %v6737_v39, %v5954_v40  ;;  %v6781_v37 = vld [vmem:[%s8224_s16 + $0x88] sm:$0xff] }
 0xc0f   :  { %v6765_v39 = vld [vmem:[%s8224_s16 + $0x8] sm:$0xff] }
 0xc10   :  { %v3029_v50 = vsel %vm716_vm9, %v3027_v48, 0.0  ;;  %v5994_v48 = vld [vmem:[%s8220_s20 + $0xd0] sm:$0xf0]  ;;  %3352 = vmatpush.bf16.msrb.mxu3 %v5993_v47  ;;  %v6789_v40 = vld [vmem:[%s8224_s16 + $0xc8] sm:$0xff] }
 0xc11   :  { %v3030_v51 = vadd.f32 %v3029_v50, %v3028_v49  ;;  %v6000_v49 = vld [vmem:[%s8220_s20 + $0x98] sm:$0xf]  ;;  %v5997_v20 = vor.u32 %v6750_v44, %v5994_v48  ;;  %v7838_v44 = vld [vmem:[%s8223_s15] sm:$0xff]  ;;  %v6024_v48 = vld [vmem:[%s8220_s20 + $0xb0] sm:$0xf] }
 0xc12   :  { %v6759_v50 = vld [vmem:[%s8220_s20 + $0xd4] sm:$0xf0] }
 0xc13   :  { %v3031_v52 = vrot.slane %v3030_v51, 4 }
 0xc15   :  { %v3032_v54 = vadd.f32 %v3031_v52, %v3030_v51  ;;  %v6001_v51 = vor.u32 %v6759_v50, %v6000_v49  ;;  %v6751_v52 = vld [vmem:[%s8220_s20 + $0x9c] sm:$0xf]  ;;  %v6762_v49 = vld [vmem:[%s8220_s20 + $0xec] sm:$0xf0]  ;;  %v6754_v50 = vld [vmem:[%s8220_s20 + $0xb4] sm:$0xf] }
 0xc16   :  { %v6005_v56 = vor.u32 %v6751_v52, %v6002_v53  ;;  %v6763_v52 = vld [vmem:[%s8220_s20 + $0xf4] sm:$0xf0]  ;;  %v6755_v53 = vld [vmem:[%s8220_s20 + $0xbc] sm:$0xf] }
 0xc17   :  { %v3033_v55 = vrot.slane %v3032_v54, 2  ;;  %3378 = vmatpush.bf16.msra.mxu1 %v6001_v51  ;;  %v6032_v51 = vld [vmem:[%s8220_s20 + $0xb8] sm:$0xf] }
 0xc18   :  { %3391 = vmatpush.bf16.msra.mxu2 %v6005_v56 }
 0xc19   :  { %v3034_v57 = vadd.f32 %v3033_v55, %v3032_v54  ;;  %v5928_v54 = vld [vmem:[%s8220_s20 + $0x10] sm:$0xf] }
 0xc1b   :  { %v3035_v58 = vrot.slane %v3034_v57, 1 }
 0xc1d   :  { %v3036_v61 = vadd.f32 %v3035_v58, %v3034_v57  ;;  %v6742_v57 = vld [vmem:[%s8220_s20 + $0x4c] sm:$0xf0]  ;;  %v6734_v58 = vld [vmem:[%s8220_s20 + $0x14] sm:$0xf] }
 0xc1f   :  { %v3037_v62 = vsel %vm860_vm2, %v2902_v60, %v3036_v61  ;;  %v5929_v60 = vor.u32 %v6742_v57, %v5928_v54  ;;  %v5930_v61 = vld [vmem:[%s8220_s20 + $0x50] sm:$0xf0]  ;;  %v6034_v54 = vld [vmem:[%s8220_s20 + $0xf8] sm:$0xf0]  ;;  %v5960_v57 = vld [vmem:[%s8220_s20 + $0x30] sm:$0xf] }
 0xc20   :  { %5909 = vmatmul.msk.f32.vlgmr.msrb.gmra.mxu0 %vm542_vm1, %v3037_v62  ;;  %v5936_v62 = vld [vmem:[%s8220_s20 + $0x18] sm:$0xf] }
 0xc21   :  { %3365 = vmatpush.bf16.msrb.mxu0 %v5997_v20  ;;  %3353 = vmatpush.bf16.msrb.mxu3 %v5929_v60  ;;  %v6026_v20 = vld [vmem:[%s8220_s20 + $0xf0] sm:$0xf0]  ;;  %v6033_v60 = vor.u32 %v6763_v52, %v6032_v51 }
 0xc22   :  { %v6029_v56 = vor.u32 %v6754_v50, %v6026_v20  ;;  %v6827_v50 = vld [vmem:[%s8224_s16 + $0x1f8] sm:$0xff]  ;;  %v6810_v20 = vld [vmem:[%s8224_s16 + $0x170] sm:$0xff] }
 0xc23   :  { %v6818_v51 = vld [vmem:[%s8224_s16 + $0x1b0] sm:$0xff] }
 0xc24   :  { %v6802_v52 = vld [vmem:[%s8224_s16 + $0x130] sm:$0xff] }
 0xc9d   :  { %v3062_v0 = vpop.f32.mrf.mxu0 }
 0xc9e   :  { %v3063_v1 = vadd.f32 %v6982_v63, %v3062_v0  ;;  %v6743_v63 = vld [vmem:[%s8220_s20 + $0x54] sm:$0xf0]  ;;  %v5933_v0 = vor.u32 %v6734_v58, %v5930_v61  ;;  %v6746_v58 = vld [vmem:[%s8220_s20 + $0x6c] sm:$0xf0]  ;;  %v6037_v61 = vor.u32 %v6755_v53, %v6034_v54  ;;  %v6809_v54 = vld [vmem:[%s8224_s16 + $0x168] sm:$0xff] }
 0xc9f   :  { %v6826_v53 = vld [vmem:[%s8224_s16 + $0x1f0] sm:$0xff] }
 0xca0   :  { %v3065_v2 = vadd.f32 %v3063_v1, %v7715_v32  ;;  %v4545_v32 = vld [vmem:[%s8219_s12] sm:$0xff]  ;;  %v5937_v1 = vor.u32 %v6743_v63, %v5936_v62  ;;  %3366 = vmatpush.bf16.msrb.mxu0 %v5933_v0  ;;  %v6738_v62 = vld [vmem:[%s8220_s20 + $0x34] sm:$0xf]  ;;  %v5968_v0 = vld [vmem:[%s8220_s20 + $0x38] sm:$0xf] }
 0xca1   :  { %v4551_v8 = vmul.f32 %v4545_v32, %v4545_v32  ;;  %v5962_v63 = vld [vmem:[%s8220_s20 + $0x70] sm:$0xf0] }
 0xca2   :  { %v3066_v3 = vsel %vm890_vm10, %v3065_v2, 0.0  ;;  %3379 = vmatpush.bf16.msra.mxu1 %v5937_v1  ;;  %v6747_v1 = vld [vmem:[%s8220_s20 + $0x74] sm:$0xf0] }
 0xca3   :  { %3067 = vadd.xlane.f32.xlu1 %v3066_v3  ;;  %v4553_v9 = vsel %vm542_vm1, %v4551_v8, 0.0  ;;  %v5938_v3 = vld [vmem:[%s8220_s20 + $0x58] sm:$0xf0] }
 0xd16   :  { %v3068_v4 = vpop.xlane.xlu1 %3067 }
 0xd17   :  { %v3069_v59 = vmul.f32 %v3068_v4, %v7412_v18 }
 0xd19   :  { %v7762_v5 = vsub.f32 %v3065_v2, %v3069_v59  ;;  %v6735_v2 = vld [vmem:[%s8220_s20 + $0x1c] sm:$0xf] }
 0xd1a   :  { %v5941_v4 = vor.u32 %v6735_v2, %v5938_v3  ;;  %v6739_v2 = vld [vmem:[%s8220_s20 + $0x3c] sm:$0xf] }
 0xd1b   :  { %v3071_v6 = vmul.f32 %v7762_v5, %v7762_v5  ;;  %v5970_v3 = vld [vmem:[%s8220_s20 + $0x78] sm:$0xf0] }
 0xd1c   :  { %3392 = vmatpush.bf16.msra.mxu2 %v5941_v4  ;;  %v5961_v4 = vor.u32 %v6746_v58, %v5960_v57  ;;  %v6825_v57 = vld [vmem:[%s8224_s16 + $0x1e8] sm:$0xff]  ;;  %v6808_v58 = vld [vmem:[%s8224_s16 + $0x160] sm:$0xff] }
 0xd1d   :  { %v3072_v7 = vsel %vm890_vm10, %v3071_v6, 0.0 }
 0xd1e   :  { %3073 = vadd.xlane.f32.xlu0 %v3072_v7 }
 0xd26   :  { %4554 = vadd.xlane.f32.xlu0 %v4553_v9 }
 0xd2e   :  { %4557 = vadd.xlane.f32.xlu0 %v4556_v11  ;;  %v6984_v11 = vld [vmem:[%s8222_s4] ss:$0 sm:$0xff] }
 0xd91   :  { %v3074_v42 = vpop.xlane.xlu0 %3073 }
 0xd92   :  { %v3075_v46 = vmul.f32 %v3074_v42, %v7412_v18  ;;  %v5949_v42 = vor.u32 %v6736_v35, %v5946_v36  ;;  %v6766_v35 = vld [vmem:[%s8224_s16 + $0x10] sm:$0xff] }
 0xd93   :  { %v6790_v36 = vld [vmem:[%s8224_s16 + $0xd0] sm:$0xff] }
 0xd94   :  { %v3076_v55 = vadd.f32 1e-05, %v3075_v46  ;;  %v4547_v46 = vmul.f32 %v7838_v44, %v7838_v44 }
 0xd96   :  { %7010 = vrsqrt.f32 %v3076_v55  ;;  %vm3083_vm7 = vweird.f32 %v3076_v55  ;;  %v4548_v47 = vsel %vm542_vm1, %v4547_v46, 0.0  ;;  %v6764_v46 = vld [vmem:[%s8224_s16] sm:$0xff] }
 0xd97   :  { %4549 = vadd.xlane.f32.xlu0 %v4548_v47  ;;  %v6788_v47 = vld [vmem:[%s8224_s16 + $0xc0] sm:$0xff] }
 0xd99   :  { %v7907_v29 = vpop.xlane.xlu0 %4554 }
 0xd9c   :  { %v7011_v59 = vpop.eup %7010 }
 0xd9d   :  { %v3078_v6 = vmul.f32 %v7011_v59, %v3076_v55  ;;  %vm3084_vm3 = vweird.f32 %v7011_v59  ;;  %v6025_v55 = vor.u32 %v6762_v49, %v6024_v48  ;;  %v6803_v48 = vld [vmem:[%s8224_s16 + $0x138] sm:$0xff] }
 0xd9e   :  { %vm3085_vm0 = vmor %vm3083_vm7, %vm3084_vm3 }
 0xd9f   :  { %v3079_v7 = vmul.f32 %v7011_v59, %v3078_v6  ;;  %v5969_v6 = vor.u32 %v6747_v1, %v5968_v0  ;;  %v6815_v0 = vld [vmem:[%s8224_s16 + $0x198] sm:$0xff]  ;;  %v6806_v1 = vld [vmem:[%s8224_s16 + $0x150] sm:$0xff] }
 0xda1   :  { %v3080_v32 = vmul.f32 0.5, %v3079_v7  ;;  %v5973_v7 = vor.u32 %v6739_v2, %v5970_v3  ;;  %v7921_v49 = vpop.xlane.xlu0 %4557  ;;  %v6814_v2 = vld [vmem:[%s8224_s16 + $0x190] sm:$0xff]  ;;  %v6799_v3 = vld [vmem:[%s8224_s16 + $0x118] sm:$0xff] }
 0xda3   :  { %v3081_v8 = vsub.f32 1.5, %v3080_v32  ;;  %v6779_v32 = vld [vmem:[%s8224_s16 + $0x78] sm:$0xff] }
 0xda5   :  { %v3082_v9 = vmul.f32 %v7011_v59, %v3081_v8  ;;  %v6787_v8 = vld [vmem:[%s8224_s16 + $0xb8] sm:$0xff] }
 0xda7   :  { %v3086_v10 = vsel %vm3085_vm0, %v7011_v59, %v3082_v9  ;;  %v5965_v59 = vor.u32 %v6738_v62, %v5962_v63  ;;  %v6771_v9 = vld [vmem:[%s8224_s16 + $0x38] sm:$0xff]  ;;  %v6824_v62 = vld [vmem:[%s8224_s16 + $0x1e0] sm:$0xff] }
 0xda8   :  { %v3087_v12 = vmul.f32 %v3086_v10, %v7762_v5  ;;  %v6778_v10 = vld [vmem:[%s8224_s16 + $0x70] sm:$0xff]  ;;  %v6807_v63 = vld [vmem:[%s8224_s16 + $0x158] sm:$0xff] }
 0xdaa   :  { %v3091_v13 = vmul.f32 %v6983_v45, %v3087_v12  ;;  %v6795_v45 = vld [vmem:[%s8224_s16 + $0xf8] sm:$0xff]  ;;  %v6770_v12 = vld [vmem:[%s8224_s16 + $0x30] sm:$0xff] }
 0xdac   :  { %v7812_v21 = vadd.f32 %v6984_v11, %v3091_v13  ;;  %v6786_v11 = vld [vmem:[%s8224_s16 + $0xb0] sm:$0xff] }
 0xdad   :  { %v6794_v13 = vld [vmem:[%s8224_s16 + $0xf0] sm:$0xff] }
 0xdae   :  { %v7819_v5 = vpack.c.bf16 %v7812_v21, %v7812_v21 }
 0xdb0   :  { %6038 = vmatmul.msk.bf16.vlgmr.msra.gmra.mxu3 %vm542_vm1, %v7819_v5  ;;  %6039 = vmatmul.msk.bf16.vlgmr.msra.gmra.mxu0 %vm542_vm1, %v7819_v5 }
 0xdb1   :  { %6040 = vmatmul.msk.bf16.vlgmr.msrb.gmra.mxu1 %vm542_vm1, %v7819_v5  ;;  %6041 = vmatmul.msk.bf16.vlgmr.msrb.gmra.mxu2 %vm542_vm1, %v7819_v5 }
 0xdb2   :  { %3404 = vmatpush.bf16.msra.mxu3 %v6009_v26  ;;  %3417 = vmatpush.bf16.msra.mxu0 %v6013_v31  ;;  %v6775_v26 = vld [vmem:[%s8224_s16 + $0x58] sm:$0xff] }
 0xdb3   :  { %3430 = vmatpush.bf16.msrb.mxu1 %v6017_v28  ;;  %3443 = vmatpush.bf16.msrb.mxu2 %v6021_v34  ;;  %v6783_v31 = vld [vmem:[%s8224_s16 + $0x98] sm:$0xff]  ;;  %v6774_v28 = vld [vmem:[%s8224_s16 + $0x50] sm:$0xff] }
 0xdb4   :  { %v6782_v34 = vld [vmem:[%s8224_s16 + $0x90] sm:$0xff] }
 0xdb6   :  { %3405 = vmatpush.bf16.msra.mxu3 %v5945_v41  ;;  %3418 = vmatpush.bf16.msra.mxu0 %v5949_v42  ;;  %v6772_v41 = vld [vmem:[%s8224_s16 + $0x40] sm:$0xff] }
 0xdb7   :  { %3431 = vmatpush.bf16.msrb.mxu1 %v5953_v30  ;;  %3444 = vmatpush.bf16.msrb.mxu2 %v5957_v43  ;;  %v6780_v42 = vld [vmem:[%s8224_s16 + $0x80] sm:$0xff]  ;;  %v6811_v30 = vld [vmem:[%s8224_s16 + $0x178] sm:$0xff] }
 0xdb8   :  { %v6819_v43 = vld [vmem:[%s8224_s16 + $0x1b8] sm:$0xff] }
 0xdc0   :  { %6042 = vmatmul.msk.bf16.vlgmr.msrb.gmra.mxu3 %vm542_vm1, %v7819_v5  ;;  %6043 = vmatmul.msk.bf16.vlgmr.msrb.gmra.mxu0 %vm542_vm1, %v7819_v5 }
 0xdc1   :  { %6044 = vmatmul.msk.bf16.vlgmr.msra.gmra.mxu1 %vm542_vm1, %v7819_v5  ;;  %6045 = vmatmul.msk.bf16.vlgmr.msra.gmra.mxu2 %vm542_vm1, %v7819_v5 }
 0xdc2   :  { %3456 = vmatpush.bf16.msrb.mxu3 %v6025_v55  ;;  %3469 = vmatpush.bf16.msrb.mxu0 %v6029_v56  ;;  %v6817_v55 = vld [vmem:[%s8224_s16 + $0x1a8] sm:$0xff] }
 0xdc3   :  { %3482 = vmatpush.bf16.msra.mxu1 %v6033_v60  ;;  %3495 = vmatpush.bf16.msra.mxu2 %v6037_v61  ;;  %v6801_v56 = vld [vmem:[%s8224_s16 + $0x128] sm:$0xff]  ;;  %v6816_v60 = vld [vmem:[%s8224_s16 + $0x1a0] sm:$0xff] }
 0xdc4   :  { %4588 = vxpose.xlu0.b32.start [1/2] (short) (narrow) %v7907_v29, 8  ;;  %v6800_v61 = vld [vmem:[%s8224_s16 + $0x120] sm:$0xff] }
 0xdc6   :  { %3457 = vmatpush.bf16.msrb.mxu3 %v5961_v4  ;;  %3470 = vmatpush.bf16.msrb.mxu0 %v5965_v59  ;;  %v6823_v4 = vld [vmem:[%s8224_s16 + $0x1d8] sm:$0xff]  ;;  %v6805_v59 = vld [vmem:[%s8224_s16 + $0x148] sm:$0xff] }
 0xdc7   :  { %3483 = vmatpush.bf16.msra.mxu1 %v5969_v6  ;;  %3496 = vmatpush.bf16.msra.mxu2 %v5973_v7  ;;  %v6813_v6 = vld [vmem:[%s8224_s16 + $0x188] sm:$0xff]  ;;  %v6798_v7 = vld [vmem:[%s8224_s16 + $0x110] sm:$0xff] }
 0xdcc   :  { %4589 = vxpose.xlu0.b32.end [2/2] (short) (narrow) %v7921_v49, 8 }
 0xdd0   :  { %6046 = vmatmul.msk.bf16.vlgmr.msra.gmra.mxu3 %vm542_vm1, %v7819_v5  ;;  %6047 = vmatmul.msk.bf16.vlgmr.msra.gmra.mxu0 %vm542_vm1, %v7819_v5 }
 0xdd1   :  { %6048 = vmatmul.msk.bf16.vlgmr.msrb.gmra.mxu1 %vm542_vm1, %v7819_v5  ;;  %6049 = vmatmul.msk.bf16.vlgmr.msrb.gmra.mxu2 %vm542_vm1, %v7819_v5 }
 0xdd2   :  { %4318 = vmatpush.bf16.msra.mxu0 %v6779_v32  ;;  %4331 = vmatpush.bf16.msrb.mxu1 %v6787_v8  ;;  %v6822_v32 = vld [vmem:[%s8224_s16 + $0x1d0] sm:$0xff]  ;;  %v6804_v8 = vld [vmem:[%s8224_s16 + $0x140] sm:$0xff] }
 0xdd3   :  { %4305 = vmatpush.bf16.msra.mxu3 %v6771_v9  ;;  %4344 = vmatpush.bf16.msrb.mxu2 %v6795_v45  ;;  %v6812_v9 = vld [vmem:[%s8224_s16 + $0x180] sm:$0xff]  ;;  %v6797_v45 = vld [vmem:[%s8224_s16 + $0x108] sm:$0xff] }
 0xdd6   :  { %4319 = vmatpush.bf16.msra.mxu0 %v6778_v10  ;;  %4332 = vmatpush.bf16.msrb.mxu1 %v6786_v11  ;;  %v6821_v10 = vld [vmem:[%s8224_s16 + $0x1c8] sm:$0xff]  ;;  %v6796_v11 = vld [vmem:[%s8224_s16 + $0x100] sm:$0xff] }
 0xdd7   :  { %4306 = vmatpush.bf16.msra.mxu3 %v6770_v12  ;;  %4345 = vmatpush.bf16.msrb.mxu2 %v6794_v13  ;;  %v6820_v12 = vld [vmem:[%s8224_s16 + $0x1c0] sm:$0xff] }
 0xdd8   :  { %v7954_v13 = vld [vmem:[%s8225_s18] sm:$0xff] }
 0xdda   :  { %4320 = vmatpush.bf16.msra.mxu0 %v6777_v14  ;;  %4333 = vmatpush.bf16.msrb.mxu1 %v6785_v15  ;;  %v3100_v14 = vperm.slane %v7954_v13, 1  ;;  %v3101_v15 = vperm.slane %v7954_v13, 2 }
 0xddb   :  { %4307 = vmatpush.bf16.msra.mxu3 %v6769_v17  ;;  %4346 = vmatpush.bf16.msrb.mxu2 %v6793_v24 }
 0xdde   :  { %4321 = vmatpush.bf16.msra.mxu0 %v6776_v19  ;;  %4334 = vmatpush.bf16.msrb.mxu1 %v6784_v22 }
 0xddf   :  { %4308 = vmatpush.bf16.msra.mxu3 %v6768_v23  ;;  %4347 = vmatpush.bf16.msrb.mxu2 %v6792_v25  ;;  %v3099_v25 = vperm.slane %v7954_v13, 0 }
 0xde0   :  { %6050 = vmatmul.msk.bf16.vlgmr.msrb.gmra.mxu3 %vm542_vm1, %v7819_v5  ;;  %6051 = vmatmul.msk.bf16.vlgmr.msrb.gmra.mxu0 %vm542_vm1, %v7819_v5 }
 0xde1   :  { %6052 = vmatmul.msk.bf16.vlgmr.msra.gmra.mxu1 %vm542_vm1, %v7819_v5  ;;  %6053 = vmatmul.msk.bf16.vlgmr.msra.gmra.mxu2 %vm542_vm1, %v7819_v5  ;;  %v6773_v5 = vld [vmem:[%s8224_s16 + $0x48] sm:$0xff] }
 0xde2   :  { %4322 = vmatpush.bf16.msra.mxu0 %v6775_v26  ;;  %4335 = vmatpush.bf16.msrb.mxu1 %v6783_v31  ;;  %v3102_v31 = vperm.slane %v7954_v13, 3 }
 0xde3   :  { %4309 = vmatpush.bf16.msra.mxu3 %v6767_v27  ;;  %4348 = vmatpush.bf16.msrb.mxu2 %v6791_v33  ;;  %v6843_v27 = vld [vmem:[%s8224_s16 + $0x278] sm:$0xff] }
 0xde6   :  { %4323 = vmatpush.bf16.msra.mxu0 %v6774_v28  ;;  %4336 = vmatpush.bf16.msrb.mxu1 %v6782_v34  ;;  %v6851_v28 = vld [vmem:[%s8224_s16 + $0x2b8] sm:$0xff] }
 0xde7   :  { %4310 = vmatpush.bf16.msra.mxu3 %v6766_v35  ;;  %4349 = vmatpush.bf16.msrb.mxu2 %v6790_v36 }
 0xdea   :  { %4324 = vmatpush.bf16.msra.mxu0 %v6773_v5  ;;  %4337 = vmatpush.bf16.msrb.mxu1 %v6781_v37 }
 0xdeb   :  { %4311 = vmatpush.bf16.msra.mxu3 %v6765_v39  ;;  %4350 = vmatpush.bf16.msrb.mxu2 %v6789_v40  ;;  %v6842_v40 = vld [vmem:[%s8224_s16 + $0x270] sm:$0xff] }
 0xdee   :  { %4325 = vmatpush.bf16.msra.mxu0 %v6772_v41  ;;  %4338 = vmatpush.bf16.msrb.mxu1 %v6780_v42 }
 0xdef   :  { %4312 = vmatpush.bf16.msra.mxu3 %v6764_v46  ;;  %4351 = vmatpush.bf16.msrb.mxu2 %v6788_v47  ;;  %v6835_v46 = vld [vmem:[%s8224_s16 + $0x238] sm:$0xff] }
 0xdf2   :  { %4370 = vmatpush.bf16.msrb.mxu0 %v6811_v30  ;;  %4383 = vmatpush.bf16.msra.mxu1 %v6819_v43  ;;  %v6850_v30 = vld [vmem:[%s8224_s16 + $0x2b0] sm:$0xff] }
 0xdf3   :  { %4357 = vmatpush.bf16.msrb.mxu3 %v6803_v48  ;;  %4396 = vmatpush.bf16.msra.mxu2 %v6827_v50  ;;  %v6859_v48 = vld [vmem:[%s8224_s16 + $0x2f8] sm:$0xff] }
 0xdf6   :  { %4371 = vmatpush.bf16.msrb.mxu0 %v6810_v20  ;;  %4384 = vmatpush.bf16.msra.mxu1 %v6818_v51  ;;  %v6841_v20 = vld [vmem:[%s8224_s16 + $0x268] sm:$0xff] }
 0xdf7   :  { %4358 = vmatpush.bf16.msrb.mxu3 %v6802_v52  ;;  %4397 = vmatpush.bf16.msra.mxu2 %v6826_v53  ;;  %v6849_v51 = vld [vmem:[%s8224_s16 + $0x2a8] sm:$0xff]  ;;  %v3104_v52 = vperm.slane %v7954_v13, 5 }
 0xdfa   :  { %4372 = vmatpush.bf16.msrb.mxu0 %v6809_v54  ;;  %4385 = vmatpush.bf16.msra.mxu1 %v6817_v55  ;;  %v3105_v54 = vperm.slane %v7954_v13, 6  ;;  %v6834_v55 = vld [vmem:[%s8224_s16 + $0x230] sm:$0xff] }
 0xdfb   :  { %4359 = vmatpush.bf16.msrb.mxu3 %v6801_v56  ;;  %4398 = vmatpush.bf16.msra.mxu2 %v6825_v57  ;;  %v6858_v57 = vld [vmem:[%s8224_s16 + $0x2f0] sm:$0xff] }
 0xdfe   :  { %4373 = vmatpush.bf16.msrb.mxu0 %v6808_v58  ;;  %4386 = vmatpush.bf16.msra.mxu1 %v6816_v60  ;;  %v6840_v60 = vld [vmem:[%s8224_s16 + $0x260] sm:$0xff] }
 0xdff   :  { %4360 = vmatpush.bf16.msrb.mxu3 %v6800_v61  ;;  %4399 = vmatpush.bf16.msra.mxu2 %v6824_v62 }
 0xe02   :  { %4374 = vmatpush.bf16.msrb.mxu0 %v6807_v63  ;;  %4387 = vmatpush.bf16.msra.mxu1 %v6815_v0  ;;  %v6848_v63 = vld [vmem:[%s8224_s16 + $0x2a0] sm:$0xff] }
 0xe03   :  { %4361 = vmatpush.bf16.msrb.mxu3 %v6799_v3  ;;  %4400 = vmatpush.bf16.msra.mxu2 %v6823_v4  ;;  %v6857_v3 = vld [vmem:[%s8224_s16 + $0x2e8] sm:$0xff]  ;;  %v3103_v4 = vperm.slane %v7954_v13, 4 }
 0xe06   :  { %4375 = vmatpush.bf16.msrb.mxu0 %v6806_v1  ;;  %4388 = vmatpush.bf16.msra.mxu1 %v6814_v2  ;;  %v6833_v1 = vld [vmem:[%s8224_s16 + $0x228] sm:$0xff] }
 0xe07   :  { %4362 = vmatpush.bf16.msrb.mxu3 %v6798_v7  ;;  %4401 = vmatpush.bf16.msra.mxu2 %v6822_v32  ;;  %v6839_v7 = vld [vmem:[%s8224_s16 + $0x258] sm:$0xff] }
 0xe0a   :  { %4376 = vmatpush.bf16.msrb.mxu0 %v6805_v59  ;;  %4389 = vmatpush.bf16.msra.mxu1 %v6813_v6  ;;  %v3106_v6 = vperm.slane %v7954_v13, 7 }
 0xe0b   :  { %4363 = vmatpush.bf16.msrb.mxu3 %v6797_v45  ;;  %4402 = vmatpush.bf16.msra.mxu2 %v6821_v10  ;;  %v6832_v10 = vld [vmem:[%s8224_s16 + $0x220] sm:$0xff] }
 0xe0e   :  { %4377 = vmatpush.bf16.msrb.mxu0 %v6804_v8  ;;  %4390 = vmatpush.bf16.msra.mxu1 %v6812_v9  ;;  %v6847_v8 = vld [vmem:[%s8224_s16 + $0x298] sm:$0xff] }
 0xe0f   :  { %4364 = vmatpush.bf16.msrb.mxu3 %v6796_v11  ;;  %4403 = vmatpush.bf16.msra.mxu2 %v6820_v12 }
 0xe2d   :  { %v3316_v17 = vpop.f32.mrf.mxu0 }
 0xe2e   :  { %v3317_v24 = vadd.f32 %v3316_v17, %v3100_v14  ;;  %v3329_v19 = vpop.f32.mrf.mxu1  ;;  %v6856_v14 = vld [vmem:[%s8224_s16 + $0x2e0] sm:$0xff]  ;;  %v6838_v17 = vld [vmem:[%s8224_s16 + $0x250] sm:$0xff] }
 0xe2f   :  { %v3330_v22 = vadd.f32 %v3329_v19, %v3101_v15 }
 0xe30   :  { %v3503_v23 = vmax.f32 %v3317_v24, 0.0 }
 0xe31   :  { %v3504_v26 = vmax.f32 %v3330_v22, 0.0  ;;  %v6846_v22 = vld [vmem:[%s8224_s16 + $0x290] sm:$0xff] }
 0xe32   :  { %v3519_v33 = vpack.c.bf16 %v3503_v23, %v3503_v23 }
 0xe33   :  { %v3520_v34 = vpack.c.bf16 %v3504_v26, %v3504_v26  ;;  %v3303_v35 = vpop.f32.mrf.mxu3  ;;  %v7986_v26 = vld [vmem:[%s8225_s18 + $0x8] sm:$0xff] }
 0xe34   :  { %v3304_v36 = vadd.f32 %v3303_v35, %v3099_v25  ;;  %v3342_v5 = vpop.f32.mrf.mxu2  ;;  %4326 = vmatmul.bf16.vlgmr.msra.gmra.mxu0 %v3519_v33  ;;  %v6831_v25 = vld [vmem:[%s8224_s16 + $0x218] sm:$0xff]  ;;  %v3108_v35 = vperm.slane %v7986_v26, 1 }
 0xe35   :  { %v3343_v37 = vadd.f32 %v3342_v5, %v3102_v31  ;;  %4339 = vmatmul.bf16.vlgmr.msrb.gmra.mxu1 %v3520_v34  ;;  %4422 = vmatpush.bf16.msra.mxu0 %v6843_v27  ;;  %v3318_v39 = vpop.f32.mrf.mxu0  ;;  %v6855_v27 = vld [vmem:[%s8224_s16 + $0x2d8] sm:$0xff]  ;;  %v6845_v34 = vld [vmem:[%s8224_s16 + $0x288] sm:$0xff]  ;;  %v3109_v5 = vperm.slane %v7986_v26, 2 }
 0xe36   :  { %v3502_v41 = vmax.f32 %v3304_v36, 0.0  ;;  %4435 = vmatpush.bf16.msrb.mxu1 %v6851_v28  ;;  %v3331_v42 = vpop.f32.mrf.mxu1  ;;  %v6837_v28 = vld [vmem:[%s8224_s16 + $0x248] sm:$0xff] }
 0xe37   :  { %v3505_v43 = vmax.f32 %v3343_v37, 0.0  ;;  %v6830_v37 = vld [vmem:[%s8224_s16 + $0x210] sm:$0xff]  ;;  %v6836_v42 = vld [vmem:[%s8224_s16 + $0x240] sm:$0xff] }
 0xe38   :  { %v3518_v47 = vpack.c.bf16 %v3502_v41, %v3502_v41 }
 0xe39   :  { %v3521_v50 = vpack.c.bf16 %v3505_v43, %v3505_v43  ;;  %4423 = vmatpush.bf16.msra.mxu0 %v6842_v40  ;;  %v6854_v40 = vld [vmem:[%s8224_s16 + $0x2d0] sm:$0xff] }
 0xe3a   :  { %4436 = vmatpush.bf16.msrb.mxu1 %v6850_v30  ;;  %4313 = vmatmul.bf16.vlgmr.msra.gmra.mxu3 %v3518_v47  ;;  %v6875_v47 = vld [vmem:[%s8224_s16 + $0x378] sm:$0xff] }
 0xe3b   :  { %4352 = vmatmul.bf16.vlgmr.msrb.gmra.mxu2 %v3521_v50  ;;  %4409 = vmatpush.bf16.msra.mxu3 %v6835_v46  ;;  %v3305_v53 = vpop.f32.mrf.mxu3  ;;  %v6844_v46 = vld [vmem:[%s8224_s16 + $0x280] sm:$0xff]  ;;  %v6883_v50 = vld [vmem:[%s8224_s16 + $0x3b8] sm:$0xff] }
 0xe3c   :  { %4448 = vmatpush.bf16.msrb.mxu2 %v6859_v48  ;;  %v3344_v56 = vpop.f32.mrf.mxu2  ;;  %v3107_v53 = vperm.slane %v7986_v26, 0 }
 0xe3d   :  { %4424 = vmatpush.bf16.msra.mxu0 %v6841_v20  ;;  %v3368_v58 = vpop.f32.mrf.mxu0  ;;  %v6829_v20 = vld [vmem:[%s8224_s16 + $0x208] sm:$0xff] }
 0xe3e   :  { %4437 = vmatpush.bf16.msrb.mxu1 %v6849_v51  ;;  %v3369_v61 = vadd.f32 %v3368_v58, %v3104_v52  ;;  %v3381_v62 = vpop.f32.mrf.mxu1  ;;  %v6853_v52 = vld [vmem:[%s8224_s16 + $0x2c8] sm:$0xff] }
 0xe3f   :  { %v3382_v0 = vadd.f32 %v3381_v62, %v3105_v54  ;;  %4410 = vmatpush.bf16.msra.mxu3 %v6834_v55  ;;  %v3110_v55 = vperm.slane %v7986_v26, 3  ;;  %v6828_v62 = vld [vmem:[%s8224_s16 + $0x200] sm:$0xff] }
 0xe40   :  { %v3507_v2 = vmax.f32 %v3369_v61, 0.0  ;;  %4449 = vmatpush.bf16.msrb.mxu2 %v6858_v57  ;;  %v6874_v57 = vld [vmem:[%s8224_s16 + $0x370] sm:$0xff] }
 0xe41   :  { %v3508_v59 = vmax.f32 %v3382_v0, 0.0  ;;  %4425 = vmatpush.bf16.msra.mxu0 %v6840_v60  ;;  %v6882_v61 = vld [vmem:[%s8224_s16 + $0x3b0] sm:$0xff] }
 0xe42   :  { %v3523_v32 = vpack.c.bf16 %v3507_v2, %v3507_v2  ;;  %4438 = vmatpush.bf16.msrb.mxu1 %v6848_v63  ;;  %v6867_v2 = vld [vmem:[%s8224_s16 + $0x338] sm:$0xff] }
 0xe43   :  { %v3524_v9 = vpack.c.bf16 %v3508_v59, %v3508_v59  ;;  %4411 = vmatpush.bf16.msra.mxu3 %v6833_v1  ;;  %v3355_v45 = vpop.f32.mrf.mxu3  ;;  %v6852_v1 = vld [vmem:[%s8224_s16 + $0x2c0] sm:$0xff]  ;;  %v6891_v59 = vld [vmem:[%s8224_s16 + $0x3f8] sm:$0xff] }
 0xe44   :  { %4450 = vmatpush.bf16.msrb.mxu2 %v6857_v3  ;;  %v3356_v11 = vadd.f32 %v3355_v45, %v3103_v4  ;;  %v3394_v12 = vpop.f32.mrf.mxu2  ;;  %4378 = vmatmul.bf16.vlgmr.msrb.gmra.mxu0 %v3523_v32  ;;  %v6873_v32 = vld [vmem:[%s8224_s16 + $0x368] sm:$0xff] }
 0xe45   :  { %v3395_v15 = vadd.f32 %v3394_v12, %v3106_v6  ;;  %4391 = vmatmul.bf16.vlgmr.msra.gmra.mxu1 %v3524_v9  ;;  %4426 = vmatpush.bf16.msra.mxu0 %v6839_v7  ;;  %v3370_v13 = vpop.f32.mrf.mxu0  ;;  %v6881_v9 = vld [vmem:[%s8224_s16 + $0x3a8] sm:$0xff]  ;;  %v6890_v12 = vld [vmem:[%s8224_s16 + $0x3f0] sm:$0xff] }
 0xe46   :  { %v3506_v24 = vmax.f32 %v3356_v11, 0.0  ;;  %4439 = vmatpush.bf16.msrb.mxu1 %v6847_v8  ;;  %v3383_v19 = vpop.f32.mrf.mxu1  ;;  %v6880_v13 = vld [vmem:[%s8224_s16 + $0x3a0] sm:$0xff] }
 0xe47   :  { %v3509_v23 = vmax.f32 %v3395_v15, 0.0  ;;  %4412 = vmatpush.bf16.msra.mxu3 %v6832_v10  ;;  %v6866_v10 = vld [vmem:[%s8224_s16 + $0x330] sm:$0xff] }
 0xe48   :  { %v3522_v31 = vpack.c.bf16 %v3506_v24, %v3506_v24  ;;  %4451 = vmatpush.bf16.msrb.mxu2 %v6856_v14  ;;  %v6872_v14 = vld [vmem:[%s8224_s16 + $0x360] sm:$0xff]  ;;  %v6865_v24 = vld [vmem:[%s8224_s16 + $0x328] sm:$0xff] }
 0xe49   :  { %v3525_v33 = vpack.c.bf16 %v3509_v23, %v3509_v23  ;;  %4427 = vmatpush.bf16.msra.mxu0 %v6838_v17 }
 0xe4a   :  { %4440 = vmatpush.bf16.msrb.mxu1 %v6846_v22  ;;  %4365 = vmatmul.bf16.vlgmr.msrb.gmra.mxu3 %v3522_v31  ;;  %v6889_v22 = vld [vmem:[%s8224_s16 + $0x3e8] sm:$0xff]  ;;  %v6879_v31 = vld [vmem:[%s8224_s16 + $0x398] sm:$0xff] }
 0xe4b   :  { %4404 = vmatmul.bf16.vlgmr.msra.gmra.mxu2 %v3525_v33  ;;  %4413 = vmatpush.bf16.msra.mxu3 %v6831_v25  ;;  %v3357_v36 = vpop.f32.mrf.mxu3  ;;  %v6871_v25 = vld [vmem:[%s8224_s16 + $0x358] sm:$0xff]  ;;  %v6888_v33 = vld [vmem:[%s8224_s16 + $0x3e0] sm:$0xff] }
 0xe4c   :  { %4452 = vmatpush.bf16.msrb.mxu2 %v6855_v27  ;;  %v3396_v39 = vpop.f32.mrf.mxu2  ;;  %v6864_v27 = vld [vmem:[%s8224_s16 + $0x320] sm:$0xff]  ;;  %v6878_v36 = vld [vmem:[%s8224_s16 + $0x390] sm:$0xff] }
 0xe4d   :  { %4428 = vmatpush.bf16.msra.mxu0 %v6837_v28  ;;  %v3420_v41 = vpop.f32.mrf.mxu0  ;;  %v6870_v28 = vld [vmem:[%s8224_s16 + $0x350] sm:$0xff]  ;;  %v6863_v39 = vld [vmem:[%s8224_s16 + $0x318] sm:$0xff] }
 0xe4e   :  { %4441 = vmatpush.bf16.msrb.mxu1 %v6845_v34  ;;  %v3421_v30 = vadd.f32 %v3420_v41, %v3108_v35  ;;  %v3433_v43 = vpop.f32.mrf.mxu1  ;;  %v3112_v34 = vperm.slane %v7986_v26, 5  ;;  %v6887_v41 = vld [vmem:[%s8224_s16 + $0x3d8] sm:$0xff] }
 0xe4f   :  { %v3434_v48 = vadd.f32 %v3433_v43, %v3109_v5  ;;  %4414 = vmatpush.bf16.msra.mxu3 %v6830_v37  ;;  %v3113_v5 = vperm.slane %v7986_v26, 6 }
 0xe50   :  { %v3511_v51 = vmax.f32 %v3421_v30, 0.0  ;;  %4453 = vmatpush.bf16.msrb.mxu2 %v6854_v40  ;;  %v6869_v30 = vld [vmem:[%s8224_s16 + $0x348] sm:$0xff] }
 0xe51   :  { %v3512_v54 = vmax.f32 %v3434_v48, 0.0  ;;  %4429 = vmatpush.bf16.msra.mxu0 %v6836_v42  ;;  %v6862_v48 = vld [vmem:[%s8224_s16 + $0x310] sm:$0xff] }
 0xe52   :  { %v3527_v56 = vpack.c.bf16 %v3511_v51, %v3511_v51  ;;  %4442 = vmatpush.bf16.msrb.mxu1 %v6844_v46  ;;  %v6877_v46 = vld [vmem:[%s8224_s16 + $0x388] sm:$0xff]  ;;  %v3114_v51 = vperm.slane %v7986_v26, 7 }
 0xe53   :  { %v3528_v58 = vpack.c.bf16 %v3512_v54, %v3512_v54  ;;  %4415 = vmatpush.bf16.msra.mxu3 %v6829_v20  ;;  %v3407_v60 = vpop.f32.mrf.mxu3  ;;  %v6886_v20 = vld [vmem:[%s8224_s16 + $0x3d0] sm:$0xff] }
 0xe54   :  { %4454 = vmatpush.bf16.msrb.mxu2 %v6853_v52  ;;  %v3408_v63 = vadd.f32 %v3407_v60, %v3107_v53  ;;  %v3446_v0 = vpop.f32.mrf.mxu2  ;;  %4430 = vmatmul.bf16.vlgmr.msra.gmra.mxu0 %v3527_v56  ;;  %v6868_v52 = vld [vmem:[%s8224_s16 + $0x340] sm:$0xff] }
 0xe55   :  { %4474 = vmatpush.bf16.msrb.mxu0 %v6875_v47  ;;  %v3447_v3 = vadd.f32 %v3446_v0, %v3110_v55  ;;  %4443 = vmatmul.bf16.vlgmr.msrb.gmra.mxu1 %v3528_v58  ;;  %v3422_v4 = vpop.f32.mrf.mxu0  ;;  %v6876_v55 = vld [vmem:[%s8224_s16 + $0x380] sm:$0xff]  ;;  %v6861_v58 = vld [vmem:[%s8224_s16 + $0x308] sm:$0xff] }
 0xe56   :  { %4487 = vmatpush.bf16.msra.mxu1 %v6883_v50  ;;  %v3510_v6 = vmax.f32 %v3408_v63, 0.0  ;;  %v3435_v7 = vpop.f32.mrf.mxu1  ;;  %v3111_v50 = vperm.slane %v7986_v26, 4  ;;  %v8038_v63 = vld [vmem:[%s8219_s12] sm:$0xff] }
 0xe57   :  { %v3513_v8 = vmax.f32 %v3447_v3, 0.0  ;;  %4416 = vmatpush.bf16.msra.mxu3 %v6828_v62  ;;  %v6884_v3 = vld [vmem:[%s8224_s16 + $0x3c0] sm:$0xff] }
 0xe58   :  { %v3526_v45 = vpack.c.bf16 %v3510_v6, %v3510_v6  ;;  %4455 = vmatpush.bf16.msrb.mxu2 %v6852_v1  ;;  %v6860_v1 = vld [vmem:[%s8224_s16 + $0x300] sm:$0xff] }
 0xe59   :  { %4475 = vmatpush.bf16.msrb.mxu0 %v6874_v57  ;;  %v3529_v11 = vpack.c.bf16 %v3513_v8, %v3513_v8 }
 0xe5a   :  { %4488 = vmatpush.bf16.msra.mxu1 %v6882_v61  ;;  %4417 = vmatmul.bf16.vlgmr.msra.gmra.mxu3 %v3526_v45  ;;  %v6885_v61 = vld [vmem:[%s8224_s16 + $0x3c8] sm:$0xff] }
 0xe5b   :  { %4461 = vmatpush.bf16.msrb.mxu3 %v6867_v2  ;;  %4456 = vmatmul.bf16.vlgmr.msrb.gmra.mxu2 %v3529_v11  ;;  %v3409_v15 = vpop.f32.mrf.mxu3 }
 0xe5c   :  { %4500 = vmatpush.bf16.msra.mxu2 %v6891_v59  ;;  %v3448_v17 = vpop.f32.mrf.mxu2  ;;  %v8045_v59 = vld [vmem:[%s8219_s12 + $0x8] sm:$0xff]  ;;  %s7106_s12 = smov 0.0  }
 0xe5d   :  { %4476 = vmatpush.bf16.msrb.mxu0 %v6873_v32  ;;  %v3472_v19 = vpop.f32.mrf.mxu0 }
 0xe5e   :  { %4489 = vmatpush.bf16.msra.mxu1 %v6881_v9  ;;  %v3485_v23 = vpop.f32.mrf.mxu1  ;;  %v3473_v43 = vadd.f32 %v3472_v19, %v3112_v34 }
 0xe5f   :  { %4462 = vmatpush.bf16.msrb.mxu3 %v6866_v10  ;;  %v3486_v47 = vadd.f32 %v3485_v23, %v3113_v5  ;;  %v6985_v10 = vld [vmem:[%s7272_s17] ss:$0 sm:$0xff]  ;;  %s7104_s17 = smov 120  }
 0xe60   :  { %4501 = vmatpush.bf16.msra.mxu2 %v6890_v12  ;;  %v3515_v53 = vmax.f32 %v3473_v43, 0.0 }
 0xe61   :  { %4477 = vmatpush.bf16.msrb.mxu0 %v6872_v14  ;;  %v3516_v56 = vmax.f32 %v3486_v47, 0.0 }
 0xe62   :  { %4490 = vmatpush.bf16.msra.mxu1 %v6880_v13  ;;  %v3531_v26 = vpack.c.bf16 %v3515_v53, %v3515_v53 }
 0xe63   :  { %4463 = vmatpush.bf16.msrb.mxu3 %v6865_v24  ;;  %v3459_v35 = vpop.f32.mrf.mxu3  ;;  %v3532_v0 = vpack.c.bf16 %v3516_v56, %v3516_v56 }
 0xe64   :  { %4502 = vmatpush.bf16.msra.mxu2 %v6889_v22  ;;  %v3498_v37 = vpop.f32.mrf.mxu2  ;;  %v3460_v60 = vadd.f32 %v3459_v35, %v3111_v50 }
 0xe65   :  { %4478 = vmatpush.bf16.msrb.mxu0 %v6871_v25  ;;  %v3474_v40 = vpop.f32.mrf.mxu0  ;;  %v3499_v62 = vadd.f32 %v3498_v37, %v3114_v51 }
 0xe66   :  { %4491 = vmatpush.bf16.msra.mxu1 %v6879_v31  ;;  %v3487_v42 = vpop.f32.mrf.mxu1  ;;  %v3514_v2 = vmax.f32 %v3460_v60, 0.0 }
 0xe67   :  { %4464 = vmatpush.bf16.msrb.mxu3 %v6864_v27  ;;  %v3517_v4 = vmax.f32 %v3499_v62, 0.0 }
 0xe68   :  { %4503 = vmatpush.bf16.msra.mxu2 %v6888_v33  ;;  %v3530_v6 = vpack.c.bf16 %v3514_v2, %v3514_v2 }
 0xe69   :  { %4479 = vmatpush.bf16.msrb.mxu0 %v6870_v28  ;;  %v3533_v7 = vpack.c.bf16 %v3517_v4, %v3517_v4 }
 0xe6a   :  { %4492 = vmatpush.bf16.msra.mxu1 %v6878_v36 }
 0xe6b   :  { %4465 = vmatpush.bf16.msrb.mxu3 %v6863_v39  ;;  %v3461_v54 = vpop.f32.mrf.mxu3 }
 0xe6c   :  { %4504 = vmatpush.bf16.msra.mxu2 %v6887_v41  ;;  %v3500_v57 = vpop.f32.mrf.mxu2 }
 0xe6d   :  { %4480 = vmatpush.bf16.msrb.mxu0 %v6869_v30 }
 0xe6e   :  { %4493 = vmatpush.bf16.msra.mxu1 %v6877_v46 }
 0xe6f   :  { %4466 = vmatpush.bf16.msrb.mxu3 %v6862_v48 }
 0xe70   :  { %4505 = vmatpush.bf16.msra.mxu2 %v6886_v20 }
 0xe71   :  { %4481 = vmatpush.bf16.msrb.mxu0 %v6868_v52 }
 0xe72   :  { %4494 = vmatpush.bf16.msra.mxu1 %v6876_v55  ;;  %v4550_v55 = vpop.xlane.xlu0 %4549 }
 0xe73   :  { %4467 = vmatpush.bf16.msrb.mxu3 %v6861_v58 }
 0xe74   :  { %4506 = vmatpush.bf16.msra.mxu2 %v6885_v61  ;;  %4482 = vmatmul.bf16.vlgmr.msrb.gmra.mxu0 %v3531_v26 }
 0xe75   :  { %6569 = vmatpush.xpose.msk.msra.mxu0 %vm542_vm1, %v8038_v63  ;;  %4495 = vmatmul.bf16.vlgmr.msra.gmra.mxu1 %v3532_v0 }
 0xe77   :  { %4468 = vmatpush.bf16.msrb.mxu3 %v6860_v1 }
 0xe78   :  { %4507 = vmatpush.bf16.msra.mxu2 %v6884_v3 }
 0xe79   :  { %6570 = vmatpush.xpose.msk.msra.mxu0 %vm542_vm1, %v8045_v59 }
 0xe7a   :  { %4469 = vmatmul.bf16.vlgmr.msrb.gmra.mxu3 %v3530_v6  ;;  %v4604_v1 = vpop.trf.xlu0 }
 0xe7b   :  { %6566 = vmatpush.xpose.msk.msra.mxu3 %vm542_vm1, %v8045_v59  ;;  %4508 = vmatmul.bf16.vlgmr.msra.gmra.mxu2 %v3533_v7  ;;  %v4620_v2 = vperm.slane %v4604_v1, 0 }
 0xe7d   :  { %v4621_v4 = vadd.f32 %v4620_v2, %v4550_v55 }
 0xe7f   :  { %6567 = vmatpush.xpose.msk.msra.mxu3 %vm542_vm1, %v8038_v63 }
 0xe8a   :  { %6568 = vmatmul.msk.f32.vlgmr.msra.gmra.mxu3 %vm542_vm1, %v7838_v44 }
 0xeb1   :  { %v4327_v32 = vpop.f32.mrf.mxu0 }
 0xeb2   :  { %v4340_v8 = vpop.f32.mrf.mxu1 }
 0xeb9   :  { %v4329_v9 = vpop.f32.mrf.mxu0 }
 0xeba   :  { %v4342_v45 = vpop.f32.mrf.mxu1 }
 0xebd   :  { %v4314_v11 = vpop.f32.mrf.mxu3 }
 0xebe   :  { %v4315_v12 = vadd.f32 %v6985_v10, %v4314_v11  ;;  %v4353_v14 = vpop.f32.mrf.mxu2 }
 0xec0   :  { %v4328_v15 = vadd.f32 %v4327_v32, %v4315_v12 }
 0xec1   :  { %v4379_v13 = vpop.f32.mrf.mxu0 }
 0xec2   :  { %v4341_v17 = vadd.f32 %v4340_v8, %v4328_v15  ;;  %v4392_v24 = vpop.f32.mrf.mxu1 }
 0xec4   :  { %v4354_v19 = vadd.f32 %v4353_v14, %v4341_v17 }
 0xec5   :  { %v4316_v22 = vpop.f32.mrf.mxu3 }
 0xec6   :  { %v4355_v23 = vpop.f32.mrf.mxu2 }
 0xec9   :  { %v4381_v25 = vpop.f32.mrf.mxu0 }
 0xeca   :  { %v4394_v31 = vpop.f32.mrf.mxu1 }
 0xecd   :  { %v4366_v27 = vpop.f32.mrf.mxu3 }
 0xece   :  { %v4367_v33 = vadd.f32 %v4366_v27, %v4354_v19  ;;  %v4405_v44 = vpop.f32.mrf.mxu2 }
 0xed0   :  { %v4380_v28 = vadd.f32 %v4379_v13, %v4367_v33 }
 0xed1   :  { %v4431_v34 = vpop.f32.mrf.mxu0 }
 0xed2   :  { %v4393_v35 = vadd.f32 %v4392_v24, %v4380_v28  ;;  %v4444_v36 = vpop.f32.mrf.mxu1 }
 0xed4   :  { %v4406_v5 = vadd.f32 %v4405_v44, %v4393_v35 }
 0xed5   :  { %v4368_v37 = vpop.f32.mrf.mxu3 }
 0xed6   :  { %v4407_v39 = vpop.f32.mrf.mxu2 }
 0xed7   :  { %v7105_v39 = vmov 8.0  }
 0xed9   :  { %v4433_v40 = vpop.f32.mrf.mxu0 }
 0xeda   :  { %v4446_v41 = vpop.f32.mrf.mxu1  ;;  %v4757_v40 = vsel %vm542_vm1, %v8038_v63, 0.0  ;;  %v8069_v63 = vld [vmem:[%s8223_s15 + $0x8] sm:$0xff] }
 0xedb   :  { %v7038_v41 = vld [vmem:[%s8223_s15] sm:$0xff]  ;;  %6571 = vmatmul.msk.f32.vlgmr.msra.gmra.mxu0 %vm542_vm1, %v8069_v63 }
 0xedd   :  { %v4418_v42 = vpop.f32.mrf.mxu3 }
 0xede   :  { %v4419_v30 = vadd.f32 %v4418_v42, %v4406_v5  ;;  %v4457_v43 = vpop.f32.mrf.mxu2  ;;  %v4742_v42 = vsel %vm542_vm1, %v7038_v41, 0.0 }
 0xee0   :  { %v4432_v46 = vadd.f32 %v4431_v34, %v4419_v30  ;;  %v4758_v30 = vrot.slane %v4757_v40, 4 }
 0xee2   :  { %v4445_v47 = vadd.f32 %v4444_v36, %v4432_v46 }
 0xee4   :  { %v4458_v48 = vadd.f32 %v4457_v43, %v4445_v47  ;;  %v4743_v43 = vrot.slane %v4742_v42, 4 }
 0xee5   :  { %v4420_v50 = vpop.f32.mrf.mxu3 }
 0xee6   :  { %v4459_v20 = vpop.f32.mrf.mxu2  ;;  %v4744_v47 = vadd.f32 %v4743_v43, %v4742_v42 }
 0xef1   :  { %v4483_v51 = vpop.f32.mrf.mxu0 }
 0xef2   :  { %v4496_v52 = vpop.f32.mrf.mxu1 }
 0xef9   :  { %v4485_v53 = vpop.f32.mrf.mxu0 }
 0xefa   :  { %v4498_v54 = vpop.f32.mrf.mxu1 }
 0xefb   :  { %v4745_v54 = vrot.slane %v4744_v47, 2 }
 0xefd   :  { %v4470_v56 = vpop.f32.mrf.mxu3 }
 0xefe   :  { %v4471_v57 = vadd.f32 %v4470_v56, %v4458_v48  ;;  %v4509_v58 = vpop.f32.mrf.mxu2  ;;  %v4759_v48 = vadd.f32 %v4758_v30, %v4757_v40 }
 0xf00   :  { %v4484_v60 = vadd.f32 %v4483_v51, %v4471_v57  ;;  %v4760_v55 = vrot.slane %v4759_v48, 2 }
 0xf02   :  { %v4497_v61 = vadd.f32 %v4496_v52, %v4484_v60  ;;  %v4761_v60 = vadd.f32 %v4760_v55, %v4759_v48 }
 0xf04   :  { %v8056_v62 = vadd.f32 %v4509_v58, %v4497_v61  ;;  %v4746_v58 = vadd.f32 %v4745_v54, %v4744_v47  ;;  %v4762_v1 = vrot.slane %v4761_v60, 1 }
 0xf05   :  { %v4472_v26 = vpop.f32.mrf.mxu3 }
 0xf06   :  { %v4511_v0 = vpop.f32.mrf.mxu2  ;;  %v8075_v57 = vadd.f32 %v8056_v62, %v7812_v21 }
 0xf07   :  { %v4747_v0 = vrot.slane %v4746_v58, 1 }
 0xf08   :  { %v4514_v26 = vsel %vm890_vm10, %v8075_v57, 0.0 }
 0xf0d   :  { %v4585_v3 = vpop.f32.mrf.mxu3 }
 0xf0e   :  { %v4622_v6 = vmul.f32 2.0, %v4585_v3  ;;  %v4748_v3 = vadd.f32 %v4747_v0, %v4746_v58 }
 0xf10   :  { %v4623_v7 = vsub.f32 %v4621_v4, %v4622_v6  ;;  %v4763_v4 = vadd.f32 %v4762_v1, %v4761_v60 }
 0xf12   :  { %v4624_v32 = vmax.f32 %v4623_v7, 0.0 }
 0xf14   :  { %7012 = vrsqrt.f32 %v4624_v32  ;;  %vm4632_vm4 = vcmp.eq.f32.partialorder %v4624_v32, inf  ;;  %v4635_v15 = vand.u32 2147483648, %v4624_v32  ;;  %vm4634_vm6 = vcmp.eq.f32.partialorder %v4624_v32, 0.0 }
 0xf15   :  { %7014 = vrcp.f32 %v7105_v39 }
 0xf1a   :  { %v7013_v8 = vpop.eup %7012 }
 0xf1b   :  { %v4626_v9 = vmul.f32 %v7013_v8, %v4624_v32  ;;  %v7015_v46 = vpop.eup %7014 }
 0xf1c   :  { %v4652_v51 = vmul.f32 8.0, %v7015_v46  ;;  %vm4656_vm13 = vweird.f32 %v7015_v46 }
 0xf1d   :  { %v4627_v45 = vmul.f32 %v7013_v8, %v4626_v9 }
 0xf1e   :  { %v4653_v56 = vsub.f32 1.0, %v4652_v51 }
 0xf1f   :  { %v4628_v10 = vmul.f32 0.5, %v4627_v45  ;;  %v4765_v45 = vsel %vm542_vm1, %v8045_v59, 0.0 }
 0xf20   :  { %v4654_v61 = vmul.f32 %v7015_v46, %v4653_v56 }
 0xf21   :  { %v4629_v11 = vsub.f32 1.5, %v4628_v10  ;;  %v4766_v10 = vrot.slane %v4765_v45, 4 }
 0xf22   :  { %v4655_v2 = vadd.f32 %v7015_v46, %v4654_v61 }
 0xf23   :  { %v4630_v12 = vmul.f32 %v7013_v8, %v4629_v11 }
 0xf24   :  { %v8080_v6 = vsel %vm4656_vm13, %v7015_v46, %v4655_v2 }
 0xf25   :  { %v4631_v14 = vmul.f32 %v4630_v12, %v4624_v32  ;;  %v4756_v21 = vmul.f32 %v4748_v3, %v8080_v6  ;;  %v8085_v62 = vmul.f32 %v4763_v4, %v8080_v6  ;;  %v4767_v12 = vadd.f32 %v4766_v10, %v4765_v45 }
 0xf27   :  { %v4633_v13 = vsel %vm4632_vm4, %v4624_v32, %v4631_v14  ;;  %v4773_v7 = vsub.f32 %v4756_v21, %v8085_v62  ;;  %v4768_v14 = vrot.slane %v4767_v12, 2 }
 0xf28   :  { %v4636_v17 = vsel %vm4634_vm6, %v4635_v15, %v4633_v13 }
 0xf29   :  { %v4689_v24 = vsel %vm4688_vm5, %v4636_v17, inf  ;;  %v4637_v19 = vsel %vm663_vm11, %v4636_v17, inf  ;;  %v4774_v8 = vmul.f32 %v4773_v7, %v4773_v7  ;;  %v4769_v15 = vadd.f32 %v4768_v14, %v4767_v12 }
 0xf2a   :  { %4690 = vmin.xlane.f32.xlu2 %v4689_v24  ;;  %4638 = vmin.xlane.f32.xlu1 %v4637_v19  ;;  %v4711_v22 = vrot.slane %v4689_v24, 4  ;;  %v4660_v44 = vrot.slane %v4637_v19, 4 }
 0xf2b   :  { %v4775_v9 = vsel %vm716_vm9, %v4774_v8, 0.0  ;;  %v4770_v13 = vrot.slane %v4769_v15, 1 }
 0xf2c   :  { %v4712_v23 = vmin.f32 %v4689_v24, %v4711_v22  ;;  %v4661_v28 = vmin.f32 %v4637_v19, %v4660_v44 }
 0xf2d   :  { %v4771_v17 = vadd.f32 %v4770_v13, %v4769_v15 }
 0xf2e   :  { %v4713_v25 = vrot.slane %v4712_v23, 2  ;;  %v4662_v34 = vrot.slane %v4661_v28, 2 }
 0xf2f   :  { %v8096_v24 = vmul.f32 %v4771_v17, %v8080_v6 }
 0xf30   :  { %v4714_v31 = vmin.f32 %v4712_v23, %v4713_v25  ;;  %v4663_v35 = vmin.f32 %v4661_v28, %v4662_v34 }
 0xf31   :  { %v4799_v19 = vsub.f32 %v4756_v21, %v8096_v24 }
 0xf32   :  { %v4715_v27 = vrot.slane %v4714_v31, 1  ;;  %v4664_v36 = vrot.slane %v4663_v35, 1 }
 0xf33   :  { %v4800_v22 = vmul.f32 %v4799_v19, %v4799_v19 }
 0xf34   :  { %v4716_v33 = vmin.f32 %v4714_v31, %v4715_v27  ;;  %v4665_v5 = vmin.f32 %v4663_v35, %v4664_v36 }
 0xf35   :  { %v4801_v59 = vsel %vm716_vm9, %v4800_v22, 0.0 }
 0xf36   :  { %v4667_v37 = vsel %vm4666_vm8, %v4665_v5, 0.0 }
 0xf43   :  { %4718 = vrot.lane.b32.xlu1 %v4716_v33, %s7104_s17 }
 0xf58   :  { %v4860_v2 = vpop.f32.mrf.mxu0 }
 0xf59   :  { %v4897_v7 = vmul.f32 2.0, %v4860_v2 }
 0xf6d   :  { %4668 = vadd.xlane.f32.xlu1 %v4667_v37 }
 0xf9d   :  { %v4691_v50 = vpop.xlane.xlu2 %4690  ;;  %v4639_v20 = vpop.xlane.xlu1 %4638 }
 0xf9e   :  { %v4692_v52 = vsel %vm4640_vm12, %v4691_v50, 0.0  ;;  %v4641_v53 = vsel %vm4640_vm12, %v4639_v20, 0.0 }
 0xf9f   :  { %4693 = vadd.xlane.f32.xlu2 %v4692_v52  ;;  %4642 = vadd.xlane.f32.xlu0 %v4641_v53 }
 0xfa7   :  { %4515 = vadd.xlane.f32.xlu0 %v4514_v26  ;;  %4863 = vxpose.xlu1.b32.start [1/2] (short) (narrow) %v7921_v49, 8 }
 0xfaf   :  { %4864 = vxpose.xlu1.b32.end [2/2] (short) (narrow) %v7907_v29, 8  ;;  %v4836_v29 = vmul.f32 %v8069_v63, %v8069_v63 }
 0xfb1   :  { %v4837_v11 = vsel %vm542_vm1, %v4836_v29, 0.0 }
 0xfb5   :  { %v4719_v32 = vpop.permute.xlu1 %4718 }
 0xfb6   :  { %v4721_v49 = vsel %vm4666_vm8, %v4719_v32, 0.0 }
 0xfb7   :  { %4722 = vadd.xlane.f32.xlu2 %v4721_v49 }
 0xfbf   :  { %4776 = vadd.xlane.f32.xlu2 %v4775_v9 }
 0xfc7   :  { %4838 = vadd.xlane.f32.xlu2 %v4837_v11 }
 0xfcf   :  { %4802 = vadd.xlane.f32.xlu2 %v4801_v59 }
 0xfe0   :  { %v4669_v23 = vpop.xlane.xlu1 %4668 }
 0xfe1   :  { %v4670_v25 = vrot.slane %v4669_v23, 4 }
 0xfe3   :  { %v4671_v31 = vadd.f32 %v4670_v25, %v4669_v23 }
 0xfe5   :  { %v4672_v44 = vrot.slane %v4671_v31, 2 }
 0xfe7   :  { %v4673_v39 = vadd.f32 %v4672_v44, %v4671_v31 }
 0xfe9   :  { %v4674_v30 = vrot.slane %v4673_v39, 1 }
 0xfeb   :  { %v4675_v48 = vadd.f32 %v4674_v30, %v4673_v39 }
0x1012   :  { %v4694_v27 = vpop.xlane.xlu2 %4693  ;;  %v4643_v33 = vpop.xlane.xlu0 %4642 }
0x1013   :  { %v4695_v28 = vrot.slane %v4694_v27, 4  ;;  %v4644_v34 = vrot.slane %v4643_v33, 4 }
0x1015   :  { %v4696_v35 = vadd.f32 %v4695_v28, %v4694_v27  ;;  %v4645_v36 = vadd.f32 %v4644_v34, %v4643_v33  ;;  %v8115_v27 = vadd.f32 %v7707_v16, %v7461_v38 }
0x1017   :  { %v4697_v5 = vrot.slane %v4696_v35, 2  ;;  %v4646_v37 = vrot.slane %v4645_v36, 2  ;;  %v2346_v34 = vsel %vm890_vm10, %v8115_v27, 0.0 }
0x1019   :  { %v4647_v40 = vadd.f32 %v4646_v37, %v4645_v36  ;;  %v4698_v41 = vadd.f32 %v4697_v5, %v4696_v35 }
0x101b   :  { %v4648_v42 = vrot.slane %v4647_v40, 1  ;;  %v4699_v43 = vrot.slane %v4698_v41, 1 }
0x101d   :  { %v4649_v46 = vadd.f32 %v4648_v42, %v4647_v40  ;;  %v4700_v47 = vadd.f32 %v4699_v43, %v4698_v41 }
0x101f   :  { %6892 = vpush %v4649_v46 }
0x1020   :  { %6894 = vpush %v8080_v6 }
0x1021   :  { %6896 = vpush %v4675_v48 }
0x1022   :  { %6898 = vpush %v4700_v47 }
0x102a   :  { %v4723_v50 = vpop.xlane.xlu2 %4722 }
0x102b   :  { %v4724_v20 = vrot.slane %v4723_v50, 4 }
0x102d   :  { %v4725_v51 = vadd.f32 %v4724_v20, %v4723_v50 }
0x102f   :  { %v4726_v52 = vrot.slane %v4725_v51, 2 }
0x1031   :  { %v4727_v53 = vadd.f32 %v4726_v52, %v4725_v51 }
0x1032   :  { %v4777_v54 = vpop.xlane.xlu2 %4776 }
0x1033   :  { %v4778_v55 = vrot.slane %v4777_v54, 4  ;;  %v4728_v56 = vrot.slane %v4727_v53, 1 }
0x1035   :  { %v4779_v58 = vadd.f32 %v4778_v55, %v4777_v54  ;;  %v4729_v60 = vadd.f32 %v4728_v56, %v4727_v53 }
0x1037   :  { %v4780_v61 = vrot.slane %v4779_v58, 2  ;;  %6900 = vpush %v4729_v60 }
0x1039   :  { %v4781_v26 = vadd.f32 %v4780_v61, %v4779_v58 }
0x103a   :  { %v4839_v4 = vpop.xlane.xlu2 %4838 }
0x103b   :  { %v4782_v0 = vrot.slane %v4781_v26, 1 }
0x103d   :  { %v4783_v1 = vadd.f32 %v4782_v0, %v4781_v26 }
0x103f   :  { %6902 = vpush %v4783_v1  ;;  %v5014_v1 = vsel %vm542_vm1, %v8069_v63, 0.0 }
0x1042   :  { %v4803_v22 = vpop.xlane.xlu2 %4802 }
0x1043   :  { %v4804_v59 = vrot.slane %v4803_v22, 4 }
0x1045   :  { %v4805_v31 = vadd.f32 %v4804_v59, %v4803_v22 }
0x1047   :  { %v4806_v44 = vrot.slane %v4805_v31, 2 }
0x1049   :  { %v4807_v5 = vadd.f32 %v4806_v44, %v4805_v31 }
0x104b   :  { %v4879_v3 = vpop.trf.xlu1  ;;  %v4808_v41 = vrot.slane %v4807_v5, 1 }
0x104c   :  { %v4895_v21 = vperm.slane %v4879_v3, 0  ;;  %v5015_v3 = vrot.slane %v5014_v1, 4 }
0x104d   :  { %v4809_v16 = vadd.f32 %v4808_v41, %v4807_v5 }
0x104e   :  { %v4896_v32 = vadd.f32 %v4895_v21, %v4839_v4 }
0x1050   :  { %v4898_v49 = vsub.f32 %v4896_v32, %v4897_v7  ;;  %s6893_s22 = spop %6892 }
0x1051   :  { %s8101_s23 = spop %6894 }
0x1052   :  { %v4899_v8 = vmax.f32 %v4898_v49, 0.0  ;;  %s4659_s26 = smul.f32 %s8101_s23, %s6893_s22  ;;  %s6897_s28 = spop %6896  ;;  %v5016_v49 = vadd.f32 %v5015_v3, %v5014_v1 }
0x1053   :  { %s4685_s1 = smul.f32 %s6897_s28, %s8101_s23  ;;  %s6899_s7 = spop %6898 }
0x1054   :  { %7016 = vrsqrt.f32 %v4899_v8  ;;  %vm4907_vm14 = vcmp.eq.f32.partialorder %v4899_v8, inf  ;;  %v4910_v15 = vand.u32 2147483648, %v4899_v8  ;;  %vm4909_vm15 = vcmp.eq.f32.partialorder %v4899_v8, 0.0  ;;  %s4710_s10 = smul.f32 %s6899_s7, %s8101_s23  ;;  %s8227_s22 = sld [smem:[#allocation12_spill]] }
0x1055   :  { %s8105_s2 = sadd.f32 %s4685_s1, %s4659_s26 }
0x1057   :  { %s4687_s25 = smul.f32 0.5, %s8105_s2 }
0x105a   :  { %v7017_v9 = vpop.eup %7016 }
0x105b   :  { %v4901_v45 = vmul.f32 %v7017_v9, %v4899_v8 }
0x105d   :  { %v4902_v29 = vmul.f32 %v7017_v9, %v4901_v45  ;;  %v5017_v45 = vrot.slane %v5016_v49, 2 }
0x105f   :  { %v4903_v10 = vmul.f32 0.5, %v4902_v29  ;;  %v5018_v29 = vadd.f32 %v5017_v45, %v5016_v49 }
0x1061   :  { %v4904_v11 = vsub.f32 1.5, %v4903_v10  ;;  %v5019_v10 = vrot.slane %v5018_v29, 1 }
0x1063   :  { %v4905_v12 = vmul.f32 %v7017_v9, %v4904_v11  ;;  %v5020_v11 = vadd.f32 %v5019_v10, %v5018_v29 }
0x1065   :  { %v4906_v14 = vmul.f32 %v4905_v12, %v4899_v8  ;;  %v5021_v63 = vmul.f32 %v5020_v11, %v8080_v6 }
0x1067   :  { %v4908_v13 = vsel %vm4907_vm14, %v4899_v8, %v4906_v14 }
0x1068   :  { %s6901_s11 = spop %6900  ;;  %v4911_v17 = vsel %vm4909_vm15, %v4910_v15, %v4908_v13  ;;  %v5022_v15 = vsub.f32 %v5021_v63, %v8096_v24 }
0x1069   :  { %s4739_s0 = smul.f32 %s6901_s11, %s8101_s23  ;;  %v4912_v19 = vsel %vm663_vm11, %v4911_v17, inf  ;;  %v4961_v25 = vsel %vm4688_vm5, %v4911_v17, inf }
0x106a   :  { %4913 = vmin.xlane.f32.xlu2 %v4912_v19  ;;  %v4983_v36 = vrot.slane %v4961_v25, 4  ;;  %v4934_v51 = vrot.slane %v4912_v19, 4 }
0x106b   :  { %s8110_s5 = sadd.f32 %s4739_s0, %s4710_s10 }
0x106c   :  { %v4984_v40 = vmin.f32 %v4961_v25, %v4983_v36  ;;  %v4935_v52 = vmin.f32 %v4912_v19, %v4934_v51  ;;  %v5023_v19 = vmul.f32 %v5022_v15, %v5022_v15 }
0x106d   :  { %s4741_s24 = smul.f32 0.5, %s8110_s5 }
0x106e   :  { %v4985_v43 = vrot.slane %v4984_v40, 2  ;;  %v4936_v53 = vrot.slane %v4935_v52, 2  ;;  %v5024_v22 = vsel %vm716_vm9, %v5023_v19, 0.0 }
0x1070   :  { %s6903_s21 = spop %6902  ;;  %v4986_v48 = vmin.f32 %v4984_v40, %v4985_v43  ;;  %v4937_v54 = vmin.f32 %v4935_v52, %v4936_v53 }
0x1071   :  { %v4785_v23 = vstv %s6903_s21 }
0x1072   :  { %7018 = vrsqrt.f32 %v4785_v23  ;;  %4962 = vmin.xlane.f32.xlu2 %v4961_v25  ;;  %vm4793_vm11 = vcmp.eq.f32.partialorder %v4785_v23, inf  ;;  %v4796_v38 = vand.u32 2147483648, %v4785_v23  ;;  %vm4795_vm3 = vcmp.eq.f32.partialorder %v4785_v23, 0.0  ;;  %v4516_v25 = vpop.xlane.xlu0 %4515 }
0x1073   :  { %v4987_v50 = vrot.slane %v4986_v48, 1  ;;  %v4938_v55 = vrot.slane %v4937_v54, 1  ;;  %v4517_v6 = vmul.f32 %v4516_v25, %v7412_v18 }
0x1075   :  { %v4988_v20 = vmin.f32 %v4986_v48, %v4987_v50  ;;  %v4939_v56 = vmin.f32 %v4937_v54, %v4938_v55  ;;  %v8139_v44 = vsub.f32 %v8075_v57, %v4517_v6  ;;  %v5048_v57 = vsub.f32 %v5021_v63, %v8085_v62 }
0x1077   :  { %v4940_v60 = vsel %vm4666_vm8, %v4939_v56, 0.0  ;;  %v5049_v36 = vmul.f32 %v5048_v57, %v5048_v57  ;;  %v6988_v57 = vld [vmem:[%s7277_s14] ss:$0 sm:$0xff] }
0x1078   :  { %v7019_v33 = vpop.eup %7018 }
0x1079   :  { %v4787_v28 = vmul.f32 %v7019_v33, %v4785_v23  ;;  %v5050_v5 = vsel %vm716_vm9, %v5049_v36, 0.0 }
0x107a   :  { %2347 = vadd.xlane.f32.xlu2 %v2346_v34 }
0x107b   :  { %v4788_v35 = vmul.f32 %v7019_v33, %v4787_v28 }
0x107d   :  { %v4789_v37 = vmul.f32 0.5, %v4788_v35  ;;  %v4519_v35 = vmul.f32 %v8139_v44, %v8139_v44 }
0x107f   :  { %v4790_v39 = vsub.f32 1.5, %v4789_v37 }
0x1081   :  { %v4791_v42 = vmul.f32 %v7019_v33, %v4790_v39 }
0x1083   :  { %v4792_v30 = vmul.f32 %v4791_v42, %v4785_v23 }
0x1085   :  { %v4794_v46 = vsel %vm4793_vm11, %v4785_v23, %v4792_v30 }
0x1086   :  { %v4797_v47 = vsel %vm4795_vm3, %v4796_v38, %v4794_v46 }
0x1087   :  { %6904 = vpush %v4797_v47 }
0x1088   :  { %6906 = vpush %v4809_v16 }
0x1092   :  { %4990 = vrot.lane.b32.xlu2 %v4988_v20, %s7104_s17  ;;  %s8226_s17 = sld [smem:[#allocation11_spill]] }
0x10b8   :  { %s6905_s13 = spop %6904 }
0x10b9   :  { %s8121_s29 = ssub.f32 %s4687_s25, %s6905_s13  ;;  %s6907_s8 = spop %6906 }
0x10ba   :  { %v4811_v58 = vstv %s6907_s8 }
0x10bb   :  { %7020 = vrsqrt.f32 %v4811_v58  ;;  %4941 = vadd.xlane.f32.xlu2 %v4940_v60  ;;  %vm4819_vm7 = vcmp.eq.f32.partialorder %v4811_v58, inf  ;;  %v4822_v7 = vand.u32 2147483648, %v4811_v58  ;;  %vm4821_vm0 = vcmp.eq.f32.partialorder %v4811_v58, 0.0  ;;  %s4826_s19 = sadd.f32 0.2, %s8121_s29 }
0x10bd   :  { %s4827_s20 = smax.f32 %s7106_s12, %s4826_s19 }
0x10be   :  { %s4828_s4 = smul.f32 0.25, %s4827_s20 }
0x10c1   :  { %v7021_v61 = vpop.eup %7020 }
0x10c2   :  { %v4813_v26 = vmul.f32 %v7021_v61, %v4811_v58 }
0x10c4   :  { %v4814_v0 = vmul.f32 %v7021_v61, %v4813_v26 }
0x10c6   :  { %v4815_v2 = vmul.f32 0.5, %v4814_v0 }
0x10c8   :  { %v4816_v4 = vsub.f32 1.5, %v4815_v2 }
0x10ca   :  { %v4817_v21 = vmul.f32 %v7021_v61, %v4816_v4 }
0x10cc   :  { %v4818_v32 = vmul.f32 %v4817_v21, %v4811_v58 }
0x10ce   :  { %v4820_v8 = vsel %vm4819_vm7, %v4811_v58, %v4818_v32  ;;  %vm5130_vm7 = vcmask 1024  }
0x10cf   :  { %v4823_v9 = vsel %vm4821_vm0, %v4822_v7, %v4820_v8 }
0x10d0   :  { %6908 = vpush %v4823_v9 }
0x10dd   :  { %v4914_v12 = vpop.xlane.xlu2 %4913 }
0x10de   :  { %v4915_v14 = vsel %vm4640_vm12, %v4914_v12, 0.0 }
0x10df   :  { %4916 = vadd.xlane.f32.xlu0 %v4915_v14 }
0x10e5   :  { %v4963_v13 = vpop.xlane.xlu2 %4962 }
0x10e6   :  { %v4964_v17 = vsel %vm4640_vm12, %v4963_v13, 0.0 }
0x10e7   :  { %4965 = vadd.xlane.f32.xlu0 %v4964_v17 }
0x10ed   :  { %v2348_v59 = vpop.xlane.xlu2 %2347 }
0x10ee   :  { %v2349_v23 = vmul.f32 %v2348_v59, %v7412_v18  ;;  %v6986_v59 = vld [vmem:[%s8226_s17] ss:$0 sm:$0xff] }
0x10ef   :  { %5025 = vadd.xlane.f32.xlu0 %v5024_v22 }
0x10f0   :  { %v8133_v31 = vsub.f32 %v8115_v27, %v2349_v23  ;;  %v4520_v27 = vsel %vm890_vm10, %v4519_v35, 0.0 }
0x10f2   :  { %v2351_v24 = vmul.f32 %v8133_v31, %v8133_v31 }
0x10f4   :  { %v2352_v28 = vsel %vm890_vm10, %v2351_v24, 0.0 }
0x10f5   :  { %v4991_v33 = vpop.permute.xlu2 %4990 }
0x10f6   :  { %v4993_v34 = vsel %vm4666_vm8, %v4991_v33, 0.0  ;;  %v6987_v33 = vld [vmem:[%s8227_s22] ss:$0 sm:$0xff]  ;;  %s7108_s22 = smov [#allocation2]  }
0x10f7   :  { %2353 = vadd.xlane.f32.xlu0 %v2352_v28  ;;  %4994 = vadd.xlane.f32.xlu1 %v4993_v34 }
0x10ff   :  { %4521 = vadd.xlane.f32.xlu0 %v4520_v27 }
0x1101   :  { %s6909_s30 = spop %6908 }
0x1102   :  { %s4830_s6 = ssub.f32 %s4741_s24, %s6909_s30 }
0x1104   :  { %s4831_s27 = sadd.f32 0.2, %s4830_s6 }
0x1106   :  { %s4832_s15 = smax.f32 %s7106_s12, %s4831_s27 }
0x1107   :  { %s4833_s16 = smul.f32 0.25, %s4832_s15  ;;  %5051 = vadd.xlane.f32.xlu0 %v5050_v5 }
0x1109   :  { %s8150_s18 = sadd.f32 %s4833_s16, %s4828_s4 }
0x112e   :  { %v4942_v37 = vpop.xlane.xlu2 %4941 }
0x112f   :  { %v4943_v39 = vrot.slane %v4942_v37, 4 }
0x1131   :  { %v4944_v40 = vadd.f32 %v4943_v39, %v4942_v37  ;;  %v6989_v37 = vld [vmem:[%s7282_s3] ss:$0 sm:$0xff] }
0x1133   :  { %v4945_v41 = vrot.slane %v4944_v40, 2 }
0x1135   :  { %v4946_v38 = vadd.f32 %v4945_v41, %v4944_v40 }
0x1137   :  { %v4947_v48 = vrot.slane %v4946_v38, 1 }
0x1139   :  { %v4948_v52 = vadd.f32 %v4947_v48, %v4946_v38 }
0x1152   :  { %v4917_v42 = vpop.xlane.xlu0 %4916 }
0x1153   :  { %v4918_v30 = vrot.slane %v4917_v42, 4 }
0x1155   :  { %v4919_v43 = vadd.f32 %v4918_v30, %v4917_v42 }
0x1157   :  { %v4920_v16 = vrot.slane %v4919_v43, 2 }
0x1159   :  { %v4921_v46 = vadd.f32 %v4920_v16, %v4919_v43 }
0x115a   :  { %v4966_v47 = vpop.xlane.xlu0 %4965 }
0x115b   :  { %v4967_v50 = vrot.slane %v4966_v47, 4  ;;  %v4922_v20 = vrot.slane %v4921_v46, 1 }
0x115d   :  { %v4968_v51 = vadd.f32 %v4967_v50, %v4966_v47  ;;  %v4923_v62 = vadd.f32 %v4922_v20, %v4921_v46 }
0x115f   :  { %v4969_v53 = vrot.slane %v4968_v51, 2  ;;  %6910 = vpush %v4923_v62 }
0x1160   :  { %6912 = vpush %v4948_v52 }
0x1161   :  { %v4970_v54 = vadd.f32 %v4969_v53, %v4968_v51 }
0x1162   :  { %v5026_v55 = vpop.xlane.xlu0 %5025 }
0x1163   :  { %v5027_v56 = vrot.slane %v5026_v55, 4  ;;  %v4971_v58 = vrot.slane %v4970_v54, 1 }
0x1165   :  { %v4972_v60 = vadd.f32 %v4971_v58, %v4970_v54  ;;  %v5028_v61 = vadd.f32 %v5027_v56, %v5026_v55 }
0x1167   :  { %6914 = vpush %v4972_v60  ;;  %v5029_v26 = vrot.slane %v5028_v61, 2 }
0x1169   :  { %v5030_v7 = vadd.f32 %v5029_v26, %v5028_v61 }
0x116a   :  { %v2354_v0 = vpop.xlane.xlu0 %2353  ;;  %v4995_v1 = vpop.xlane.xlu1 %4994 }
0x116b   :  { %v2355_v2 = vmul.f32 %v2354_v0, %v7412_v18  ;;  %v4996_v3 = vrot.slane %v4995_v1, 4  ;;  %v5031_v9 = vrot.slane %v5030_v7, 1 }
0x116d   :  { %v2356_v4 = vadd.f32 1e-05, %v2355_v2  ;;  %v4997_v21 = vadd.f32 %v4996_v3, %v4995_v1  ;;  %v5032_v63 = vadd.f32 %v5031_v9, %v5030_v7 }
0x116f   :  { %7022 = vrsqrt.f32 %v2356_v4  ;;  %v4998_v32 = vrot.slane %v4997_v21, 2  ;;  %vm2363_vm9 = vweird.f32 %v2356_v4 }
0x1171   :  { %v4999_v49 = vadd.f32 %v4998_v32, %v4997_v21 }
0x1172   :  { %v4522_v8 = vpop.xlane.xlu0 %4521 }
0x1173   :  { %v4523_v45 = vmul.f32 %v4522_v8, %v7412_v18  ;;  %v5000_v29 = vrot.slane %v4999_v49, 1 }
0x1175   :  { %v7023_v10 = vpop.eup %7022  ;;  %v4524_v11 = vadd.f32 1e-05, %v4523_v45  ;;  %v5001_v12 = vadd.f32 %v5000_v29, %v4999_v49 }
0x1176   :  { %v2358_v14 = vmul.f32 %v7023_v10, %v2356_v4  ;;  %vm2364_vm1 = vweird.f32 %v7023_v10 }
0x1177   :  { %7024 = vrsqrt.f32 %v4524_v11  ;;  %6916 = vpush %v5001_v12  ;;  %vm2365_vm4 = vmor %vm2363_vm9, %vm2364_vm1  ;;  %vm4531_vm6 = vweird.f32 %v4524_v11  ;;  %vm5152_vm1 = vcmask 0  }
0x1178   :  { %v2359_v15 = vmul.f32 %v7023_v10, %v2358_v14  ;;  %6918 = vpush %v5032_v63 }
0x117a   :  { %v2360_v13 = vmul.f32 0.5, %v2359_v15  ;;  %v5052_v50 = vpop.xlane.xlu0 %5051 }
0x117b   :  { %v5053_v20 = vrot.slane %v5052_v50, 4 }
0x117c   :  { %v2361_v17 = vsub.f32 1.5, %v2360_v13 }
0x117d   :  { %v7025_v19 = vpop.eup %7024  ;;  %v5054_v62 = vadd.f32 %v5053_v20, %v5052_v50 }
0x117e   :  { %v2362_v22 = vmul.f32 %v7023_v10, %v2361_v17  ;;  %v4526_v18 = vmul.f32 %v7025_v19, %v4524_v11  ;;  %vm4532_vm5 = vweird.f32 %v7025_v19 }
0x117f   :  { %vm4533_vm8 = vmor %vm4531_vm6, %vm4532_vm5  ;;  %v5055_v53 = vrot.slane %v5054_v62, 2 }
0x1180   :  { %v2366_v23 = vsel %vm2365_vm4, %v7023_v10, %v2362_v22  ;;  %v4527_v25 = vmul.f32 %v7025_v19, %v4526_v18 }
0x1181   :  { %v2367_v6 = vmul.f32 %v2366_v23, %v8133_v31  ;;  %v5056_v56 = vadd.f32 %v5055_v53, %v5054_v62 }
0x1182   :  { %v4528_v24 = vmul.f32 0.5, %v4527_v25 }
0x1183   :  { %v2371_v28 = vmul.f32 %v6986_v59, %v2367_v6  ;;  %v5057_v61 = vrot.slane %v5056_v56, 1 }
0x1184   :  { %v4529_v34 = vsub.f32 1.5, %v4528_v24 }
0x1185   :  { %v2375_v27 = vadd.f32 %v6987_v33, %v2371_v28  ;;  %v5058_v2 = vadd.f32 %v5057_v61, %v5056_v56 }
0x1186   :  { %v4530_v35 = vmul.f32 %v7025_v19, %v4529_v34 }
0x1187   :  { %v5086_v39 = vrot.slane %v2375_v27, 1  ;;  %v5088_v40 = vrot.slane %v2375_v27, 7 }
0x1188   :  { %v4534_v36 = vsel %vm4533_vm8, %v7025_v19, %v4530_v35 }
0x1189   :  { %v4535_v5 = vmul.f32 %v4534_v36, %v8139_v44  ;;  %v5090_v42 = vsel %vm860_vm2, %v5086_v39, %v5088_v40 }
0x118b   :  { %v4539_v41 = vmul.f32 %v6988_v57, %v4535_v5 }
0x118d   :  { %v4543_v31 = vadd.f32 %v6989_v37, %v4539_v41 }
0x118f   :  { %v5109_v30 = vsub.f32 %v4543_v31, %v5090_v42  ;;  %v5091_v43 = vsub.f32 %v4543_v31, %v2375_v27  ;;  %v7107_v42 = vmov 2.0  }
0x1190   :  { %s6911_s26 = spop %6910 }
0x1191   :  { %s4933_s28 = smul.f32 %s6911_s26, %s8101_s23  ;;  %s6913_s1 = spop %6912  ;;  %v5110_v38 = vadd.f32 1e-06, %v5109_v30  ;;  %v5092_v16 = vadd.f32 1e-06, %v5091_v43 }
0x1192   :  { %s4958_s14 = smul.f32 %s6913_s1, %s8101_s23  ;;  %s5159_s26 = sshll.u32 %s7108_s22, 4  ;;  %s5160_s26 = int_to_ptr.vmem [resolvable:$true] %s5159_s26 }
0x1193   :  { %v5111_v46 = vmul.f32 %v5110_v38, %v5110_v38  ;;  %v5093_v47 = vmul.f32 %v5092_v16, %v5092_v16  ;;  %s5161_s1 = sshll.u32 %s7287_s9, 4  ;;  %s5162_s1 = int_to_ptr.hbm [resolvable:$true] %s5161_s1 }
0x1194   :  { %s8165_s2 = sadd.f32 %s4958_s14, %s4933_s28 }
0x1195   :  { %v5112_v44 = vsel %vm890_vm10, %v5111_v46, 0.0  ;;  %v5094_v48 = vsel %vm890_vm10, %v5093_v47, 0.0 }
0x1196   :  { %5113 = vadd.xlane.f32.xlu0 %v5112_v44  ;;  %5095 = vadd.xlane.f32.xlu2 %v5094_v48 }
0x1198   :  { %s6915_s3 = spop %6914 }
0x1199   :  { %s4982_s7 = smul.f32 %s6915_s3, %s8101_s23 }
0x11a8   :  { %s6917_s10 = spop %6916 }
0x11a9   :  { %s5011_s11 = smul.f32 %s6917_s10, %s8101_s23  ;;  %s6919_s0 = spop %6918 }
0x11aa   :  { %v5034_v51 = vstv %s6919_s0  ;;  %s4960_s23 = smul.f32 0.5, %s8165_s2  ;;  %s7051_s2 = sshra.s32 %s5162_s1, 4  ;;  %s7052_s2 = int_to_ptr.hbm [resolvable:$true] %s7051_s2 }
0x11ab   :  { %s8171_s5 = sadd.f32 %s5011_s11, %s4982_s7  ;;  %7026 = vrsqrt.f32 %v5034_v51  ;;  %vm5042_vm2 = vcmp.eq.f32.partialorder %v5034_v51, inf  ;;  %v5045_v1 = vand.u32 2147483648, %v5034_v51  ;;  %vm5044_vm10 = vcmp.eq.f32.partialorder %v5034_v51, 0.0  ;;  %s7053_s3 = scalar_lea.hbm %s7052_s2, 1 }
0x11ac   :  { %p7054_p0 = scmp.ne.s32.totalorder %s7052_s2, %s7053_s3  ;;  %s7055_s7 = scalar_lea.hbm %s7287_s9, 1 }
0x11ad   :  { %s5013_s30 = smul.f32 0.5, %s8171_s5  ;;  %p7056_p1 = scmp.lt.s32.totalorder %s7052_s2, %s7287_s9 }
0x11ae   :  { %p7057_p2 = scmp.lt.s32.totalorder %s7055_s7, %s7053_s3 }
0x11b0   :  { %p7058_p3 = por %p7057_p2, %p7056_p1 }
0x11b1   :  { %v7027_v52 = vpop.eup %7026 }
0x11b2   :  { %v5036_v54 = vmul.f32 %v7027_v52, %v5034_v51  ;;  %p7059_p4 = pnand %p7058_p3, %p7054_p0 }
0x11b4   :  { %v5037_v55 = vmul.f32 %v7027_v52, %v5036_v54 }
0x11b6   :  { %v5038_v58 = vmul.f32 0.5, %v5037_v55 }
0x11b8   :  { %v5039_v60 = vsub.f32 1.5, %v5038_v58 }
0x11ba   :  { %v5040_v26 = vmul.f32 %v7027_v52, %v5039_v60 }
0x11bc   :  { %v5041_v0 = vmul.f32 %v5040_v26, %v5034_v51 }
0x11be   :  { %v5043_v3 = vsel %vm5042_vm2, %v5034_v51, %v5041_v0 }
0x11bf   :  { %v5046_v4 = vsel %vm5044_vm10, %v5045_v1, %v5043_v3 }
0x11c0   :  { %6920 = vpush %v5046_v4 }
0x11c1   :  { %6922 = vpush %v5058_v2 }
0x11f1   :  { %s6921_s21 = spop %6920 }
0x11f2   :  { %s5074_s25 = ssub.f32 %s4960_s23, %s6921_s21  ;;  %s6923_s13 = spop %6922 }
0x11f3   :  { %v5060_v21 = vstv %s6923_s13 }
0x11f4   :  { %s5075_s29 = sadd.f32 0.2, %s5074_s25  ;;  %7028 = vrsqrt.f32 %v5060_v21  ;;  %vm5068_vm12 = vcmp.eq.f32.partialorder %v5060_v21, inf  ;;  %v5071_v29 = vand.u32 2147483648, %v5060_v21  ;;  %vm5070_vm13 = vcmp.eq.f32.partialorder %v5060_v21, 0.0 }
0x11f6   :  { %s5076_s8 = smax.f32 %s7106_s12, %s5075_s29 }
0x11f7   :  { %s5077_s19 = smul.f32 0.25, %s5076_s8 }
0x11f9   :  { %s8176_s24 = sadd.f32 %s5077_s19, %s8150_s18 }
0x11fa   :  { %v7029_v7 = vpop.eup %7028 }
0x11fb   :  { %v5062_v32 = vmul.f32 %v7029_v7, %v5060_v21 }
0x11fd   :  { %v5063_v49 = vmul.f32 %v7029_v7, %v5062_v32 }
0x11ff   :  { %v5064_v8 = vmul.f32 0.5, %v5063_v49 }
0x1201   :  { %v5065_v9 = vsub.f32 1.5, %v5064_v8 }
0x1203   :  { %v5066_v45 = vmul.f32 %v7029_v7, %v5065_v9 }
0x1205   :  { %v5067_v10 = vmul.f32 %v5066_v45, %v5060_v21 }
0x1207   :  { %v5069_v11 = vsel %vm5068_vm12, %v5060_v21, %v5067_v10 }
0x1208   :  { %v5072_v12 = vsel %vm5070_vm13, %v5071_v29, %v5069_v11 }
0x1209   :  { %6924 = vpush %v5072_v12  ;;  %v5114_v14 = vpop.xlane.xlu0 %5113  ;;  %v5096_v63 = vpop.xlane.xlu2 %5095 }
0x120a   :  { %7030 = vrsqrt.f32 %v5114_v14  ;;  %vm5122_vm14 = vcmp.eq.f32.partialorder %v5114_v14, inf  ;;  %v5125_v35 = vand.u32 2147483648, %v5114_v14  ;;  %vm5104_vm15 = vcmp.eq.f32.partialorder %v5096_v63, inf }
0x120b   :  { %7032 = vrsqrt.f32 %v5096_v63  ;;  %v5107_v27 = vand.u32 2147483648, %v5096_v63  ;;  %vm5124_vm11 = vcmp.eq.f32.partialorder %v5114_v14, 0.0  ;;  %vm5106_vm3 = vcmp.eq.f32.partialorder %v5096_v63, 0.0 }
0x120c   :  { %7034 = vrcp.f32 %v7107_v42 }
0x1210   :  { %v7031_v15 = vpop.eup %7030 }
0x1211   :  { %v7033_v13 = vpop.eup %7032  ;;  %v5116_v17 = vmul.f32 %v7031_v15, %v5114_v14 }
0x1212   :  { %v5098_v19 = vmul.f32 %v7033_v13, %v5096_v63  ;;  %v7035_v30 = vpop.eup %7034 }
0x1213   :  { %v5117_v22 = vmul.f32 %v7031_v15, %v5116_v17  ;;  %v5142_v43 = vmul.f32 2.0, %v7035_v30  ;;  %vm5146_vm0 = vweird.f32 %v7035_v30 }
0x1214   :  { %v5099_v18 = vmul.f32 %v7033_v13, %v5098_v19 }
0x1215   :  { %v5118_v59 = vmul.f32 0.5, %v5117_v22  ;;  %v5143_v38 = vsub.f32 1.0, %v5142_v43 }
0x1216   :  { %v5100_v23 = vmul.f32 0.5, %v5099_v18 }
0x1217   :  { %v5119_v25 = vsub.f32 1.5, %v5118_v59  ;;  %v5144_v44 = vmul.f32 %v7035_v30, %v5143_v38 }
0x1218   :  { %v5101_v6 = vsub.f32 1.5, %v5100_v23 }
0x1219   :  { %v5120_v24 = vmul.f32 %v7031_v15, %v5119_v25  ;;  %v5145_v20 = vadd.f32 %v7035_v30, %v5144_v44 }
0x121a   :  { %v5102_v33 = vmul.f32 %v7033_v13, %v5101_v6 }
0x121b   :  { %v5121_v28 = vmul.f32 %v5120_v24, %v5114_v14  ;;  %v5147_v52 = vsel %vm5146_vm0, %v7035_v30, %v5145_v20 }
0x121c   :  { %v5103_v34 = vmul.f32 %v5102_v33, %v5096_v63 }
0x121d   :  { %v5123_v57 = vsel %vm5122_vm14, %v5114_v14, %v5121_v28 }
0x121e   :  { %v5105_v36 = vsel %vm5104_vm15, %v5096_v63, %v5103_v34  ;;  %v5126_v5 = vsel %vm5124_vm11, %v5125_v35, %v5123_v57 }
0x121f   :  { %v5108_v37 = vsel %vm5106_vm3, %v5107_v27, %v5105_v36 }
0x1220   :  { %v5127_v39 = vsub.f32 %v5108_v37, %v5126_v5 }
0x1222   :  { %v5128_v40 = vadd.f32 0.2, %v5127_v39 }
0x1224   :  { %v5129_v41 = vmax.f32 %v5128_v40, 0.0 }
0x1226   :  { %v5131_v31 = vsel %vm5130_vm7, %v5129_v41, 0.0 }
0x1227   :  { %5132 = vadd.xlane.f32.xlu2 %v5131_v31 }
0x123a   :  { %s6925_s6 = spop %6924 }
0x123b   :  { %s5079_s20 = ssub.f32 %s5013_s30, %s6925_s6 }
0x123d   :  { %s5080_s27 = sadd.f32 0.2, %s5079_s20 }
0x123f   :  { %s5081_s4 = smax.f32 %s7106_s12, %s5080_s27 }
0x1240   :  { %s5082_s15 = smul.f32 0.25, %s5081_s4 }
0x1242   :  { %s5083_s16 = sadd.f32 %s5082_s15, %s8176_s24 }
0x1244   :  { %s5084_s18 = smul.f32 0.5, %s5083_s16 }
0x129a   :  { %v5133_v16 = vpop.xlane.xlu2 %5132 }
0x129b   :  { %v5134_v46 = vrot.slane %v5133_v16, 4 }
0x129d   :  { %v5135_v47 = vadd.f32 %v5134_v46, %v5133_v16 }
0x129f   :  { %v5136_v48 = vrot.slane %v5135_v47, 2 }
0x12a1   :  { %v5137_v50 = vadd.f32 %v5136_v48, %v5135_v47 }
0x12a3   :  { %v5138_v51 = vrot.slane %v5137_v50, 1 }
0x12a5   :  { %v5139_v62 = vadd.f32 %v5138_v51, %v5137_v50 }
0x12a7   :  { %6926 = vpush %v5139_v62 }
0x12a8   :  { %6928 = vpush %v5147_v52 }
0x12d8   :  { %s6927_s12 = spop %6926 }
0x12d9   :  { %s6929_s17 = spop %6928 }
0x12da   :  { %s5149_s28 = smul.f32 %s6929_s17, %s6927_s12 }
0x12dc   :  { %s5150_s14 = sadd.f32 %s5149_s28, %s5084_s18 }
0x12de   :  { %v5151_v53 = vstv %s5150_s14 }
0x12df   :  { %5153 = vst.msk [vmem:[#allocation2] sm:$0x1] %vm5152_vm1, %v5151_v53 }
0x12e0   :  { %7062 = shalt.err (!%p7059_p4)
}
0x12e1   :  { %5164 = dma.vmem_to_hbm [thread:$0]  %s5160_s26, 16, %s5162_s1, [#allocation3]  }
0x12e2   :  { %7063 = dma.done.wait [#allocation3], 16  }
0x12e3   :  { %7064 = vsyncadd [#allocation3], 4294967280 }
0x12e4   :  { %5169 = vsyncpa [#allocation3], 1 }

</bundles_post_ra>
